<compile_context>
chip_gen: v7x
topology: tpu7x:2x2x1
jax: 0.10.0
libtpu: 0.0.40
codegen_flags: <defaults>
</compile_context>

<pallas_src>
import numpy as np
import jax
import jax.numpy as jnp
from jax.experimental import pallas as pl
from jax.experimental.pallas import tpu as pltpu


# ----------------------------------------------------------------------------
# Host-side static index helpers (trace-time constants)
# ----------------------------------------------------------------------------
def _fractional_pool_starts(input_size, output_size, pool_size=2, sample=0.0):
    """Deterministic version of PyTorch's generate_intervals (fixed sample)."""
    seq = np.zeros((output_size,), dtype=np.int32)
    if output_size > 1:
        alpha = (input_size - pool_size) / (output_size - 1)
        for i in range(output_size - 1):
            seq[i] = int((i + sample) * alpha) - int(sample * alpha)
    seq[output_size - 1] = input_size - pool_size
    return seq


def _nearest_upsample_src(in_size, out_size):
    scale = in_size / out_size
    idx = np.floor(np.arange(out_size) * scale).astype(np.int32)
    return np.minimum(idx, in_size - 1)


def _runs_from_src(src, n_src):
    """For each source index a, the contiguous [start, end) of outputs it feeds."""
    runs = []
    for a in range(n_src):
        pos = np.nonzero(src == a)[0]
        assert pos.size > 0, "every source index must be selected at least once"
        assert pos[-1] - pos[0] + 1 == pos.size, "runs must be contiguous"
        runs.append((int(pos[0]), int(pos[-1]) + 1))
    return runs


def _round_up(v, m):
    return ((v + m - 1) // m) * m


def _vmem_block_bytes(shape, dtype):
    """Rough VMEM footprint of one (8,128)-tiled block."""
    shape = tuple(int(s) for s in shape)
    itemsize = np.dtype(dtype).itemsize
    if len(shape) < 2:
        return _round_up(int(np.prod(shape, dtype=np.int64)) * itemsize, 4096)
    lead = 1
    for s in shape[:-2]:
        lead *= s
    return lead * _round_up(shape[-2], 8) * _round_up(shape[-1], 128) * itemsize


# ----------------------------------------------------------------------------
# Pallas kernel: per sample, all cards (conv + nearest upsample + sum)
# ----------------------------------------------------------------------------
def _make_pyramid_kernel(card_meta, R, D):
    C = len(card_meta)

    def kernel(*refs):
        # refs = [slab_0, sel_0, ..., slab_{C-1}, sel_{C-1},
        #         w_all, bias_row, o_ref, col3_0..col3_{C-1}, wide_ref]
        w_ref = refs[2 * C]              # (C, 3, 3*D, D) bf16
        b_ref = refs[2 * C + 1]          # (1, R*D)       f32
        o_ref = refs[2 * C + 2]          # (R, R*D)       f32 (one sample)
        col3_refs = refs[2 * C + 3: 2 * C + 3 + C]
        wide_ref = refs[2 * C + 3 + C]   # (hc_max, R*D)  bf16

        # Bias folded into the accumulator init (nearest-upsampling a constant
        # bias map reproduces the constant); the output is stored exactly once.
        total = jnp.broadcast_to(b_ref[...], (R, R * D))

        for c, meta in enumerate(card_meta):
            hc, wc, wcp = meta["hc"], meta["wc"], meta["wcp"]
            slab_ref = refs[2 * c]       # (hc+2, wpad, D) bf16 padded pooled map
            sel_ref = refs[2 * c + 1]    # (R, hc)         bf16 one-hot rows
            col3_ref = col3_refs[c]      # (hc+2, wcp, 3*D) bf16 scratch

            # --- three W-shifted copies, lane-concatenated as (dj*D + ci) ----
            for dj in range(3):
                col3_ref[:, :, dj * D:(dj + 1) * D] = slab_ref[:, dj:dj + wcp, :]

            # --- 3x3 conv as 3 MXU matmuls with K = 3*D ----------------------
            # H-slices of col3 are sublane-free; the reshape is layout
            # preserving because wcp % 8 == 0 and W is the full scratch extent.
            acc = None
            for di in range(3):
                patch = col3_ref[di:di + hc, :, :].reshape(hc * wcp, 3 * D)
                part = jnp.dot(patch, w_ref[c, di],
                               preferred_element_type=jnp.float32)
                acc = part if acc is None else acc + part
            conv = acc.reshape(hc, wcp, D).astype(jnp.bfloat16)
            # columns >= wc of `conv` are never read below.

            # --- width-axis nearest upsample: static run copies --------------
            # (run lengths are 1 or 2 since the smallest pool ratio is 0.5)
            for b, (xs, xe) in enumerate(meta["x_runs"]):
                col_val = conv[:, b, :]                          # (hc, D)
                if xe - xs > 1:
                    col_val = jnp.concatenate([col_val] * (xe - xs), axis=1)
                wide_ref[0:hc, xs * D:xe * D] = col_val

            # --- row-axis nearest upsample: exact one-hot MXU matmul ---------
            total = total + jnp.dot(sel_ref[...], wide_ref[0:hc, :],
                                    preferred_element_type=jnp.float32)

        o_ref[...] = total

    return kernel


# ----------------------------------------------------------------------------
# Wrapper: pooling gather, compact bf16 slabs, static tables, pallas_call
# ----------------------------------------------------------------------------
def pyramid_forward(x_nchw, weights, biases, D, cardinality, input_res):
    N = x_nchw.shape[0]
    R = input_res
    x = jnp.transpose(x_nchw, (0, 2, 3, 1)).astype(jnp.float32)   # NHWC
    scale = 2.0 ** (-1.0 / cardinality)

    kernel_inputs, in_specs, card_meta = [], [], []
    vmem = 0
    for card in range(cardinality):
        ratio = scale ** (card + 1)
        hc = int(R * ratio)
        wc = int(R * ratio)
        assert hc >= 3 and wc >= 3, "cardinality too large for input_res"
        wcp = _round_up(wc, 8)          # conv width, sublane aligned
        wpad = wcp + 8                  # slab width: zero ring + dj<=2 shifts

        # Fractional max pool (2x2) with deterministic static start indices.
        rs = _fractional_pool_starts(R, hc)
        cs = _fractional_pool_starts(R, wc)
        g = lambda a, b: x[:, rs + a][:, :, cs + b]
        pooled = jnp.maximum(jnp.maximum(g(0, 0), g(0, 1)),
                             jnp.maximum(g(1, 0), g(1, 1)))       # (N,hc,wc,D)

        # Compact bf16 zero-padded slab: the zero ring is conv padding=1;
        # extra right-hand zero columns keep in-kernel shapes tile aligned.
        slab = jnp.zeros((N, hc + 2, wpad, D), jnp.bfloat16)
        slab = slab.at[:, 1:hc + 1, 1:wc + 1, :].set(pooled.astype(jnp.bfloat16))

        # Static nearest-upsample maps.
        sy = _nearest_upsample_src(hc, R)
        sx = _nearest_upsample_src(wc, R)
        assert set(sy.tolist()) == set(range(hc))
        sel = np.zeros((R, hc), np.float32)
        sel[np.arange(R), sy] = 1.0                  # one-hot row selector

        card_meta.append(dict(hc=hc, wc=wc, wcp=wcp,
                              x_runs=_runs_from_src(sx, wc)))

        kernel_inputs.append(slab)
        kernel_inputs.append(jnp.asarray(sel, jnp.bfloat16))
        in_specs.append(pl.BlockSpec((None, hc + 2, wpad, D),
                                     lambda n: (n, 0, 0, 0)))
        in_specs.append(pl.BlockSpec((R, hc), lambda n: (0, 0)))
        vmem += 2 * _vmem_block_bytes((hc + 2, wpad, D), jnp.bfloat16)
        vmem += 2 * _vmem_block_bytes((R, hc), jnp.bfloat16)

    # Stacked per-card conv weights, (card, di, dj*D + ci, co) layout, bf16.
    w_all = weights.astype(jnp.bfloat16).reshape(cardinality, 3, 3 * D, D)
    kernel_inputs.append(w_all)
    in_specs.append(pl.BlockSpec((cardinality, 3, 3 * D, D),
                                 lambda n: (0, 0, 0, 0)))
    vmem += 2 * _vmem_block_bytes((cardinality, 3, 3 * D, D), jnp.bfloat16)

    # Summed biases, tiled to the lane-merged (x*D + d) output layout (f32).
    bias_sum = jnp.sum(biases.astype(jnp.float32), axis=0)          # (D,)
    bias_row = jnp.tile(bias_sum, R).reshape(1, R * D)
    kernel_inputs.append(bias_row)
    in_specs.append(pl.BlockSpec((1, R * D), lambda n: (0, 0)))
    vmem += 2 * _vmem_block_bytes((1, R * D), jnp.float32)

    hc_max = max(m["hc"] for m in card_meta)
    scratch_shapes = [pltpu.VMEM((m["hc"] + 2, m["wcp"], 3 * D), jnp.bfloat16)
                      for m in card_meta]
    scratch_shapes.append(pltpu.VMEM((hc_max, R * D), jnp.bfloat16))
    for m in card_meta:
        vmem += _vmem_block_bytes((m["hc"] + 2, m["wcp"], 3 * D), jnp.bfloat16)
    vmem += _vmem_block_bytes((hc_max, R * D), jnp.bfloat16)
    vmem += 2 * _vmem_block_bytes((R, R * D), jnp.float32)       # output block

    # Explicit VMEM budget (fits all generations; v7x physical is 64 MiB).
    vmem_limit = int(min(max(2 * vmem + (2 << 20), 8 << 20), 48 << 20))

    out2d = pl.pallas_call(
        _make_pyramid_kernel(card_meta, R, D),
        out_shape=jax.ShapeDtypeStruct((N, R, R * D), jnp.float32),
        grid=(N,),
        in_specs=in_specs,
        out_specs=pl.BlockSpec((None, R, R * D), lambda n: (n, 0, 0)),
        scratch_shapes=scratch_shapes,
        compiler_params=pltpu.CompilerParams(
            dimension_semantics=("parallel",),       # batch across TCs (v7x)
            vmem_limit_bytes=vmem_limit),
    )(*kernel_inputs)

    out = out2d.reshape(N, R, R, D)
    return jnp.transpose(out, (0, 3, 1, 2))           # back to NCHW


# ----------------------------------------------------------------------------
# Pure-JAX reference (same deterministic pooling/upsampling) for sanity check
# ----------------------------------------------------------------------------
def pyramid_ref(x_nchw, weights, biases, D, cardinality, input_res):
    R = input_res
    x = jnp.transpose(x_nchw, (0, 2, 3, 1)).astype(jnp.float32)
    scale = 2.0 ** (-1.0 / cardinality)
    out = jnp.zeros_like(x)
    for card in range(cardinality):
        ratio = scale ** (card + 1)
        hc, wc = int(R * ratio), int(R * ratio)
        rs = _fractional_pool_starts(R, hc)
        cs = _fractional_pool_starts(R, wc)
        g = lambda a, b: x[:, rs + a][:, :, cs + b]
        pooled = jnp.maximum(jnp.maximum(g(0, 0), g(0, 1)),
                             jnp.maximum(g(1, 0), g(1, 1)))
        conv = jax.lax.conv_general_dilated(
            pooled, weights[card].astype(jnp.float32),
            window_strides=(1, 1), padding=((1, 1), (1, 1)),
            dimension_numbers=("NHWC", "HWIO", "NHWC")) + biases[card]
        sy = _nearest_upsample_src(hc, R)
        sx = _nearest_upsample_src(wc, R)
        out = out + conv[:, sy][:, :, sx]
    return jnp.transpose(out, (0, 3, 1, 2))


if __name__ == "__main__":
    D, cardinality, input_res, N = 4, 3, 16, 2

    key = jax.random.PRNGKey(0)
    kx, kw, kb = jax.random.split(key, 3)
    x = jax.random.normal(kx, (N, D, input_res, input_res), jnp.float32)
    weights = 0.1 * jax.random.normal(
        kw, (cardinality, 3, 3, D, D), jnp.float32)   # HWIO per card
    biases = 0.1 * jax.random.normal(kb, (cardinality, D), jnp.float32)

    out = pyramid_forward(x, weights, biases, D, cardinality, input_res)
    out = jax.block_until_ready(out)
    assert out.shape == x.shape

    # The kernel runs its matmuls on bf16 operands (f32 accumulation), so
    # compare against an f32 reference fed the same bf16-rounded x / weights.
    x_r = x.astype(jnp.bfloat16).astype(jnp.float32)
    w_r = weights.astype(jnp.bfloat16).astype(jnp.float32)
    ref = pyramid_ref(x_r, w_r, biases, D, cardinality, input_res)
    np.testing.assert_allclose(np.asarray(out), np.asarray(ref),
                               rtol=2e-2, atol=5e-2)
    print("KERNEL_OK")
</pallas_src>

<mosaic_0001>
module attributes {stable_mosaic.version = 11 : i64} {
  func.func @kernel(%arg0: i32, %arg1: memref<1x14x24x4xbf16, #tpu.memory_space<vmem>>, %arg2: memref<16x12xbf16, #tpu.memory_space<vmem>>, %arg3: memref<1x12x24x4xbf16, #tpu.memory_space<vmem>>, %arg4: memref<16x10xbf16, #tpu.memory_space<vmem>>, %arg5: memref<1x10x16x4xbf16, #tpu.memory_space<vmem>>, %arg6: memref<16x8xbf16, #tpu.memory_space<vmem>>, %arg7: memref<3x3x12x4xbf16, #tpu.memory_space<vmem>>, %arg8: memref<1x64xf32, #tpu.memory_space<vmem>>, %arg9: memref<1x16x64xf32, #tpu.memory_space<vmem>>, %arg10: memref<14x16x12xbf16, #tpu.memory_space<vmem>>, %arg11: memref<12x16x12xbf16, #tpu.memory_space<vmem>>, %arg12: memref<10x8x12xbf16, #tpu.memory_space<vmem>>, %arg13: memref<12x64xbf16, #tpu.memory_space<vmem>>) attributes {dimension_semantics = [#tpu.dimension_semantics<parallel>], iteration_bounds = array<i64: 2>, scalar_prefetch = 0 : i64, scratch_operands = 4 : i64, tpu.core_type = #tpu.core_type<tc>, window_params = [{transform_indices = @transform_0, window_bounds = array<i64: 1, 14, 24, 4>}, {pipeline_mode = #tpu.pipeline_mode<synchronous>, transform_indices = @transform_1, window_bounds = array<i64: 16, 12>}, {transform_indices = @transform_2, window_bounds = array<i64: 1, 12, 24, 4>}, {pipeline_mode = #tpu.pipeline_mode<synchronous>, transform_indices = @transform_3, window_bounds = array<i64: 16, 10>}, {transform_indices = @transform_4, window_bounds = array<i64: 1, 10, 16, 4>}, {pipeline_mode = #tpu.pipeline_mode<synchronous>, transform_indices = @transform_5, window_bounds = array<i64: 16, 8>}, {pipeline_mode = #tpu.pipeline_mode<synchronous>, transform_indices = @transform_6, window_bounds = array<i64: 3, 3, 12, 4>}, {pipeline_mode = #tpu.pipeline_mode<synchronous>, transform_indices = @transform_7, window_bounds = array<i64: 1, 64>}, {transform_indices = @transform_8, window_bounds = array<i64: 1, 16, 64>}]} {
    %c0 = arith.constant 0 : index
    %c0_0 = arith.constant 0 : index
    %0 = vector.load %arg8[%c0, %c0_0] : memref<1x64xf32, #tpu.memory_space<vmem>>, vector<1x64xf32>
    %1 = vector.shape_cast %0 : vector<1x64xf32> to vector<1x64xf32>
    %2 = vector.broadcast %1 : vector<1x64xf32> to vector<16x64xf32>
    %c0_1 = arith.constant 0 : index
    %c0_2 = arith.constant 0 : index
    %c0_3 = arith.constant 0 : index
    %c0_4 = arith.constant 0 : index
    %3 = vector.load %arg1[%c0_1, %c0_2, %c0_3, %c0_4] : memref<1x14x24x4xbf16, #tpu.memory_space<vmem>>, vector<1x14x16x4xbf16>
    %4 = vector.shape_cast %3 : vector<1x14x16x4xbf16> to vector<14x16x4xbf16>
    %c0_5 = arith.constant 0 : index
    %c0_6 = arith.constant 0 : index
    %c0_7 = arith.constant 0 : index
    %5 = vector.load %arg10[%c0_5, %c0_6, %c0_7] : memref<14x16x12xbf16, #tpu.memory_space<vmem>>, vector<14x16x4xbf16>
    tpu.vector_store %arg10[%c0_5, %c0_6, %c0_7], %4 {strides = array<i32>} : memref<14x16x12xbf16, #tpu.memory_space<vmem>>, vector<14x16x4xbf16>,
    %c0_8 = arith.constant 0 : index
    %c0_9 = arith.constant 0 : index
    %c1 = arith.constant 1 : index
    %c0_10 = arith.constant 0 : index
    %6 = vector.load %arg1[%c0_8, %c0_9, %c1, %c0_10] : memref<1x14x24x4xbf16, #tpu.memory_space<vmem>>, vector<1x14x16x4xbf16>
    %7 = vector.shape_cast %6 : vector<1x14x16x4xbf16> to vector<14x16x4xbf16>
    %c0_11 = arith.constant 0 : index
    %c0_12 = arith.constant 0 : index
    %c4 = arith.constant 4 : index
    %8 = vector.load %arg10[%c0_11, %c0_12, %c4] : memref<14x16x12xbf16, #tpu.memory_space<vmem>>, vector<14x16x4xbf16>
    tpu.vector_store %arg10[%c0_11, %c0_12, %c4], %7 {strides = array<i32>} : memref<14x16x12xbf16, #tpu.memory_space<vmem>>, vector<14x16x4xbf16>,
    %c0_13 = arith.constant 0 : index
    %c0_14 = arith.constant 0 : index
    %c2 = arith.constant 2 : index
    %c0_15 = arith.constant 0 : index
    %9 = vector.load %arg1[%c0_13, %c0_14, %c2, %c0_15] : memref<1x14x24x4xbf16, #tpu.memory_space<vmem>>, vector<1x14x16x4xbf16>
    %10 = vector.shape_cast %9 : vector<1x14x16x4xbf16> to vector<14x16x4xbf16>
    %c0_16 = arith.constant 0 : index
    %c0_17 = arith.constant 0 : index
    %c8 = arith.constant 8 : index
    %11 = vector.load %arg10[%c0_16, %c0_17, %c8] : memref<14x16x12xbf16, #tpu.memory_space<vmem>>, vector<14x16x4xbf16>
    tpu.vector_store %arg10[%c0_16, %c0_17, %c8], %10 {strides = array<i32>} : memref<14x16x12xbf16, #tpu.memory_space<vmem>>, vector<14x16x4xbf16>,
    %c0_18 = arith.constant 0 : index
    %c0_19 = arith.constant 0 : index
    %c0_20 = arith.constant 0 : index
    %12 = vector.load %arg10[%c0_18, %c0_19, %c0_20] : memref<14x16x12xbf16, #tpu.memory_space<vmem>>, vector<12x16x12xbf16>
    %13 = vector.shape_cast %12 : vector<12x16x12xbf16> to vector<192x12xbf16>
    %c0_21 = arith.constant 0 : index
    %c0_22 = arith.constant 0 : index
    %c0_23 = arith.constant 0 : index
    %c0_24 = arith.constant 0 : index
    %14 = vector.load %arg7[%c0_21, %c0_22, %c0_23, %c0_24] : memref<3x3x12x4xbf16, #tpu.memory_space<vmem>>, vector<1x1x12x4xbf16>
    %15 = vector.shape_cast %14 : vector<1x1x12x4xbf16> to vector<12x4xbf16>
    %cst = arith.constant dense<0.000000e+00> : vector<192x4xf32>
    %16 = tpu.matmul %13, %15, %cst {dimension_numbers = #tpu.dot_dimension_numbers<[1], [0], [0], [1], [0, 0, 1, 1], [], []>} : vector<192x12xbf16>, vector<12x4xbf16>, vector<192x4xf32> -> vector<192x4xf32>
    %c1_25 = arith.constant 1 : index
    %c0_26 = arith.constant 0 : index
    %c0_27 = arith.constant 0 : index
    %17 = vector.load %arg10[%c1_25, %c0_26, %c0_27] : memref<14x16x12xbf16, #tpu.memory_space<vmem>>, vector<12x16x12xbf16>
    %18 = vector.shape_cast %17 : vector<12x16x12xbf16> to vector<192x12xbf16>
    %c0_28 = arith.constant 0 : index
    %c1_29 = arith.constant 1 : index
    %c0_30 = arith.constant 0 : index
    %c0_31 = arith.constant 0 : index
    %19 = vector.load %arg7[%c0_28, %c1_29, %c0_30, %c0_31] : memref<3x3x12x4xbf16, #tpu.memory_space<vmem>>, vector<1x1x12x4xbf16>
    %20 = vector.shape_cast %19 : vector<1x1x12x4xbf16> to vector<12x4xbf16>
    %cst_32 = arith.constant dense<0.000000e+00> : vector<192x4xf32>
    %21 = tpu.matmul %18, %20, %cst_32 {dimension_numbers = #tpu.dot_dimension_numbers<[1], [0], [0], [1], [0, 0, 1, 1], [], []>} : vector<192x12xbf16>, vector<12x4xbf16>, vector<192x4xf32> -> vector<192x4xf32>
    %22 = arith.addf %16, %21 : vector<192x4xf32>
    %c2_33 = arith.constant 2 : index
    %c0_34 = arith.constant 0 : index
    %c0_35 = arith.constant 0 : index
    %23 = vector.load %arg10[%c2_33, %c0_34, %c0_35] : memref<14x16x12xbf16, #tpu.memory_space<vmem>>, vector<12x16x12xbf16>
    %24 = vector.shape_cast %23 : vector<12x16x12xbf16> to vector<192x12xbf16>
    %c0_36 = arith.constant 0 : index
    %c2_37 = arith.constant 2 : index
    %c0_38 = arith.constant 0 : index
    %c0_39 = arith.constant 0 : index
    %25 = vector.load %arg7[%c0_36, %c2_37, %c0_38, %c0_39] : memref<3x3x12x4xbf16, #tpu.memory_space<vmem>>, vector<1x1x12x4xbf16>
    %26 = vector.shape_cast %25 : vector<1x1x12x4xbf16> to vector<12x4xbf16>
    %cst_40 = arith.constant dense<0.000000e+00> : vector<192x4xf32>
    %27 = tpu.matmul %24, %26, %cst_40 {dimension_numbers = #tpu.dot_dimension_numbers<[1], [0], [0], [1], [0, 0, 1, 1], [], []>} : vector<192x12xbf16>, vector<12x4xbf16>, vector<192x4xf32> -> vector<192x4xf32>
    %28 = arith.addf %22, %27 : vector<192x4xf32>
    %29 = vector.shape_cast %28 : vector<192x4xf32> to vector<12x16x4xf32>
    %30 = arith.truncf %29 : vector<12x16x4xf32> to vector<12x16x4xbf16>
    %31 = vector.extract_strided_slice %30 {offsets = [0, 0, 0], sizes = [12, 1, 4], strides = [1, 1, 1]} : vector<12x16x4xbf16> to vector<12x1x4xbf16>
    %32 = vector.shape_cast %31 : vector<12x1x4xbf16> to vector<12x4xbf16>
    %33 = tpu.concatenate %32, %32 in 1 : vector<12x4xbf16>, vector<12x4xbf16> -> vector<12x8xbf16>
    %c0_41 = arith.constant 0 : index
    %c0_42 = arith.constant 0 : index
    %34 = vector.load %arg13[%c0_41, %c0_42] : memref<12x64xbf16, #tpu.memory_space<vmem>>, vector<12x8xbf16>
    tpu.vector_store %arg13[%c0_41, %c0_42], %33 {strides = array<i32>} : memref<12x64xbf16, #tpu.memory_space<vmem>>, vector<12x8xbf16>,
    %35 = vector.extract_strided_slice %30 {offsets = [0, 1, 0], sizes = [12, 1, 4], strides = [1, 1, 1]} : vector<12x16x4xbf16> to vector<12x1x4xbf16>
    %36 = vector.shape_cast %35 : vector<12x1x4xbf16> to vector<12x4xbf16>
    %c0_43 = arith.constant 0 : index
    %c8_44 = arith.constant 8 : index
    %37 = vector.load %arg13[%c0_43, %c8_44] : memref<12x64xbf16, #tpu.memory_space<vmem>>, vector<12x4xbf16>
    tpu.vector_store %arg13[%c0_43, %c8_44], %36 {strides = array<i32>} : memref<12x64xbf16, #tpu.memory_space<vmem>>, vector<12x4xbf16>,
    %38 = vector.extract_strided_slice %30 {offsets = [0, 2, 0], sizes = [12, 1, 4], strides = [1, 1, 1]} : vector<12x16x4xbf16> to vector<12x1x4xbf16>
    %39 = vector.shape_cast %38 : vector<12x1x4xbf16> to vector<12x4xbf16>
    %c0_45 = arith.constant 0 : index
    %c12 = arith.constant 12 : index
    %40 = vector.load %arg13[%c0_45, %c12] : memref<12x64xbf16, #tpu.memory_space<vmem>>, vector<12x4xbf16>
    tpu.vector_store %arg13[%c0_45, %c12], %39 {strides = array<i32>} : memref<12x64xbf16, #tpu.memory_space<vmem>>, vector<12x4xbf16>,
    %41 = vector.extract_strided_slice %30 {offsets = [0, 3, 0], sizes = [12, 1, 4], strides = [1, 1, 1]} : vector<12x16x4xbf16> to vector<12x1x4xbf16>
    %42 = vector.shape_cast %41 : vector<12x1x4xbf16> to vector<12x4xbf16>
    %43 = tpu.concatenate %42, %42 in 1 : vector<12x4xbf16>, vector<12x4xbf16> -> vector<12x8xbf16>
    %c0_46 = arith.constant 0 : index
    %c16 = arith.constant 16 : index
    %44 = vector.load %arg13[%c0_46, %c16] : memref<12x64xbf16, #tpu.memory_space<vmem>>, vector<12x8xbf16>
    tpu.vector_store %arg13[%c0_46, %c16], %43 {strides = array<i32>} : memref<12x64xbf16, #tpu.memory_space<vmem>>, vector<12x8xbf16>,
    %45 = vector.extract_strided_slice %30 {offsets = [0, 4, 0], sizes = [12, 1, 4], strides = [1, 1, 1]} : vector<12x16x4xbf16> to vector<12x1x4xbf16>
    %46 = vector.shape_cast %45 : vector<12x1x4xbf16> to vector<12x4xbf16>
    %c0_47 = arith.constant 0 : index
    %c24 = arith.constant 24 : index
    %47 = vector.load %arg13[%c0_47, %c24] : memref<12x64xbf16, #tpu.memory_space<vmem>>, vector<12x4xbf16>
    tpu.vector_store %arg13[%c0_47, %c24], %46 {strides = array<i32>} : memref<12x64xbf16, #tpu.memory_space<vmem>>, vector<12x4xbf16>,
    %48 = vector.extract_strided_slice %30 {offsets = [0, 5, 0], sizes = [12, 1, 4], strides = [1, 1, 1]} : vector<12x16x4xbf16> to vector<12x1x4xbf16>
    %49 = vector.shape_cast %48 : vector<12x1x4xbf16> to vector<12x4xbf16>
    %c0_48 = arith.constant 0 : index
    %c28 = arith.constant 28 : index
    %50 = vector.load %arg13[%c0_48, %c28] : memref<12x64xbf16, #tpu.memory_space<vmem>>, vector<12x4xbf16>
    tpu.vector_store %arg13[%c0_48, %c28], %49 {strides = array<i32>} : memref<12x64xbf16, #tpu.memory_space<vmem>>, vector<12x4xbf16>,
    %51 = vector.extract_strided_slice %30 {offsets = [0, 6, 0], sizes = [12, 1, 4], strides = [1, 1, 1]} : vector<12x16x4xbf16> to vector<12x1x4xbf16>
    %52 = vector.shape_cast %51 : vector<12x1x4xbf16> to vector<12x4xbf16>
    %53 = tpu.concatenate %52, %52 in 1 : vector<12x4xbf16>, vector<12x4xbf16> -> vector<12x8xbf16>
    %c0_49 = arith.constant 0 : index
    %c32 = arith.constant 32 : index
    %54 = vector.load %arg13[%c0_49, %c32] : memref<12x64xbf16, #tpu.memory_space<vmem>>, vector<12x8xbf16>
    tpu.vector_store %arg13[%c0_49, %c32], %53 {strides = array<i32>} : memref<12x64xbf16, #tpu.memory_space<vmem>>, vector<12x8xbf16>,
    %55 = vector.extract_strided_slice %30 {offsets = [0, 7, 0], sizes = [12, 1, 4], strides = [1, 1, 1]} : vector<12x16x4xbf16> to vector<12x1x4xbf16>
    %56 = vector.shape_cast %55 : vector<12x1x4xbf16> to vector<12x4xbf16>
    %c0_50 = arith.constant 0 : index
    %c40 = arith.constant 40 : index
    %57 = vector.load %arg13[%c0_50, %c40] : memref<12x64xbf16, #tpu.memory_space<vmem>>, vector<12x4xbf16>
    tpu.vector_store %arg13[%c0_50, %c40], %56 {strides = array<i32>} : memref<12x64xbf16, #tpu.memory_space<vmem>>, vector<12x4xbf16>,
    %58 = vector.extract_strided_slice %30 {offsets = [0, 8, 0], sizes = [12, 1, 4], strides = [1, 1, 1]} : vector<12x16x4xbf16> to vector<12x1x4xbf16>
    %59 = vector.shape_cast %58 : vector<12x1x4xbf16> to vector<12x4xbf16>
    %c0_51 = arith.constant 0 : index
    %c44 = arith.constant 44 : index
    %60 = vector.load %arg13[%c0_51, %c44] : memref<12x64xbf16, #tpu.memory_space<vmem>>, vector<12x4xbf16>
    tpu.vector_store %arg13[%c0_51, %c44], %59 {strides = array<i32>} : memref<12x64xbf16, #tpu.memory_space<vmem>>, vector<12x4xbf16>,
    %61 = vector.extract_strided_slice %30 {offsets = [0, 9, 0], sizes = [12, 1, 4], strides = [1, 1, 1]} : vector<12x16x4xbf16> to vector<12x1x4xbf16>
    %62 = vector.shape_cast %61 : vector<12x1x4xbf16> to vector<12x4xbf16>
    %63 = tpu.concatenate %62, %62 in 1 : vector<12x4xbf16>, vector<12x4xbf16> -> vector<12x8xbf16>
    %c0_52 = arith.constant 0 : index
    %c48 = arith.constant 48 : index
    %64 = vector.load %arg13[%c0_52, %c48] : memref<12x64xbf16, #tpu.memory_space<vmem>>, vector<12x8xbf16>
    tpu.vector_store %arg13[%c0_52, %c48], %63 {strides = array<i32>} : memref<12x64xbf16, #tpu.memory_space<vmem>>, vector<12x8xbf16>,
    %65 = vector.extract_strided_slice %30 {offsets = [0, 10, 0], sizes = [12, 1, 4], strides = [1, 1, 1]} : vector<12x16x4xbf16> to vector<12x1x4xbf16>
    %66 = vector.shape_cast %65 : vector<12x1x4xbf16> to vector<12x4xbf16>
    %c0_53 = arith.constant 0 : index
    %c56 = arith.constant 56 : index
    %67 = vector.load %arg13[%c0_53, %c56] : memref<12x64xbf16, #tpu.memory_space<vmem>>, vector<12x4xbf16>
    tpu.vector_store %arg13[%c0_53, %c56], %66 {strides = array<i32>} : memref<12x64xbf16, #tpu.memory_space<vmem>>, vector<12x4xbf16>,
    %68 = vector.extract_strided_slice %30 {offsets = [0, 11, 0], sizes = [12, 1, 4], strides = [1, 1, 1]} : vector<12x16x4xbf16> to vector<12x1x4xbf16>
    %69 = vector.shape_cast %68 : vector<12x1x4xbf16> to vector<12x4xbf16>
    %c0_54 = arith.constant 0 : index
    %c60 = arith.constant 60 : index
    %70 = vector.load %arg13[%c0_54, %c60] : memref<12x64xbf16, #tpu.memory_space<vmem>>, vector<12x4xbf16>
    tpu.vector_store %arg13[%c0_54, %c60], %69 {strides = array<i32>} : memref<12x64xbf16, #tpu.memory_space<vmem>>, vector<12x4xbf16>,
    %c0_55 = arith.constant 0 : index
    %c0_56 = arith.constant 0 : index
    %71 = vector.load %arg2[%c0_55, %c0_56] : memref<16x12xbf16, #tpu.memory_space<vmem>>, vector<16x12xbf16>
    %c0_57 = arith.constant 0 : index
    %c0_58 = arith.constant 0 : index
    %72 = vector.load %arg13[%c0_57, %c0_58] : memref<12x64xbf16, #tpu.memory_space<vmem>>, vector<12x64xbf16>
    %cst_59 = arith.constant dense<0.000000e+00> : vector<16x64xf32>
    %73 = tpu.matmul %71, %72, %cst_59 {dimension_numbers = #tpu.dot_dimension_numbers<[1], [0], [0], [1], [0, 0, 1, 1], [], []>} : vector<16x12xbf16>, vector<12x64xbf16>, vector<16x64xf32> -> vector<16x64xf32>
    %74 = arith.addf %2, %73 : vector<16x64xf32>
    %c0_60 = arith.constant 0 : index
    %c0_61 = arith.constant 0 : index
    %c0_62 = arith.constant 0 : index
    %c0_63 = arith.constant 0 : index
    %75 = vector.load %arg3[%c0_60, %c0_61, %c0_62, %c0_63] : memref<1x12x24x4xbf16, #tpu.memory_space<vmem>>, vector<1x12x16x4xbf16>
    %76 = vector.shape_cast %75 : vector<1x12x16x4xbf16> to vector<12x16x4xbf16>
    %c0_64 = arith.constant 0 : index
    %c0_65 = arith.constant 0 : index
    %c0_66 = arith.constant 0 : index
    %77 = vector.load %arg11[%c0_64, %c0_65, %c0_66] : memref<12x16x12xbf16, #tpu.memory_space<vmem>>, vector<12x16x4xbf16>
    tpu.vector_store %arg11[%c0_64, %c0_65, %c0_66], %76 {strides = array<i32>} : memref<12x16x12xbf16, #tpu.memory_space<vmem>>, vector<12x16x4xbf16>,
    %c0_67 = arith.constant 0 : index
    %c0_68 = arith.constant 0 : index
    %c1_69 = arith.constant 1 : index
    %c0_70 = arith.constant 0 : index
    %78 = vector.load %arg3[%c0_67, %c0_68, %c1_69, %c0_70] : memref<1x12x24x4xbf16, #tpu.memory_space<vmem>>, vector<1x12x16x4xbf16>
    %79 = vector.shape_cast %78 : vector<1x12x16x4xbf16> to vector<12x16x4xbf16>
    %c0_71 = arith.constant 0 : index
    %c0_72 = arith.constant 0 : index
    %c4_73 = arith.constant 4 : index
    %80 = vector.load %arg11[%c0_71, %c0_72, %c4_73] : memref<12x16x12xbf16, #tpu.memory_space<vmem>>, vector<12x16x4xbf16>
    tpu.vector_store %arg11[%c0_71, %c0_72, %c4_73], %79 {strides = array<i32>} : memref<12x16x12xbf16, #tpu.memory_space<vmem>>, vector<12x16x4xbf16>,
    %c0_74 = arith.constant 0 : index
    %c0_75 = arith.constant 0 : index
    %c2_76 = arith.constant 2 : index
    %c0_77 = arith.constant 0 : index
    %81 = vector.load %arg3[%c0_74, %c0_75, %c2_76, %c0_77] : memref<1x12x24x4xbf16, #tpu.memory_space<vmem>>, vector<1x12x16x4xbf16>
    %82 = vector.shape_cast %81 : vector<1x12x16x4xbf16> to vector<12x16x4xbf16>
    %c0_78 = arith.constant 0 : index
    %c0_79 = arith.constant 0 : index
    %c8_80 = arith.constant 8 : index
    %83 = vector.load %arg11[%c0_78, %c0_79, %c8_80] : memref<12x16x12xbf16, #tpu.memory_space<vmem>>, vector<12x16x4xbf16>
    tpu.vector_store %arg11[%c0_78, %c0_79, %c8_80], %82 {strides = array<i32>} : memref<12x16x12xbf16, #tpu.memory_space<vmem>>, vector<12x16x4xbf16>,
    %c0_81 = arith.constant 0 : index
    %c0_82 = arith.constant 0 : index
    %c0_83 = arith.constant 0 : index
    %84 = vector.load %arg11[%c0_81, %c0_82, %c0_83] : memref<12x16x12xbf16, #tpu.memory_space<vmem>>, vector<10x16x12xbf16>
    %85 = vector.shape_cast %84 : vector<10x16x12xbf16> to vector<160x12xbf16>
    %c1_84 = arith.constant 1 : index
    %c0_85 = arith.constant 0 : index
    %c0_86 = arith.constant 0 : index
    %c0_87 = arith.constant 0 : index
    %86 = vector.load %arg7[%c1_84, %c0_85, %c0_86, %c0_87] : memref<3x3x12x4xbf16, #tpu.memory_space<vmem>>, vector<1x1x12x4xbf16>
    %87 = vector.shape_cast %86 : vector<1x1x12x4xbf16> to vector<12x4xbf16>
    %cst_88 = arith.constant dense<0.000000e+00> : vector<160x4xf32>
    %88 = tpu.matmul %85, %87, %cst_88 {dimension_numbers = #tpu.dot_dimension_numbers<[1], [0], [0], [1], [0, 0, 1, 1], [], []>} : vector<160x12xbf16>, vector<12x4xbf16>, vector<160x4xf32> -> vector<160x4xf32>
    %c1_89 = arith.constant 1 : index
    %c0_90 = arith.constant 0 : index
    %c0_91 = arith.constant 0 : index
    %89 = vector.load %arg11[%c1_89, %c0_90, %c0_91] : memref<12x16x12xbf16, #tpu.memory_space<vmem>>, vector<10x16x12xbf16>
    %90 = vector.shape_cast %89 : vector<10x16x12xbf16> to vector<160x12xbf16>
    %c1_92 = arith.constant 1 : index
    %c1_93 = arith.constant 1 : index
    %c0_94 = arith.constant 0 : index
    %c0_95 = arith.constant 0 : index
    %91 = vector.load %arg7[%c1_92, %c1_93, %c0_94, %c0_95] : memref<3x3x12x4xbf16, #tpu.memory_space<vmem>>, vector<1x1x12x4xbf16>
    %92 = vector.shape_cast %91 : vector<1x1x12x4xbf16> to vector<12x4xbf16>
    %cst_96 = arith.constant dense<0.000000e+00> : vector<160x4xf32>
    %93 = tpu.matmul %90, %92, %cst_96 {dimension_numbers = #tpu.dot_dimension_numbers<[1], [0], [0], [1], [0, 0, 1, 1], [], []>} : vector<160x12xbf16>, vector<12x4xbf16>, vector<160x4xf32> -> vector<160x4xf32>
    %94 = arith.addf %88, %93 : vector<160x4xf32>
    %c2_97 = arith.constant 2 : index
    %c0_98 = arith.constant 0 : index
    %c0_99 = arith.constant 0 : index
    %95 = vector.load %arg11[%c2_97, %c0_98, %c0_99] : memref<12x16x12xbf16, #tpu.memory_space<vmem>>, vector<10x16x12xbf16>
    %96 = vector.shape_cast %95 : vector<10x16x12xbf16> to vector<160x12xbf16>
    %c1_100 = arith.constant 1 : index
    %c2_101 = arith.constant 2 : index
    %c0_102 = arith.constant 0 : index
    %c0_103 = arith.constant 0 : index
    %97 = vector.load %arg7[%c1_100, %c2_101, %c0_102, %c0_103] : memref<3x3x12x4xbf16, #tpu.memory_space<vmem>>, vector<1x1x12x4xbf16>
    %98 = vector.shape_cast %97 : vector<1x1x12x4xbf16> to vector<12x4xbf16>
    %cst_104 = arith.constant dense<0.000000e+00> : vector<160x4xf32>
    %99 = tpu.matmul %96, %98, %cst_104 {dimension_numbers = #tpu.dot_dimension_numbers<[1], [0], [0], [1], [0, 0, 1, 1], [], []>} : vector<160x12xbf16>, vector<12x4xbf16>, vector<160x4xf32> -> vector<160x4xf32>
    %100 = arith.addf %94, %99 : vector<160x4xf32>
    %101 = vector.shape_cast %100 : vector<160x4xf32> to vector<10x16x4xf32>
    %102 = arith.truncf %101 : vector<10x16x4xf32> to vector<10x16x4xbf16>
    %103 = vector.extract_strided_slice %102 {offsets = [0, 0, 0], sizes = [10, 1, 4], strides = [1, 1, 1]} : vector<10x16x4xbf16> to vector<10x1x4xbf16>
    %104 = vector.shape_cast %103 : vector<10x1x4xbf16> to vector<10x4xbf16>
    %105 = tpu.concatenate %104, %104 in 1 : vector<10x4xbf16>, vector<10x4xbf16> -> vector<10x8xbf16>
    %c0_105 = arith.constant 0 : index
    %c0_106 = arith.constant 0 : index
    %106 = vector.load %arg13[%c0_105, %c0_106] : memref<12x64xbf16, #tpu.memory_space<vmem>>, vector<10x8xbf16>
    tpu.vector_store %arg13[%c0_105, %c0_106], %105 {strides = array<i32>} : memref<12x64xbf16, #tpu.memory_space<vmem>>, vector<10x8xbf16>,
    %107 = vector.extract_strided_slice %102 {offsets = [0, 1, 0], sizes = [10, 1, 4], strides = [1, 1, 1]} : vector<10x16x4xbf16> to vector<10x1x4xbf16>
    %108 = vector.shape_cast %107 : vector<10x1x4xbf16> to vector<10x4xbf16>
    %109 = tpu.concatenate %108, %108 in 1 : vector<10x4xbf16>, vector<10x4xbf16> -> vector<10x8xbf16>
    %c0_107 = arith.constant 0 : index
    %c8_108 = arith.constant 8 : index
    %110 = vector.load %arg13[%c0_107, %c8_108] : memref<12x64xbf16, #tpu.memory_space<vmem>>, vector<10x8xbf16>
    tpu.vector_store %arg13[%c0_107, %c8_108], %109 {strides = array<i32>} : memref<12x64xbf16, #tpu.memory_space<vmem>>, vector<10x8xbf16>,
    %111 = vector.extract_strided_slice %102 {offsets = [0, 2, 0], sizes = [10, 1, 4], strides = [1, 1, 1]} : vector<10x16x4xbf16> to vector<10x1x4xbf16>
    %112 = vector.shape_cast %111 : vector<10x1x4xbf16> to vector<10x4xbf16>
    %c0_109 = arith.constant 0 : index
    %c16_110 = arith.constant 16 : index
    %113 = vector.load %arg13[%c0_109, %c16_110] : memref<12x64xbf16, #tpu.memory_space<vmem>>, vector<10x4xbf16>
    tpu.vector_store %arg13[%c0_109, %c16_110], %112 {strides = array<i32>} : memref<12x64xbf16, #tpu.memory_space<vmem>>, vector<10x4xbf16>,
    %114 = vector.extract_strided_slice %102 {offsets = [0, 3, 0], sizes = [10, 1, 4], strides = [1, 1, 1]} : vector<10x16x4xbf16> to vector<10x1x4xbf16>
    %115 = vector.shape_cast %114 : vector<10x1x4xbf16> to vector<10x4xbf16>
    %116 = tpu.concatenate %115, %115 in 1 : vector<10x4xbf16>, vector<10x4xbf16> -> vector<10x8xbf16>
    %c0_111 = arith.constant 0 : index
    %c20 = arith.constant 20 : index
    %117 = vector.load %arg13[%c0_111, %c20] : memref<12x64xbf16, #tpu.memory_space<vmem>>, vector<10x8xbf16>
    tpu.vector_store %arg13[%c0_111, %c20], %116 {strides = array<i32>} : memref<12x64xbf16, #tpu.memory_space<vmem>>, vector<10x8xbf16>,
    %118 = vector.extract_strided_slice %102 {offsets = [0, 4, 0], sizes = [10, 1, 4], strides = [1, 1, 1]} : vector<10x16x4xbf16> to vector<10x1x4xbf16>
    %119 = vector.shape_cast %118 : vector<10x1x4xbf16> to vector<10x4xbf16>
    %c0_112 = arith.constant 0 : index
    %c28_113 = arith.constant 28 : index
    %120 = vector.load %arg13[%c0_112, %c28_113] : memref<12x64xbf16, #tpu.memory_space<vmem>>, vector<10x4xbf16>
    tpu.vector_store %arg13[%c0_112, %c28_113], %119 {strides = array<i32>} : memref<12x64xbf16, #tpu.memory_space<vmem>>, vector<10x4xbf16>,
    %121 = vector.extract_strided_slice %102 {offsets = [0, 5, 0], sizes = [10, 1, 4], strides = [1, 1, 1]} : vector<10x16x4xbf16> to vector<10x1x4xbf16>
    %122 = vector.shape_cast %121 : vector<10x1x4xbf16> to vector<10x4xbf16>
    %123 = tpu.concatenate %122, %122 in 1 : vector<10x4xbf16>, vector<10x4xbf16> -> vector<10x8xbf16>
    %c0_114 = arith.constant 0 : index
    %c32_115 = arith.constant 32 : index
    %124 = vector.load %arg13[%c0_114, %c32_115] : memref<12x64xbf16, #tpu.memory_space<vmem>>, vector<10x8xbf16>
    tpu.vector_store %arg13[%c0_114, %c32_115], %123 {strides = array<i32>} : memref<12x64xbf16, #tpu.memory_space<vmem>>, vector<10x8xbf16>,
    %125 = vector.extract_strided_slice %102 {offsets = [0, 6, 0], sizes = [10, 1, 4], strides = [1, 1, 1]} : vector<10x16x4xbf16> to vector<10x1x4xbf16>
    %126 = vector.shape_cast %125 : vector<10x1x4xbf16> to vector<10x4xbf16>
    %127 = tpu.concatenate %126, %126 in 1 : vector<10x4xbf16>, vector<10x4xbf16> -> vector<10x8xbf16>
    %c0_116 = arith.constant 0 : index
    %c40_117 = arith.constant 40 : index
    %128 = vector.load %arg13[%c0_116, %c40_117] : memref<12x64xbf16, #tpu.memory_space<vmem>>, vector<10x8xbf16>
    tpu.vector_store %arg13[%c0_116, %c40_117], %127 {strides = array<i32>} : memref<12x64xbf16, #tpu.memory_space<vmem>>, vector<10x8xbf16>,
    %129 = vector.extract_strided_slice %102 {offsets = [0, 7, 0], sizes = [10, 1, 4], strides = [1, 1, 1]} : vector<10x16x4xbf16> to vector<10x1x4xbf16>
    %130 = vector.shape_cast %129 : vector<10x1x4xbf16> to vector<10x4xbf16>
    %c0_118 = arith.constant 0 : index
    %c48_119 = arith.constant 48 : index
    %131 = vector.load %arg13[%c0_118, %c48_119] : memref<12x64xbf16, #tpu.memory_space<vmem>>, vector<10x4xbf16>
    tpu.vector_store %arg13[%c0_118, %c48_119], %130 {strides = array<i32>} : memref<12x64xbf16, #tpu.memory_space<vmem>>, vector<10x4xbf16>,
    %132 = vector.extract_strided_slice %102 {offsets = [0, 8, 0], sizes = [10, 1, 4], strides = [1, 1, 1]} : vector<10x16x4xbf16> to vector<10x1x4xbf16>
    %133 = vector.shape_cast %132 : vector<10x1x4xbf16> to vector<10x4xbf16>
    %134 = tpu.concatenate %133, %133 in 1 : vector<10x4xbf16>, vector<10x4xbf16> -> vector<10x8xbf16>
    %c0_120 = arith.constant 0 : index
    %c52 = arith.constant 52 : index
    %135 = vector.load %arg13[%c0_120, %c52] : memref<12x64xbf16, #tpu.memory_space<vmem>>, vector<10x8xbf16>
    tpu.vector_store %arg13[%c0_120, %c52], %134 {strides = array<i32>} : memref<12x64xbf16, #tpu.memory_space<vmem>>, vector<10x8xbf16>,
    %136 = vector.extract_strided_slice %102 {offsets = [0, 9, 0], sizes = [10, 1, 4], strides = [1, 1, 1]} : vector<10x16x4xbf16> to vector<10x1x4xbf16>
    %137 = vector.shape_cast %136 : vector<10x1x4xbf16> to vector<10x4xbf16>
    %c0_121 = arith.constant 0 : index
    %c60_122 = arith.constant 60 : index
    %138 = vector.load %arg13[%c0_121, %c60_122] : memref<12x64xbf16, #tpu.memory_space<vmem>>, vector<10x4xbf16>
    tpu.vector_store %arg13[%c0_121, %c60_122], %137 {strides = array<i32>} : memref<12x64xbf16, #tpu.memory_space<vmem>>, vector<10x4xbf16>,
    %c0_123 = arith.constant 0 : index
    %c0_124 = arith.constant 0 : index
    %139 = vector.load %arg4[%c0_123, %c0_124] : memref<16x10xbf16, #tpu.memory_space<vmem>>, vector<16x10xbf16>
    %c0_125 = arith.constant 0 : index
    %c0_126 = arith.constant 0 : index
    %140 = vector.load %arg13[%c0_125, %c0_126] : memref<12x64xbf16, #tpu.memory_space<vmem>>, vector<10x64xbf16>
    %cst_127 = arith.constant dense<0.000000e+00> : vector<16x64xf32>
    %141 = tpu.matmul %139, %140, %cst_127 {dimension_numbers = #tpu.dot_dimension_numbers<[1], [0], [0], [1], [0, 0, 1, 1], [], []>} : vector<16x10xbf16>, vector<10x64xbf16>, vector<16x64xf32> -> vector<16x64xf32>
    %142 = arith.addf %74, %141 : vector<16x64xf32>
    %c0_128 = arith.constant 0 : index
    %c0_129 = arith.constant 0 : index
    %c0_130 = arith.constant 0 : index
    %c0_131 = arith.constant 0 : index
    %143 = vector.load %arg5[%c0_128, %c0_129, %c0_130, %c0_131] : memref<1x10x16x4xbf16, #tpu.memory_space<vmem>>, vector<1x10x8x4xbf16>
    %144 = vector.shape_cast %143 : vector<1x10x8x4xbf16> to vector<10x8x4xbf16>
    %c0_132 = arith.constant 0 : index
    %c0_133 = arith.constant 0 : index
    %c0_134 = arith.constant 0 : index
    %145 = vector.load %arg12[%c0_132, %c0_133, %c0_134] : memref<10x8x12xbf16, #tpu.memory_space<vmem>>, vector<10x8x4xbf16>
    tpu.vector_store %arg12[%c0_132, %c0_133, %c0_134], %144 {strides = array<i32>} : memref<10x8x12xbf16, #tpu.memory_space<vmem>>, vector<10x8x4xbf16>,
    %c0_135 = arith.constant 0 : index
    %c0_136 = arith.constant 0 : index
    %c1_137 = arith.constant 1 : index
    %c0_138 = arith.constant 0 : index
    %146 = vector.load %arg5[%c0_135, %c0_136, %c1_137, %c0_138] : memref<1x10x16x4xbf16, #tpu.memory_space<vmem>>, vector<1x10x8x4xbf16>
    %147 = vector.shape_cast %146 : vector<1x10x8x4xbf16> to vector<10x8x4xbf16>
    %c0_139 = arith.constant 0 : index
    %c0_140 = arith.constant 0 : index
    %c4_141 = arith.constant 4 : index
    %148 = vector.load %arg12[%c0_139, %c0_140, %c4_141] : memref<10x8x12xbf16, #tpu.memory_space<vmem>>, vector<10x8x4xbf16>
    tpu.vector_store %arg12[%c0_139, %c0_140, %c4_141], %147 {strides = array<i32>} : memref<10x8x12xbf16, #tpu.memory_space<vmem>>, vector<10x8x4xbf16>,
    %c0_142 = arith.constant 0 : index
    %c0_143 = arith.constant 0 : index
    %c2_144 = arith.constant 2 : index
    %c0_145 = arith.constant 0 : index
    %149 = vector.load %arg5[%c0_142, %c0_143, %c2_144, %c0_145] : memref<1x10x16x4xbf16, #tpu.memory_space<vmem>>, vector<1x10x8x4xbf16>
    %150 = vector.shape_cast %149 : vector<1x10x8x4xbf16> to vector<10x8x4xbf16>
    %c0_146 = arith.constant 0 : index
    %c0_147 = arith.constant 0 : index
    %c8_148 = arith.constant 8 : index
    %151 = vector.load %arg12[%c0_146, %c0_147, %c8_148] : memref<10x8x12xbf16, #tpu.memory_space<vmem>>, vector<10x8x4xbf16>
    tpu.vector_store %arg12[%c0_146, %c0_147, %c8_148], %150 {strides = array<i32>} : memref<10x8x12xbf16, #tpu.memory_space<vmem>>, vector<10x8x4xbf16>,
    %c0_149 = arith.constant 0 : index
    %c0_150 = arith.constant 0 : index
    %c0_151 = arith.constant 0 : index
    %152 = vector.load %arg12[%c0_149, %c0_150, %c0_151] : memref<10x8x12xbf16, #tpu.memory_space<vmem>>, vector<8x8x12xbf16>
    %153 = vector.shape_cast %152 : vector<8x8x12xbf16> to vector<64x12xbf16>
    %c2_152 = arith.constant 2 : index
    %c0_153 = arith.constant 0 : index
    %c0_154 = arith.constant 0 : index
    %c0_155 = arith.constant 0 : index
    %154 = vector.load %arg7[%c2_152, %c0_153, %c0_154, %c0_155] : memref<3x3x12x4xbf16, #tpu.memory_space<vmem>>, vector<1x1x12x4xbf16>
    %155 = vector.shape_cast %154 : vector<1x1x12x4xbf16> to vector<12x4xbf16>
    %cst_156 = arith.constant dense<0.000000e+00> : vector<64x4xf32>
    %156 = tpu.matmul %153, %155, %cst_156 {dimension_numbers = #tpu.dot_dimension_numbers<[1], [0], [0], [1], [0, 0, 1, 1], [], []>} : vector<64x12xbf16>, vector<12x4xbf16>, vector<64x4xf32> -> vector<64x4xf32>
    %c1_157 = arith.constant 1 : index
    %c0_158 = arith.constant 0 : index
    %c0_159 = arith.constant 0 : index
    %157 = vector.load %arg12[%c1_157, %c0_158, %c0_159] : memref<10x8x12xbf16, #tpu.memory_space<vmem>>, vector<8x8x12xbf16>
    %158 = vector.shape_cast %157 : vector<8x8x12xbf16> to vector<64x12xbf16>
    %c2_160 = arith.constant 2 : index
    %c1_161 = arith.constant 1 : index
    %c0_162 = arith.constant 0 : index
    %c0_163 = arith.constant 0 : index
    %159 = vector.load %arg7[%c2_160, %c1_161, %c0_162, %c0_163] : memref<3x3x12x4xbf16, #tpu.memory_space<vmem>>, vector<1x1x12x4xbf16>
    %160 = vector.shape_cast %159 : vector<1x1x12x4xbf16> to vector<12x4xbf16>
    %cst_164 = arith.constant dense<0.000000e+00> : vector<64x4xf32>
    %161 = tpu.matmul %158, %160, %cst_164 {dimension_numbers = #tpu.dot_dimension_numbers<[1], [0], [0], [1], [0, 0, 1, 1], [], []>} : vector<64x12xbf16>, vector<12x4xbf16>, vector<64x4xf32> -> vector<64x4xf32>
    %162 = arith.addf %156, %161 : vector<64x4xf32>
    %c2_165 = arith.constant 2 : index
    %c0_166 = arith.constant 0 : index
    %c0_167 = arith.constant 0 : index
    %163 = vector.load %arg12[%c2_165, %c0_166, %c0_167] : memref<10x8x12xbf16, #tpu.memory_space<vmem>>, vector<8x8x12xbf16>
    %164 = vector.shape_cast %163 : vector<8x8x12xbf16> to vector<64x12xbf16>
    %c2_168 = arith.constant 2 : index
    %c2_169 = arith.constant 2 : index
    %c0_170 = arith.constant 0 : index
    %c0_171 = arith.constant 0 : index
    %165 = vector.load %arg7[%c2_168, %c2_169, %c0_170, %c0_171] : memref<3x3x12x4xbf16, #tpu.memory_space<vmem>>, vector<1x1x12x4xbf16>
    %166 = vector.shape_cast %165 : vector<1x1x12x4xbf16> to vector<12x4xbf16>
    %cst_172 = arith.constant dense<0.000000e+00> : vector<64x4xf32>
    %167 = tpu.matmul %164, %166, %cst_172 {dimension_numbers = #tpu.dot_dimension_numbers<[1], [0], [0], [1], [0, 0, 1, 1], [], []>} : vector<64x12xbf16>, vector<12x4xbf16>, vector<64x4xf32> -> vector<64x4xf32>
    %168 = arith.addf %162, %167 : vector<64x4xf32>
    %169 = vector.shape_cast %168 : vector<64x4xf32> to vector<8x8x4xf32>
    %170 = arith.truncf %169 : vector<8x8x4xf32> to vector<8x8x4xbf16>
    %171 = vector.extract_strided_slice %170 {offsets = [0, 0, 0], sizes = [8, 1, 4], strides = [1, 1, 1]} : vector<8x8x4xbf16> to vector<8x1x4xbf16>
    %172 = vector.shape_cast %171 : vector<8x1x4xbf16> to vector<8x4xbf16>
    %173 = tpu.concatenate %172, %172 in 1 : vector<8x4xbf16>, vector<8x4xbf16> -> vector<8x8xbf16>
    %c0_173 = arith.constant 0 : index
    %c0_174 = arith.constant 0 : index
    %174 = vector.load %arg13[%c0_173, %c0_174] : memref<12x64xbf16, #tpu.memory_space<vmem>>, vector<8x8xbf16>
    tpu.vector_store %arg13[%c0_173, %c0_174], %173 {strides = array<i32>} : memref<12x64xbf16, #tpu.memory_space<vmem>>, vector<8x8xbf16>,
    %175 = vector.extract_strided_slice %170 {offsets = [0, 1, 0], sizes = [8, 1, 4], strides = [1, 1, 1]} : vector<8x8x4xbf16> to vector<8x1x4xbf16>
    %176 = vector.shape_cast %175 : vector<8x1x4xbf16> to vector<8x4xbf16>
    %177 = tpu.concatenate %176, %176 in 1 : vector<8x4xbf16>, vector<8x4xbf16> -> vector<8x8xbf16>
    %c0_175 = arith.constant 0 : index
    %c8_176 = arith.constant 8 : index
    %178 = vector.load %arg13[%c0_175, %c8_176] : memref<12x64xbf16, #tpu.memory_space<vmem>>, vector<8x8xbf16>
    tpu.vector_store %arg13[%c0_175, %c8_176], %177 {strides = array<i32>} : memref<12x64xbf16, #tpu.memory_space<vmem>>, vector<8x8xbf16>,
    %179 = vector.extract_strided_slice %170 {offsets = [0, 2, 0], sizes = [8, 1, 4], strides = [1, 1, 1]} : vector<8x8x4xbf16> to vector<8x1x4xbf16>
    %180 = vector.shape_cast %179 : vector<8x1x4xbf16> to vector<8x4xbf16>
    %181 = tpu.concatenate %180, %180 in 1 : vector<8x4xbf16>, vector<8x4xbf16> -> vector<8x8xbf16>
    %c0_177 = arith.constant 0 : index
    %c16_178 = arith.constant 16 : index
    %182 = vector.load %arg13[%c0_177, %c16_178] : memref<12x64xbf16, #tpu.memory_space<vmem>>, vector<8x8xbf16>
    tpu.vector_store %arg13[%c0_177, %c16_178], %181 {strides = array<i32>} : memref<12x64xbf16, #tpu.memory_space<vmem>>, vector<8x8xbf16>,
    %183 = vector.extract_strided_slice %170 {offsets = [0, 3, 0], sizes = [8, 1, 4], strides = [1, 1, 1]} : vector<8x8x4xbf16> to vector<8x1x4xbf16>
    %184 = vector.shape_cast %183 : vector<8x1x4xbf16> to vector<8x4xbf16>
    %185 = tpu.concatenate %184, %184 in 1 : vector<8x4xbf16>, vector<8x4xbf16> -> vector<8x8xbf16>
    %c0_179 = arith.constant 0 : index
    %c24_180 = arith.constant 24 : index
    %186 = vector.load %arg13[%c0_179, %c24_180] : memref<12x64xbf16, #tpu.memory_space<vmem>>, vector<8x8xbf16>
    tpu.vector_store %arg13[%c0_179, %c24_180], %185 {strides = array<i32>} : memref<12x64xbf16, #tpu.memory_space<vmem>>, vector<8x8xbf16>,
    %187 = vector.extract_strided_slice %170 {offsets = [0, 4, 0], sizes = [8, 1, 4], strides = [1, 1, 1]} : vector<8x8x4xbf16> to vector<8x1x4xbf16>
    %188 = vector.shape_cast %187 : vector<8x1x4xbf16> to vector<8x4xbf16>
    %189 = tpu.concatenate %188, %188 in 1 : vector<8x4xbf16>, vector<8x4xbf16> -> vector<8x8xbf16>
    %c0_181 = arith.constant 0 : index
    %c32_182 = arith.constant 32 : index
    %190 = vector.load %arg13[%c0_181, %c32_182] : memref<12x64xbf16, #tpu.memory_space<vmem>>, vector<8x8xbf16>
    tpu.vector_store %arg13[%c0_181, %c32_182], %189 {strides = array<i32>} : memref<12x64xbf16, #tpu.memory_space<vmem>>, vector<8x8xbf16>,
    %191 = vector.extract_strided_slice %170 {offsets = [0, 5, 0], sizes = [8, 1, 4], strides = [1, 1, 1]} : vector<8x8x4xbf16> to vector<8x1x4xbf16>
    %192 = vector.shape_cast %191 : vector<8x1x4xbf16> to vector<8x4xbf16>
    %193 = tpu.concatenate %192, %192 in 1 : vector<8x4xbf16>, vector<8x4xbf16> -> vector<8x8xbf16>
    %c0_183 = arith.constant 0 : index
    %c40_184 = arith.constant 40 : index
    %194 = vector.load %arg13[%c0_183, %c40_184] : memref<12x64xbf16, #tpu.memory_space<vmem>>, vector<8x8xbf16>
    tpu.vector_store %arg13[%c0_183, %c40_184], %193 {strides = array<i32>} : memref<12x64xbf16, #tpu.memory_space<vmem>>, vector<8x8xbf16>,
    %195 = vector.extract_strided_slice %170 {offsets = [0, 6, 0], sizes = [8, 1, 4], strides = [1, 1, 1]} : vector<8x8x4xbf16> to vector<8x1x4xbf16>
    %196 = vector.shape_cast %195 : vector<8x1x4xbf16> to vector<8x4xbf16>
    %197 = tpu.concatenate %196, %196 in 1 : vector<8x4xbf16>, vector<8x4xbf16> -> vector<8x8xbf16>
    %c0_185 = arith.constant 0 : index
    %c48_186 = arith.constant 48 : index
    %198 = vector.load %arg13[%c0_185, %c48_186] : memref<12x64xbf16, #tpu.memory_space<vmem>>, vector<8x8xbf16>
    tpu.vector_store %arg13[%c0_185, %c48_186], %197 {strides = array<i32>} : memref<12x64xbf16, #tpu.memory_space<vmem>>, vector<8x8xbf16>,
    %199 = vector.extract_strided_slice %170 {offsets = [0, 7, 0], sizes = [8, 1, 4], strides = [1, 1, 1]} : vector<8x8x4xbf16> to vector<8x1x4xbf16>
    %200 = vector.shape_cast %199 : vector<8x1x4xbf16> to vector<8x4xbf16>
    %201 = tpu.concatenate %200, %200 in 1 : vector<8x4xbf16>, vector<8x4xbf16> -> vector<8x8xbf16>
    %c0_187 = arith.constant 0 : index
    %c56_188 = arith.constant 56 : index
    %202 = vector.load %arg13[%c0_187, %c56_188] : memref<12x64xbf16, #tpu.memory_space<vmem>>, vector<8x8xbf16>
    tpu.vector_store %arg13[%c0_187, %c56_188], %201 {strides = array<i32>} : memref<12x64xbf16, #tpu.memory_space<vmem>>, vector<8x8xbf16>,
    %c0_189 = arith.constant 0 : index
    %c0_190 = arith.constant 0 : index
    %203 = vector.load %arg6[%c0_189, %c0_190] : memref<16x8xbf16, #tpu.memory_space<vmem>>, vector<16x8xbf16>
    %c0_191 = arith.constant 0 : index
    %c0_192 = arith.constant 0 : index
    %204 = vector.load %arg13[%c0_191, %c0_192] : memref<12x64xbf16, #tpu.memory_space<vmem>>, vector<8x64xbf16>
    %cst_193 = arith.constant dense<0.000000e+00> : vector<16x64xf32>
    %205 = tpu.matmul %203, %204, %cst_193 {dimension_numbers = #tpu.dot_dimension_numbers<[1], [0], [0], [1], [0, 0, 1, 1], [], []>} : vector<16x8xbf16>, vector<8x64xbf16>, vector<16x64xf32> -> vector<16x64xf32>
    %206 = arith.addf %142, %205 : vector<16x64xf32>
    %c0_194 = arith.constant 0 : index
    %c0_195 = arith.constant 0 : index
    %c0_196 = arith.constant 0 : index
    %207 = vector.load %arg9[%c0_194, %c0_195, %c0_196] : memref<1x16x64xf32, #tpu.memory_space<vmem>>, vector<1x16x64xf32>
    %208 = vector.shape_cast %207 : vector<1x16x64xf32> to vector<16x64xf32>
    %209 = vector.shape_cast %206 : vector<16x64xf32> to vector<1x16x64xf32>
    tpu.vector_store %arg9[%c0_194, %c0_195, %c0_196], %209 {strides = array<i32>} : memref<1x16x64xf32, #tpu.memory_space<vmem>>, vector<1x16x64xf32>,
    return
  }
  func.func @transform_0(%arg0: i32) -> (i32, i32, i32, i32) {
    %c0_i32 = arith.constant 0 : i32
    %c0_i32_0 = arith.constant 0 : i32
    %c0_i32_1 = arith.constant 0 : i32
    %c0_i32_2 = arith.constant 0 : i32
    return %arg0, %c0_i32, %c0_i32_0, %c0_i32_1 : i32, i32, i32, i32
  }
  func.func @transform_1(%arg0: i32) -> (i32, i32) {
    %c0_i32 = arith.constant 0 : i32
    %c0_i32_0 = arith.constant 0 : i32
    %c0_i32_1 = arith.constant 0 : i32
    return %c0_i32, %c0_i32_0 : i32, i32
  }
  func.func @transform_2(%arg0: i32) -> (i32, i32, i32, i32) {
    %c0_i32 = arith.constant 0 : i32
    %c0_i32_0 = arith.constant 0 : i32
    %c0_i32_1 = arith.constant 0 : i32
    %c0_i32_2 = arith.constant 0 : i32
    return %arg0, %c0_i32, %c0_i32_0, %c0_i32_1 : i32, i32, i32, i32
  }
  func.func @transform_3(%arg0: i32) -> (i32, i32) {
    %c0_i32 = arith.constant 0 : i32
    %c0_i32_0 = arith.constant 0 : i32
    %c0_i32_1 = arith.constant 0 : i32
    return %c0_i32, %c0_i32_0 : i32, i32
  }
  func.func @transform_4(%arg0: i32) -> (i32, i32, i32, i32) {
    %c0_i32 = arith.constant 0 : i32
    %c0_i32_0 = arith.constant 0 : i32
    %c0_i32_1 = arith.constant 0 : i32
    %c0_i32_2 = arith.constant 0 : i32
    return %arg0, %c0_i32, %c0_i32_0, %c0_i32_1 : i32, i32, i32, i32
  }
  func.func @transform_5(%arg0: i32) -> (i32, i32) {
    %c0_i32 = arith.constant 0 : i32
    %c0_i32_0 = arith.constant 0 : i32
    %c0_i32_1 = arith.constant 0 : i32
    return %c0_i32, %c0_i32_0 : i32, i32
  }
  func.func @transform_6(%arg0: i32) -> (i32, i32, i32, i32) {
    %c0_i32 = arith.constant 0 : i32
    %c0_i32_0 = arith.constant 0 : i32
    %c0_i32_1 = arith.constant 0 : i32
    %c0_i32_2 = arith.constant 0 : i32
    %c0_i32_3 = arith.constant 0 : i32
    return %c0_i32, %c0_i32_0, %c0_i32_1, %c0_i32_2 : i32, i32, i32, i32
  }
  func.func @transform_7(%arg0: i32) -> (i32, i32) {
    %c0_i32 = arith.constant 0 : i32
    %c0_i32_0 = arith.constant 0 : i32
    %c0_i32_1 = arith.constant 0 : i32
    return %c0_i32, %c0_i32_0 : i32, i32
  }
  func.func @transform_8(%arg0: i32) -> (i32, i32, i32) {
    %c0_i32 = arith.constant 0 : i32
    %c0_i32_0 = arith.constant 0 : i32
    %c0_i32_1 = arith.constant 0 : i32
    return %arg0, %c0_i32, %c0_i32_0 : i32, i32, i32
  }
}

</mosaic_0001>

<bundles_post_ra>
// kernel: tpu_custom_call.1
= control target key start
LH: loop header
LB: loop body
LE: loop exit
PB: predicated region body
PF: predicated region fallthrough
CT: control target
= control target key end

     0   :  { %13 = vsyncpa [#allocation7], 0  ;;  %s8143_s0 = inlined_call_operand.vmem [shape: bf16[2,14,24,4], index: 0, kind: input, shape index: {}]   ;;  %s8144_s1 = inlined_call_operand.vmem [shape: bf16[16,12], index: 1, kind: input, shape index: {}]   ;;  %s8145_s2 = inlined_call_operand.vmem [shape: bf16[2,12,24,4], index: 2, kind: input, shape index: {}]   ;;  %s8146_s3 = inlined_call_operand.vmem [shape: bf16[16,10], index: 3, kind: input, shape index: {}]   ;;  %s8147_s4 = inlined_call_operand.vmem [shape: bf16[2,10,16,4], index: 4, kind: input, shape index: {}]   ;;  %s8148_s5 = inlined_call_operand.vmem [shape: bf16[16,8], index: 5, kind: input, shape index: {}]   ;;  %s8149_s6 = inlined_call_operand.vmem [shape: bf16[3,3,12,4], index: 6, kind: input, shape index: {}]   ;;  %s8150_s7 = inlined_call_operand.vmem [shape: f32[1,64], index: 7, kind: input, shape index: {}]   ;;  %s8151_s8 = inlined_call_operand.hbm [shape: f32[2,16,64], index: 8, kind: output, shape index: {}]  }
   0x1   :  { %15 = vsyncpa [#allocation7 + $0x1], 0  ;;  %s6314_s27 = smov 0   ;;  %s6316_s28 = smov 0  }
   0x2   :  { %s6318_s29 = smov 0   ;;  %s6320_s30 = smov 0  }
   0x3 LB: > { %s6335_s9 = sadd.s32 4294967295, %s6249_s30   ;;  %s5155_s10 = sadd.s32 4294967294, %s6249_s30   ;;  %s6249_s30 = sphi %s6320_s30, %s8461_s30   ;;  %s6245_s29 = sphi %s6318_s29, %s8460_s29   ;;  %s6241_s28 = sphi %s6316_s28, %s8459_s28   ;;  %s6237_s27 = sphi %s6314_s27, %s8458_s27  }
   0x4   : > { %s6339_s11 = sadd.s32 1, %s6249_s30   ;;  %s211_s12 = sadd.s32 1, %s6245_s29 }
   0x5   : > { %s208_s13 = ssub.s32 %s6249_s30, %s6339_s11  ;;  %p221_p0 = scmp.ne.s32.totalorder %s6245_s29, %s6241_s28 }
   0x6   : > { %p209_p1 = scmp.eq.s32.totalorder %s208_s13, 0  ;;  %p222_p2 = scmp.eq.s32.totalorder %s6335_s9, 1 }
   0x7   : > { %p227_p3 = scmp.ne.s32.totalorder %s6241_s28, %s6237_s27  ;;  %p228_p4 = scmp.eq.s32.totalorder %s5155_s10, 1 }
   0x8   : > { %s6350_s14 = scalar_select %p209_p1, %s6245_s29, %s211_s12  }
   0x9   : > { %p6352_p5 = por %p222_p2, %p221_p0  ;;  %p6356_p6 = por %p228_p4, %p227_p3 }
   0xa   : > { %p5158_p7 = scmp.ge.s32.totalorder %s6249_s30, 1  ;;  %p285_p8 = scmp.lt.s32.totalorder %s6249_s30, 3 }
   0xc   : > { %p286_p9 = pnand %p5158_p7, %p285_p8 }
   0xd   : > { %p329_p10 = scmp.lt.s32.totalorder (!%p286_p9), %s6335_s9, 1  ;;  %vm1013_vm0 = vcmask (!%p286_p9), 1046528   ;;  %vm633_vm1 = vsmask.f32 (!%p286_p9), 7424  ;;  %s6251_s22 = smov (!%p286_p9), 8   ;;  %vm8164_vm2 = vcmask (!%p286_p9), 31744  }
   0xe   : > { %289 = sbr.rel (%p286_p9) target bundleno = 2191 (0x88f), region = 52  ;;  %s6252_s23 = smov (!%p286_p9), 4   ;;  %vm8166_vm3 = vcmask (!%p286_p9), 1045504   ;;  %vm8168_vm4 = vcmask (!%p286_p9), 64544   ;;  %vm8167_vm5 = vcmask (!%p286_p9), 97344   ;;  %vm8165_vm6 = vcmask (!%p286_p9), 97280  }
   0xf   : > { %vm8158_vm7 = vcmask (!%p286_p9), 1041409   ;;  %vm8156_vm8 = vcmask (!%p286_p9), 1042434   ;;  %vm8157_vm9 = vcmask (!%p286_p9), 1044484   ;;  %vm8153_vm10 = vcmask (!%p286_p9), 1045509   ;;  %s8170_s19 = smov (!%p286_p9), 24   ;;  %s6255_s20 = smov (!%p286_p9), 28  }
  0x10   : > { %vm8154_vm11 = vcmask (!%p286_p9), 1043459   ;;  %vm8152_vm12 = vcmask (!%p286_p9), 1046534   ;;  %vm8155_vm13 = vcmask (!%p286_p9), 1047559   ;;  %s6256_s24 = smov (!%p286_p9), 40   ;;  %s6257_s12 = smov (!%p286_p9), 44   ;;  %vm2020_vm14 = vcmask (!%p286_p9), 1040384  }
  0x11   : > { %vm2179_vm15 = vsmask.f32 (!%p286_p9), 3328  ;;  %s6258_s13 = smov (!%p286_p9), 32   ;;  %s8159_s25 = smov (!%p286_p9), 56  }
  0x12   : > { %s6263_s26 = smov (!%p286_p9), 60  }
  0x15   : > { %s6364_s17 = scalar_select %p329_p10, %s6335_s9, 1 }
  0x17   : > { %s5973_s18 = smul.u32 168, %s6364_s17 }
  0x19   : > { %s6370_s21 = scalar_lea.vmem %s8143_s0, %s5973_s18  ;;  %s6253_s18 = smov 12  }
  0x1a   : > { %v6032_v0 = vld [vmem:[%s6370_s21 + $0xc] sm:$0xff]   ;;  %v6033_v1 = vld [vmem:[%s6370_s21 + $0x14] ss:$0 sps:$4 sm:$0x11]   ;;  %v6036_v8 = vld [vmem:[%s6370_s21 + $0x18] sm:$0xff]  }
  0x1b   : > { %v6034_v2 = vld [vmem:[%s6370_s21 + $0xc] sm:$0xfe]   ;;  %v647_v3 = vshrl.u32 %v6032_v0, 16  ;;  %v649_v4 = vshll.u32 %v6032_v0, 16  ;;  %v654_v5 = vshll.u32 %v6033_v1, 16  ;;  %v659_v13 = vshrl.u32 %v6036_v8, 16 }
  0x1c   : > { %v6035_v6 = vld [vmem:[%s6370_s21 + $0x14] ss:$0 sps:$4 sm:$0x11]   ;;  %v1017_v7 = vrot.slane %v6034_v2, 1  ;;  %v661_v14 = vshll.u32 %v6036_v8, 16  ;;  %v6040_v15 = vld [vmem:[%s6370_s21 + $0x24] sm:$0xff]  }
  0x1d   : > { %v651_v9 = vrot.slane %v649_v4, 1  ;;  %v656_v10 = vrot.slane %v654_v5, 1  ;;  %v1018_v11 = vrot.slane %v6035_v6, 1  ;;  %v6037_v12 = vld [vmem:[%s6370_s21 + $0x20] ss:$0 sps:$4 sm:$0x11]  }
  0x1e   : > { %v6042_v18 = vld [vmem:[%s6370_s21 + $0x30] sm:$0xff]   ;;  %v663_v19 = vrot.slane %v661_v14, 1  ;;  %v666_v20 = vshll.u32 %v6037_v12, 16  ;;  %v6038_v21 = vld [vmem:[%s6370_s21 + $0x18] sm:$0xfe]   ;;  %v671_v24 = vshrl.u32 %v6040_v15, 16 }
  0x1f   : > { %v652_v16 = vor.u32 %v651_v9, %v647_v3  ;;  %v1019_v17 = vsel %vm1013_vm0, %v1017_v7, %v1018_v11  ;;  %v6039_v23 = vld [vmem:[%s6370_s21 + $0x20] ss:$0 sps:$4 sm:$0x11]   ;;  %v1020_v27 = vrot.slane %v6038_v21, 1  ;;  %v673_v28 = vshll.u32 %v6040_v15, 16  ;;  %v6050_v45 = vld [vmem:[%s6370_s21 + $0x48] sm:$0xff]  }
  0x20   : > { %1058 = vrot.lane.b32.xlu1 %v1019_v17, %s6251_s22  ;;  %v664_v25 = vor.u32 %v663_v19, %v659_v13  ;;  %v668_v26 = vrot.slane %v666_v20, 1  ;;  %v6048_v29 = vld [vmem:[%s6370_s21 + $0x3c] sm:$0xff]   ;;  %v1021_v30 = vrot.slane %v6039_v23, 1  ;;  %v6041_v31 = vld [vmem:[%s6370_s21 + $0x2c] ss:$0 sps:$4 sm:$0x11]  }
  0x21   : > { %v657_v22 = vsel %vm633_vm1, %v652_v16, %v656_v10  ;;  %v675_v33 = vrot.slane %v673_v28, 1  ;;  %v678_v35 = vshll.u32 %v6041_v31, 16  ;;  %v6043_v36 = vld [vmem:[%s6370_s21 + $0x38] ss:$0 sps:$4 sm:$0x11]   ;;  %v683_v37 = vshrl.u32 %v6042_v18, 16 }
  0x22   : > { %804 = vrot.lane.b32.xlu0 %v657_v22, %s6252_s23  ;;  %v669_v32 = vsel %vm633_vm1, %v664_v25, %v668_v26  ;;  %v1022_v34 = vsel %vm1013_vm0, %v1020_v27, %v1021_v30  ;;  %v685_v38 = vshll.u32 %v6042_v18, 16  ;;  %v695_v40 = vshrl.u32 %v6048_v29, 16  ;;  %v6044_v46 = vld [vmem:[%s6370_s21 + $0x24] sm:$0xfe]   ;;  %v6046_v55 = vld [vmem:[%s6370_s21 + $0x30] sm:$0xfe]  }
  0x23   : > { %v676_v39 = vor.u32 %v675_v33, %v671_v24  ;;  %v697_v41 = vshll.u32 %v6048_v29, 16  ;;  %v680_v42 = vrot.slane %v678_v35, 1  ;;  %v690_v44 = vshll.u32 %v6043_v36, 16  ;;  %v6045_v47 = vld [vmem:[%s6370_s21 + $0x2c] ss:$0 sps:$4 sm:$0x11]  }
  0x24   : > { %1060 = vrot.lane.b32.xlu1 %v1022_v34, %s6251_s22  ;;  %v687_v43 = vrot.slane %v685_v38, 1  ;;  %v707_v52 = vshrl.u32 %v6050_v45, 16  ;;  %v1023_v53 = vrot.slane %v6044_v46, 1  ;;  %v1024_v54 = vrot.slane %v6045_v47, 1  ;;  %v6056_v61 = vld [vmem:[%s6370_s21 + $0x54] sm:$0xff]   ;;  %v6058_v13 = vld [vmem:[%s6370_s21 + $0x60] sm:$0xff]  }
  0x25   : > { %v699_v48 = vrot.slane %v697_v41, 1  ;;  %v681_v49 = vsel %vm633_vm1, %v676_v39, %v680_v42  ;;  %v692_v51 = vrot.slane %v690_v44, 1  ;;  %v6047_v57 = vld [vmem:[%s6370_s21 + $0x38] ss:$0 sps:$4 sm:$0x11]   ;;  %v709_v58 = vshll.u32 %v6050_v45, 16 }
  0x26   : > { %806 = vrot.lane.b32.xlu0 %v669_v32, %s6252_s23  ;;  %v688_v50 = vor.u32 %v687_v43, %v683_v37  ;;  %v1025_v59 = vsel %vm1013_vm0, %v1023_v53, %v1024_v54  ;;  %v1026_v60 = vrot.slane %v6046_v55, 1  ;;  %v1027_v62 = vrot.slane %v6047_v57, 1  ;;  %v6049_v63 = vld [vmem:[%s6370_s21 + $0x44] ss:$0 sps:$4 sm:$0x11]   ;;  %v6064_v27 = vld [vmem:[%s6370_s21 + $0x6c] sm:$0xff]  }
  0x27   : > { %v711_v0 = vrot.slane %v709_v58, 1  ;;  %v719_v1 = vshrl.u32 %v6056_v61, 16  ;;  %v700_v3 = vor.u32 %v699_v48, %v695_v40  ;;  %v702_v4 = vshll.u32 %v6049_v63, 16  ;;  %v6051_v5 = vld [vmem:[%s6370_s21 + $0x50] ss:$0 sps:$4 sm:$0x11]  }
  0x28   : > { %v693_v56 = vsel %vm633_vm1, %v688_v50, %v692_v51  ;;  %v1028_v2 = vsel %vm1013_vm0, %v1026_v60, %v1027_v62  ;;  %v6052_v6 = vld [vmem:[%s6370_s21 + $0x3c] sm:$0xfe]   ;;  %v714_v9 = vshll.u32 %v6051_v5, 16  ;;  %v6053_v10 = vld [vmem:[%s6370_s21 + $0x44] ss:$0 sps:$4 sm:$0x11]  }
  0x29   : > { %810 = vrot.lane.b32.xlu1 %v693_v56, %s6252_s23  ;;  %v704_v7 = vrot.slane %v702_v4, 1  ;;  %v712_v8 = vor.u32 %v711_v0, %v707_v52  ;;  %v721_v11 = vshll.u32 %v6056_v61, 16  ;;  %v1029_v12 = vrot.slane %v6052_v6, 1  ;;  %v6054_v17 = vld [vmem:[%s6370_s21 + $0x48] sm:$0xfe]   ;;  %v6066_v52 = vld [vmem:[%s6370_s21 + $0x78] sm:$0xff]  }
  0x2a   : > { %808 = vrot.lane.b32.xlu0 %v681_v49, %s6252_s23  ;;  %v716_v15 = vrot.slane %v714_v9, 1  ;;  %v1030_v16 = vrot.slane %v6053_v10, 1  ;;  %v6055_v18 = vld [vmem:[%s6370_s21 + $0x50] ss:$0 sps:$4 sm:$0x11]   ;;  %v1032_v22 = vrot.slane %v6054_v17, 1 }
  0x2b   : > { %v705_v14 = vsel %vm633_vm1, %v700_v3, %v704_v7  ;;  %v723_v19 = vrot.slane %v721_v11, 1  ;;  %v731_v23 = vshrl.u32 %v6058_v13, 16  ;;  %v1033_v24 = vrot.slane %v6055_v18, 1  ;;  %v6057_v25 = vld [vmem:[%s6370_s21 + $0x5c] ss:$0 sps:$4 sm:$0x11]  }
  0x2c   : > { %v717_v20 = vsel %vm633_vm1, %v712_v8, %v716_v15  ;;  %v1031_v21 = vsel %vm1013_vm0, %v1029_v12, %v1030_v16  ;;  %v733_v26 = vshll.u32 %v6058_v13, 16  ;;  %v726_v30 = vshll.u32 %v6057_v25, 16  ;;  %v6059_v31 = vld [vmem:[%s6370_s21 + $0x68] ss:$0 sps:$4 sm:$0x11]   ;;  %v6074_v17 = vld [vmem:[%s6370_s21 + $0x90] sm:$0xff]  }
  0x2d   : > { %1064 = vrot.lane.b32.xlu1 %v1028_v2, %s6251_s22  ;;  %v1034_v28 = vsel %vm1013_vm0, %v1032_v22, %v1033_v24  ;;  %v724_v29 = vor.u32 %v723_v19, %v719_v1  ;;  %v743_v33 = vshrl.u32 %v6064_v27, 16  ;;  %v738_v35 = vshll.u32 %v6059_v31, 16  ;;  %v6060_v36 = vld [vmem:[%s6370_s21 + $0x54] sm:$0xfe]   ;;  %v6062_v43 = vld [vmem:[%s6370_s21 + $0x60] sm:$0xfe]  }
  0x2e   : > { %1062 = vrot.lane.b32.xlu0 %v1025_v59, %s6251_s22  ;;  %v735_v32 = vrot.slane %v733_v26, 1  ;;  %v728_v34 = vrot.slane %v726_v30, 1  ;;  %v6061_v38 = vld [vmem:[%s6370_s21 + $0x5c] ss:$0 sps:$4 sm:$0x11]   ;;  %v745_v39 = vshll.u32 %v6064_v27, 16 }
  0x2f   : > { %v740_v41 = vrot.slane %v738_v35, 1  ;;  %v1035_v42 = vrot.slane %v6060_v36, 1  ;;  %v1036_v44 = vrot.slane %v6061_v38, 1  ;;  %v6063_v45 = vld [vmem:[%s6370_s21 + $0x68] ss:$0 sps:$4 sm:$0x11]  }
  0x30   : > { %v736_v37 = vor.u32 %v735_v32, %v731_v23  ;;  %v729_v40 = vsel %vm633_vm1, %v724_v29, %v728_v34  ;;  %v1038_v47 = vrot.slane %v6062_v43, 1  ;;  %v747_v48 = vrot.slane %v745_v39, 1  ;;  %v6065_v51 = vld [vmem:[%s6370_s21 + $0x74] ss:$0 sps:$4 sm:$0x11]   ;;  %v6072_v8 = vld [vmem:[%s6370_s21 + $0x84] sm:$0xff]  }
  0x31   : > { %814 = vrot.lane.b32.xlu1 %v717_v20, %s6252_s23  ;;  %v1037_v49 = vsel %vm1013_vm0, %v1035_v42, %v1036_v44  ;;  %v1039_v50 = vrot.slane %v6063_v45, 1  ;;  %v750_v55 = vshll.u32 %v6065_v51, 16  ;;  %v6067_v56 = vld [vmem:[%s6370_s21 + $0x80] ss:$0 sps:$4 sm:$0x11]   ;;  %v755_v57 = vshrl.u32 %v6066_v52, 16 }
  0x32   : > { %812 = vrot.lane.b32.xlu0 %v705_v14, %s6252_s23  ;;  %v741_v46 = vsel %vm633_vm1, %v736_v37, %v740_v41  ;;  %v748_v54 = vor.u32 %v747_v48, %v743_v33  ;;  %v757_v58 = vshll.u32 %v6066_v52, 16  ;;  %v762_v60 = vshll.u32 %v6067_v56, 16  ;;  %v6068_v61 = vld [vmem:[%s6370_s21 + $0x6c] sm:$0xfe]   ;;  %v6070_v3 = vld [vmem:[%s6370_s21 + $0x78] sm:$0xfe]  }
  0x33   : > { %v1040_v53 = vsel %vm1013_vm0, %v1038_v47, %v1039_v50  ;;  %v752_v59 = vrot.slane %v750_v55, 1  ;;  %v6069_v63 = vld [vmem:[%s6370_s21 + $0x74] ss:$0 sps:$4 sm:$0x11]   ;;  %v1041_v2 = vrot.slane %v6068_v61, 1  ;;  %v1044_v7 = vrot.slane %v6070_v3, 1 }
  0x34   : > { %v759_v62 = vrot.slane %v757_v58, 1  ;;  %v764_v1 = vrot.slane %v762_v60, 1  ;;  %v1042_v5 = vrot.slane %v6069_v63, 1  ;;  %v6071_v6 = vld [vmem:[%s6370_s21 + $0x80] ss:$0 sps:$4 sm:$0x11]  }
  0x35   : > { %1068 = vrot.lane.b32.xlu1 %v1034_v28, %s6251_s22  ;;  %v753_v0 = vsel %vm633_vm1, %v748_v54, %v752_v59  ;;  %v1045_v11 = vrot.slane %v6071_v6, 1  ;;  %v6073_v12 = vld [vmem:[%s6370_s21 + $0x8c] ss:$0 sps:$4 sm:$0x11]   ;;  %v767_v13 = vshrl.u32 %v6072_v8, 16  ;;  %v769_v14 = vshll.u32 %v6072_v8, 16 }
  0x36   : > { %1066 = vrot.lane.b32.xlu0 %v1031_v21, %s6251_s22  ;;  %v760_v4 = vor.u32 %v759_v62, %v755_v57  ;;  %v1043_v10 = vsel %vm1013_vm0, %v1041_v2, %v1042_v5  ;;  %v774_v16 = vshll.u32 %v6073_v12, 16  ;;  %v6075_v18 = vld [vmem:[%s6370_s21 + $0x98] ss:$0 sps:$4 sm:$0x11]   ;;  %v6080_v19 = vld [vmem:[%s6370_s21] sm:$0xff]   ;;  %v6084_v21 = vld [vmem:[%s6370_s21 + $0xc] sm:$0xff]  }
  0x37   : > { %v1046_v15 = vsel %vm1013_vm0, %v1044_v7, %v1045_v11  ;;  %v771_v20 = vrot.slane %v769_v14, 1  ;;  %v779_v23 = vshrl.u32 %v6074_v17, 16  ;;  %v781_v24 = vshll.u32 %v6074_v17, 16  ;;  %v6076_v27 = vld [vmem:[%s6370_s21 + $0x84] sm:$0xfe]   ;;  %466 = vst.msk [vmem:[#allocation2 + $0x8] sm:$0xff] %vm8164_vm2, %v6084_v21 }
  0x38   : > { %v765_v9 = vsel %vm633_vm1, %v760_v4, %v764_v1  ;;  %v776_v22 = vrot.slane %v774_v16, 1  ;;  %v786_v25 = vshll.u32 %v6075_v18, 16  ;;  %v6077_v28 = vld [vmem:[%s6370_s21 + $0x8c] ss:$0 sps:$4 sm:$0x11]   ;;  %v635_v29 = vshrl.u32 %v6080_v19, 16 }
  0x39   : > { %818 = vrot.lane.b32.xlu1 %v741_v46, %s6252_s23  ;;  %v772_v26 = vor.u32 %v771_v20, %v767_v13  ;;  %v783_v30 = vrot.slane %v781_v24, 1  ;;  %v1047_v33 = vrot.slane %v6076_v27, 1  ;;  %v1048_v34 = vrot.slane %v6077_v28, 1  ;;  %v6078_v35 = vld [vmem:[%s6370_s21 + $0x90] sm:$0xfe]   ;;  %v6085_v41 = vld [vmem:[%s6370_s21 + $0x18] sm:$0xff]  }
  0x3a   : > { %816 = vrot.lane.b32.xlu0 %v729_v40, %s6252_s23  ;;  %v788_v31 = vrot.slane %v786_v25, 1  ;;  %v6079_v37 = vld [vmem:[%s6370_s21 + $0x98] ss:$0 sps:$4 sm:$0x11]   ;;  %v637_v38 = vshll.u32 %v6080_v19, 16  ;;  %v1050_v40 = vrot.slane %v6078_v35, 1 }
  0x3b   : > { %v777_v32 = vsel %vm633_vm1, %v772_v26, %v776_v22  ;;  %v784_v36 = vor.u32 %v783_v30, %v779_v23  ;;  %v1049_v39 = vsel %vm1013_vm0, %v1047_v33, %v1048_v34  ;;  %v1051_v43 = vrot.slane %v6079_v37, 1  ;;  %v6081_v44 = vld [vmem:[%s6370_s21 + $0x8] ss:$0 sps:$4 sm:$0x11]   ;;  %467 = vst.msk [vmem:[#allocation2 + $0x10] sm:$0xff] %vm8164_vm2, %v6085_v41  ;;  %v6087_v55 = vld [vmem:[%s6370_s21 + $0x30] sm:$0xff]  }
  0x3c   : > { %v639_v45 = vrot.slane %v637_v38, 1  ;;  %v6086_v46 = vld [vmem:[%s6370_s21 + $0x24] sm:$0xff]   ;;  %469 = vst.msk [vmem:[#allocation2 + $0x20] sm:$0xff] %vm8164_vm2, %v6087_v55  ;;  %v6089_v59 = vld [vmem:[%s6370_s21 + $0x3c] sm:$0xff]   ;;  %v6091_v62 = vld [vmem:[%s6370_s21 + $0x54] sm:$0xff]  }
  0x3d   : > { %1072 = vrot.lane.b32.xlu1 %v1040_v53, %s6251_s22  ;;  %v789_v42 = vsel %vm633_vm1, %v784_v36, %v788_v31  ;;  %v1052_v47 = vsel %vm1013_vm0, %v1050_v40, %v1051_v43  ;;  %v6082_v50 = vld [vmem:[%s6370_s21] sm:$0xfe]   ;;  %v6083_v51 = vld [vmem:[%s6370_s21 + $0x8] ss:$0 sps:$4 sm:$0x11]   ;;  %468 = vst.msk [vmem:[#allocation2 + $0x18] sm:$0xff] %vm8164_vm2, %v6086_v46 }
  0x3e   : > { %1070 = vrot.lane.b32.xlu0 %v1037_v49, %s6251_s22  ;;  %v640_v48 = vor.u32 %v639_v45, %v635_v29  ;;  %v642_v49 = vshll.u32 %v6081_v44, 16  ;;  %v1014_v53 = vrot.slane %v6082_v50, 1  ;;  %v1015_v54 = vrot.slane %v6083_v51, 1  ;;  %v6088_v58 = vld [vmem:[%s8149_s6 + $0x8] sm:$0x3f]   ;;  %470 = vst.msk [vmem:[#allocation2 + $0x28] sm:$0xff] %vm8164_vm2, %v6089_v59 }
  0x3f   : > { %5963 = vmatprep.subr.msk.bf16.mxu0 %vm8166_vm3, %v6088_v58  ;;  %v1187_v60 = vsel %vm8166_vm3, %v6088_v58, 0  ;;  %v6090_v61 = vld [vmem:[%s6370_s21 + $0x48] sm:$0xff]   ;;  %v6092_v63 = vld [vmem:[%s6370_s21 + $0x60] sm:$0xff]   ;;  %472 = vst.msk [vmem:[#allocation2 + $0x38] sm:$0xff] %vm8164_vm2, %v6091_v62  ;;  %v6100_v16 = vld [vmem:[%s6370_s21 + $0x90] sm:$0xff]  }
  0x40   : > { %v644_v52 = vrot.slane %v642_v49, 1  ;;  %v1016_v57 = vsel %vm1013_vm0, %v1014_v53, %v1015_v54  ;;  %5656 = vmatpush3.bf16.msra.mxu0 %v1187_v60  ;;  %471 = vst.msk [vmem:[#allocation2 + $0x30] sm:$0xff] %vm8164_vm2, %v6090_v61  ;;  %473 = vst.msk [vmem:[#allocation2 + $0x40] sm:$0xff] %vm8164_vm2, %v6092_v63  ;;  %v6094_v1 = vld [vmem:[%s6370_s21 + $0xa4] ss:$0 sps:$4 sm:$0x11]  }
  0x41   : > { %822 = vrot.lane.b32.xlu1 %v765_v9, %s6252_s23  ;;  %v6097_v2 = vld [vmem:[%s6370_s21 + $0x6c] sm:$0xff]   ;;  %v798_v5 = vshll.u32 %v6094_v1, 16  ;;  %v6095_v6 = vld [vmem:[%s6370_s21 + $0x9c] sm:$0xfe]   ;;  %v6099_v13 = vld [vmem:[%s6370_s21 + $0x84] sm:$0xff]   ;;  %477 = vst.msk [vmem:[#allocation2 + $0x60] sm:$0xff] %vm8164_vm2, %v6100_v16 }
  0x42   : > { %820 = vrot.lane.b32.xlu0 %v753_v0, %s6252_s23  ;;  %v645_v56 = vsel %vm633_vm1, %v640_v48, %v644_v52  ;;  %v6093_v0 = vld [vmem:[%s6370_s21 + $0x9c] sm:$0xff]   ;;  %v6096_v7 = vld [vmem:[%s6370_s21 + $0xa4] ss:$0 sps:$4 sm:$0x11]   ;;  %474 = vst.msk [vmem:[#allocation2 + $0x48] sm:$0xff] %vm8164_vm2, %v6097_v2  ;;  %v1053_v11 = vrot.slane %v6095_v6, 1 }
  0x43   : > { %v791_v3 = vshrl.u32 %v6093_v0, 16  ;;  %v793_v4 = vshll.u32 %v6093_v0, 16  ;;  %v6098_v9 = vld [vmem:[%s6370_s21 + $0x78] sm:$0xff]   ;;  %v1054_v12 = vrot.slane %v6096_v7, 1  ;;  %476 = vst.msk [vmem:[#allocation2 + $0x58] sm:$0xff] %vm8164_vm2, %v6099_v13  ;;  %v6102_v19 = vld [vmem:[%s6370_s21] sm:$0xff]  }
  0x44   : > { %475 = vst.msk [vmem:[#allocation2 + $0x50] sm:$0xff] %vm8164_vm2, %v6098_v9  ;;  %v6101_v18 = vld [vmem:[%s8149_s6] sm:$0x3f]   ;;  %465 = vst.msk [vmem:[#allocation2] sm:$0xff] %vm8164_vm2, %v6102_v19  ;;  %v6533_v29 = vld [vmem:[%s8149_s6 + $0x10] sm:$0x3f]  }
  0x45   : > { %1076 = vrot.lane.b32.xlu1 %v1046_v15, %s6251_s22  ;;  %v795_v8 = vrot.slane %v793_v4, 1  ;;  %v1055_v15 = vsel %vm1013_vm0, %v1053_v11, %v1054_v12  ;;  %5964 = vmatprep.subr.msk.bf16.mxu0 %vm8166_vm3, %v6101_v18  ;;  %v1360_v28 = vsel %vm8166_vm3, %v6101_v18, 0  ;;  %v1549_v63 = vsel %vm8166_vm3, %v6533_v29, 0 }
  0x46   : > { %1074 = vrot.lane.b32.xlu0 %v1043_v10, %s6251_s22  ;;  %v800_v10 = vrot.slane %v798_v5, 1 }
  0x47   : > { %v796_v14 = vor.u32 %v795_v8, %v791_v3 }
  0x49   : > { %826 = vrot.lane.b32.xlu1 %v789_v42, %s6252_s23  ;;  %v801_v17 = vsel %vm633_vm1, %v796_v14, %v800_v10 }
  0x4a   : > { %824 = vrot.lane.b32.xlu0 %v777_v32, %s6252_s23  ;;  %v6104_v32 = vld [vmem:[%s6370_s21 + $0x9c] sm:$0xff]   ;;  %s5974_s21 = smul.u32 144, %s6364_s17 }
  0x4b   : > { %478 = vst.msk [vmem:[#allocation2 + $0x68] sm:$0xff] %vm8164_vm2, %v6104_v32 }
  0x4c   : > { %s6966_s10 = scalar_lea.vmem %s8145_s2, %s5974_s21  ;;  %s6260_s21 = smov 16  }
  0x4d   : > { %1080 = vrot.lane.b32.xlu1 %v1052_v47, %s6251_s22 }
  0x4e   : > { %1078 = vrot.lane.b32.xlu0 %v1049_v39, %s6251_s22 }
  0x51   : > { %1056 = vrot.lane.b32.xlu1 %v1016_v57, %s6251_s22 }
  0x52   : > { %802 = vrot.lane.b32.xlu0 %v645_v56, %s6252_s23 }
  0x55   : > { %1082 = vrot.lane.b32.xlu1 %v1055_v15, %s6251_s22 }
  0x56   : > { %828 = vrot.lane.b32.xlu0 %v801_v17, %s6252_s23 }
  0x92   : > { %v1059_v20 = vpop.permute.xlu1 %1058 }
  0x94   : > { %v805_v21 = vpop.permute.xlu0 %804 }
  0x95   : > { %846 = vst.msk [vmem:[#allocation2 + $0x8] sm:$0xff] %vm8168_vm4, %v805_v21 }
  0x96   : > { %1100 = vst.msk [vmem:[#allocation2 + $0x8] sm:$0xff] %vm8167_vm5, %v1059_v20  ;;  %v1061_v23 = vpop.permute.xlu1 %1060 }
  0x98   : > { %v807_v22 = vpop.permute.xlu0 %806 }
  0x99   : > { %847 = vst.msk [vmem:[#allocation2 + $0x10] sm:$0xff] %vm8168_vm4, %v807_v22 }
  0x9a   : > { %1101 = vst.msk [vmem:[#allocation2 + $0x10] sm:$0xff] %vm8167_vm5, %v1061_v23 }
  0x9b   : > { %v811_v26 = vpop.permute.xlu1 %810 }
  0x9c   : > { %v809_v24 = vpop.permute.xlu0 %808  ;;  %849 = vst.msk [vmem:[#allocation2 + $0x20] sm:$0xff] %vm8168_vm4, %v811_v26 }
  0x9d   : > { %848 = vst.msk [vmem:[#allocation2 + $0x18] sm:$0xff] %vm8168_vm4, %v809_v24  ;;  %v6524_v25 = vld [vmem:[#allocation2 + $0x8] sm:$0xff] }
  0x9e   : > { %5657 = vmatprep.mubr.msk.bf16.mxu0 %vm8165_vm6, %v6524_v25 }
  0x9f   : > { %v1065_v31 = vpop.permute.xlu1 %1064 }
  0xa0   : > { %v1063_v27 = vpop.permute.xlu0 %1062  ;;  %1103 = vst.msk [vmem:[#allocation2 + $0x20] sm:$0xff] %vm8167_vm5, %v1065_v31 }
  0xa1   : > { %1102 = vst.msk [vmem:[#allocation2 + $0x18] sm:$0xff] %vm8167_vm5, %v1063_v27  ;;  %v6536_v30 = vld [vmem:[#allocation2 + $0x10] sm:$0xff] }
  0xa2   : > { %5658 = vmatmul.mubr.msk.bf16.vlgmr.msra.gmra.mrb[0].mxu0 %vm8165_vm6, %v6536_v30 }
  0xa3   : > { %5682 = vmatpush3.bf16.msra.mxu0 %v1360_v28  ;;  %v815_v34 = vpop.permute.xlu1 %814 }
  0xa4   : > { %5965 = vmatprep.subr.msk.bf16.mxu0 %vm8166_vm3, %v6533_v29  ;;  %v813_v33 = vpop.permute.xlu0 %812  ;;  %851 = vst.msk [vmem:[#allocation2 + $0x30] sm:$0xff] %vm8168_vm4, %v815_v34 }
  0xa5   : > { %850 = vst.msk [vmem:[#allocation2 + $0x28] sm:$0xff] %vm8168_vm4, %v813_v33 }
  0xa7   : > { %v6551_v37 = vld [vmem:[#allocation2 + $0x20] sm:$0xff]  ;;  %v1069_v38 = vpop.permute.xlu1 %1068 }
  0xa8   : > { %v6546_v35 = vld [vmem:[#allocation2 + $0x18] sm:$0xff]  ;;  %v1067_v36 = vpop.permute.xlu0 %1066  ;;  %1105 = vst.msk [vmem:[#allocation2 + $0x30] sm:$0xff] %vm8167_vm5, %v1069_v38 }
  0xa9   : > { %5661 = vmatprep.mubr.msk.bf16.mxu0 %vm8165_vm6, %v6546_v35  ;;  %1104 = vst.msk [vmem:[#allocation2 + $0x28] sm:$0xff] %vm8167_vm5, %v1067_v36 }
  0xaa   : > { %5662 = vmatmul.mubr.msk.bf16.gmra.mrb[4].mxu0 %vm8165_vm6, %v6551_v37 }
  0xab   : > { %v819_v40 = vpop.permute.xlu1 %818 }
  0xac   : > { %v817_v39 = vpop.permute.xlu0 %816  ;;  %853 = vst.msk [vmem:[#allocation2 + $0x40] sm:$0xff] %vm8168_vm4, %v819_v40 }
  0xad   : > { %852 = vst.msk [vmem:[#allocation2 + $0x38] sm:$0xff] %vm8168_vm4, %v817_v39 }
  0xaf   : > { %v1133_v43 = vld [vmem:[#allocation2 + $0x30] sm:$0xff]  ;;  %v1073_v44 = vpop.permute.xlu1 %1072 }
  0xb0   : > { %v1132_v41 = vld [vmem:[#allocation2 + $0x28] sm:$0xff]  ;;  %v1071_v42 = vpop.permute.xlu0 %1070  ;;  %1107 = vst.msk [vmem:[#allocation2 + $0x40] sm:$0xff] %vm8167_vm5, %v1073_v44 }
  0xb1   : > { %5665 = vmatprep.mubr.msk.bf16.mxu0 %vm8165_vm6, %v1132_v41  ;;  %1106 = vst.msk [vmem:[#allocation2 + $0x38] sm:$0xff] %vm8167_vm5, %v1071_v42 }
  0xb2   : > { %5666 = vmatmul.mubr.msk.bf16.gmra.mrb[8].mxu0 %vm8165_vm6, %v1133_v43 }
  0xb3   : > { %v823_v46 = vpop.permute.xlu1 %822 }
  0xb4   : > { %v821_v45 = vpop.permute.xlu0 %820  ;;  %855 = vst.msk [vmem:[#allocation2 + $0x50] sm:$0xff] %vm8168_vm4, %v823_v46 }
  0xb5   : > { %854 = vst.msk [vmem:[#allocation2 + $0x48] sm:$0xff] %vm8168_vm4, %v821_v45 }
  0xb7   : > { %v1135_v49 = vld [vmem:[#allocation2 + $0x40] sm:$0xff]  ;;  %v1077_v50 = vpop.permute.xlu1 %1076 }
  0xb8   : > { %v1134_v47 = vld [vmem:[#allocation2 + $0x38] sm:$0xff]  ;;  %v1075_v48 = vpop.permute.xlu0 %1074  ;;  %1109 = vst.msk [vmem:[#allocation2 + $0x50] sm:$0xff] %vm8167_vm5, %v1077_v50 }
  0xb9   : > { %5669 = vmatprep.mubr.msk.bf16.mxu0 %vm8165_vm6, %v1134_v47  ;;  %1108 = vst.msk [vmem:[#allocation2 + $0x48] sm:$0xff] %vm8167_vm5, %v1075_v48 }
  0xba   : > { %5670 = vmatmul.mubr.msk.bf16.gmra.mrb[12].mxu0 %vm8165_vm6, %v1135_v49 }
  0xbb   : > { %v827_v53 = vpop.permute.xlu1 %826 }
  0xbc   : > { %v825_v51 = vpop.permute.xlu0 %824  ;;  %857 = vst.msk [vmem:[#allocation2 + $0x60] sm:$0xff] %vm8168_vm4, %v827_v53 }
  0xbd   : > { %856 = vst.msk [vmem:[#allocation2 + $0x58] sm:$0xff] %vm8168_vm4, %v825_v51 }
  0xbf   : > { %v1137_v55 = vld [vmem:[#allocation2 + $0x50] sm:$0xff]  ;;  %v1081_v56 = vpop.permute.xlu1 %1080 }
  0xc0   : > { %v1136_v52 = vld [vmem:[#allocation2 + $0x48] sm:$0xff]  ;;  %v1079_v54 = vpop.permute.xlu0 %1078  ;;  %1111 = vst.msk [vmem:[#allocation2 + $0x60] sm:$0xff] %vm8167_vm5, %v1081_v56 }
  0xc1   : > { %5673 = vmatprep.mubr.msk.bf16.mxu0 %vm8165_vm6, %v1136_v52  ;;  %1110 = vst.msk [vmem:[#allocation2 + $0x58] sm:$0xff] %vm8167_vm5, %v1079_v54 }
  0xc2   : > { %5674 = vmatmul.mubr.msk.bf16.gmra.mrb[16].mxu0 %vm8165_vm6, %v1137_v55 }
  0xc3   : > { %v1057_v58 = vpop.permute.xlu1 %1056 }
  0xc4   : > { %v803_v57 = vpop.permute.xlu0 %802 }
  0xc5   : > { %845 = vst.msk [vmem:[#allocation2] sm:$0xff] %vm8168_vm4, %v803_v57 }
  0xc6   : > { %1099 = vst.msk [vmem:[#allocation2] sm:$0xff] %vm8167_vm5, %v1057_v58 }
  0xc7   : > { %v1139_v60 = vld [vmem:[#allocation2 + $0x60] sm:$0xff]  ;;  %v1083_v62 = vpop.permute.xlu1 %1082 }
  0xc8   : > { %v1138_v59 = vld [vmem:[#allocation2 + $0x58] sm:$0xff]  ;;  %v829_v0 = vpop.permute.xlu0 %828 }
  0xc9   : > { %5677 = vmatprep.mubr.msk.bf16.mxu0 %vm8165_vm6, %v1138_v59  ;;  %858 = vst.msk [vmem:[#allocation2 + $0x68] sm:$0xff] %vm8168_vm4, %v829_v0  ;;  %vm2209_vm4 = vcmask 451968  }
  0xca   : > { %5678 = vmatmul.mubr.msk.bf16.gmra.mrb[20].mxu0 %vm8165_vm6, %v1139_v60  ;;  %1112 = vst.msk [vmem:[#allocation2 + $0x68] sm:$0xff] %vm8167_vm5, %v1083_v62  ;;  %vm2137_vm5 = vcmask 388448  }
  0xcd   : > { %v1113_v61 = vld [vmem:[#allocation2] sm:$0xff] }
  0xce   : > { %5683 = vmatprep.mubr.msk.bf16.mxu0 %vm8165_vm6, %v1113_v61 }
  0xd1   : > { %v1503_v1 = vld [vmem:[#allocation2 + $0x68] sm:$0xff] }
  0xd2   : > { %5684 = vmatmul.mubr.msk.bf16.vlgmr.msra.gmra.mrb[0].mxu0 %vm8165_vm6, %v6524_v25 }
  0xd3   : > { %5687 = vmatprep.mubr.msk.bf16.mxu0 %vm8165_vm6, %v6536_v30  ;;  %5708 = vmatpush3.bf16.msra.mxu0 %v1549_v63 }
  0xda   : > { %5688 = vmatmul.mubr.msk.bf16.gmra.mrb[4].mxu0 %vm8165_vm6, %v6546_v35 }
  0xdb   : > { %5691 = vmatprep.mubr.msk.bf16.mxu0 %vm8165_vm6, %v6551_v37 }
  0xe2   : > { %5692 = vmatmul.mubr.msk.bf16.gmra.mrb[8].mxu0 %vm8165_vm6, %v1132_v41 }
  0xe3   : > { %5695 = vmatprep.mubr.msk.bf16.mxu0 %vm8165_vm6, %v1133_v43 }
  0xea   : > { %5696 = vmatmul.mubr.msk.bf16.gmra.mrb[12].mxu0 %vm8165_vm6, %v1134_v47 }
  0xeb   : > { %5699 = vmatprep.mubr.msk.bf16.mxu0 %vm8165_vm6, %v1135_v49 }
  0xf2   : > { %5700 = vmatmul.mubr.msk.bf16.gmra.mrb[16].mxu0 %vm8165_vm6, %v1136_v52 }
  0xf3   : > { %5703 = vmatprep.mubr.msk.bf16.mxu0 %vm8165_vm6, %v1137_v55 }
  0xfa   : > { %5704 = vmatmul.mubr.msk.bf16.gmra.mrb[20].mxu0 %vm8165_vm6, %v1138_v59 }
  0xfb   : > { %5709 = vmatprep.mubr.msk.bf16.mxu0 %vm8165_vm6, %v6536_v30 }
 0x102   : > { %5710 = vmatmul.mubr.msk.bf16.vlgmr.msra.gmra.mrb[0].mxu0 %vm8165_vm6, %v6546_v35 }
 0x103   : > { %5713 = vmatprep.mubr.msk.bf16.mxu0 %vm8165_vm6, %v6551_v37 }
 0x10a   : > { %5714 = vmatmul.mubr.msk.bf16.gmra.mrb[4].mxu0 %vm8165_vm6, %v1132_v41 }
 0x10b   : > { %5717 = vmatprep.mubr.msk.bf16.mxu0 %vm8165_vm6, %v1133_v43 }
 0x112   : > { %5718 = vmatmul.mubr.msk.bf16.gmra.mrb[8].mxu0 %vm8165_vm6, %v1134_v47 }
 0x113   : > { %5721 = vmatprep.mubr.msk.bf16.mxu0 %vm8165_vm6, %v1135_v49 }
 0x11a   : > { %5722 = vmatmul.mubr.msk.bf16.gmra.mrb[12].mxu0 %vm8165_vm6, %v1136_v52 }
 0x11b   : > { %5725 = vmatprep.mubr.msk.bf16.mxu0 %vm8165_vm6, %v1137_v55 }
 0x122   : > { %5726 = vmatmul.mubr.msk.bf16.gmra.mrb[16].mxu0 %vm8165_vm6, %v1138_v59 }
 0x123   : > { %5729 = vmatprep.mubr.msk.bf16.mxu0 %vm8165_vm6, %v1139_v60 }
 0x12a   : > { %5730 = vmatmul.mubr.msk.bf16.gmra.mrb[20].mxu0 %vm8165_vm6, %v1503_v1  ;;  %vm2069_vm6 = vcmask 355648  }
 0x1d5   : > { %v5711_v2 = vpop.f32.mrb[0].mxu0 }
 0x1d6   : > { %v5518_v3 = vpack.c.bf16 %v5711_v2, %v5711_v2  ;;  %v1585_v4 = vpop.f32.mrb[1].mxu0 }
 0x1d7   : > { %v5517_v5 = vpack.c.bf16 %v1585_v4, %v1585_v4  ;;  %v5712_v6 = vpop.f32.mrb[2].mxu0 }
 0x1d8   : > { %v6614_v7 = vunpack.c.l.b16 %v5518_v3  ;;  %v1705_v8 = vpack.c.bf16 %v5712_v6, %v5711_v2  ;;  %v5530_v9 = vpack.c.bf16 %v5712_v6, %v5712_v6  ;;  %v1588_v10 = vpop.f32.mrb[3].mxu0 }
 0x1d9   : > { %v6616_v11 = vunpack.c.l.b16 %v5517_v5  ;;  %v1704_v12 = vpack.c.bf16 %v1588_v10, %v1585_v4  ;;  %v5529_v13 = vpack.c.bf16 %v1588_v10, %v1588_v10 }
 0x1da   : > { %v1841_v14 = vrot.slane %v6614_v7, 1  ;;  %v1729_v16 = vunpack.c.l.b16 %v1705_v8  ;;  %v2074_v17 = vunpack.c.h.b16 %v1705_v8  ;;  %v2098_v18 = vunpack.c.l.b16 %v5530_v9 }
 0x1db   : > { %v1840_v15 = vrot.slane %v6616_v11, 2  ;;  %v6620_v19 = vunpack.c.l.b16 %v1704_v12  ;;  %v2073_v20 = vunpack.c.h.b16 %v1704_v12  ;;  %v2097_v21 = vunpack.c.l.b16 %v5529_v13 }
 0x1dc   : > { %v6623_v24 = vrot.slane %v1729_v16, 7  ;;  %v2109_v25 = vrot.slane %v2098_v18, 7  ;;  %v2141_v26 = vrot.slane %v2074_v17, 7  ;;  %v2212_v27 = vrot.slane %v2098_v18, 1 }
 0x1dd   : > { %v5715_v22 = vpop.f32.mrb[4].mxu0  ;;  %v1842_v23 = vsel %vm8158_vm7, %v1841_v14, %v1840_v15  ;;  %v2244_v29 = vrot.slane %v2098_v18, 2  ;;  %v2211_v30 = vrot.slane %v2097_v21, 2  ;;  %v2243_v31 = vrot.slane %v2097_v21, 3 }
 0x1de   : > { %v1601_v28 = vpop.f32.mrb[5].mxu0  ;;  %v5520_v32 = vpack.c.bf16 %v5715_v22, %v5715_v22  ;;  %v1742_v34 = vsel %vm8158_vm7, %v6623_v24, %v6620_v19  ;;  %v1872_v35 = vsel %vm8157_vm9, %v6623_v24, %v6620_v19  ;;  %v2110_v36 = vsel %vm8158_vm7, %v2109_v25, %v2097_v21 }
 0x1df   : > { %v5716_v33 = vpop.f32.mrb[6].mxu0  ;;  %v2142_v37 = vsel %vm8156_vm8, %v2141_v26, %v2073_v20  ;;  %v2245_v39 = vsel %vm8158_vm7, %v2244_v29, %v2243_v31  ;;  %v5519_v40 = vpack.c.bf16 %v1601_v28, %v1601_v28  ;;  %v2213_v45 = vsel %vm8158_vm7, %v2212_v27, %v2211_v30 }
 0x1e0   : > { %v1604_v38 = vpop.f32.mrb[7].mxu0  ;;  %v1707_v41 = vpack.c.bf16 %v5716_v33, %v5715_v22  ;;  %v5532_v42 = vpack.c.bf16 %v5716_v33, %v5716_v33  ;;  %v1926_v46 = vrot.slane %v6614_v7, 3  ;;  %v6637_v48 = vunpack.c.l.b16 %v5520_v32 }
 0x1e1   : > { %v1706_v43 = vpack.c.bf16 %v1604_v38, %v1601_v28  ;;  %v5531_v44 = vpack.c.bf16 %v1604_v38, %v1604_v38  ;;  %v1808_v50 = vrot.slane %v6616_v11, 1  ;;  %v6641_v51 = vunpack.c.l.b16 %v5519_v40 }
 0x1e2   : > { %v1731_v52 = vunpack.c.l.b16 %v1707_v41  ;;  %v6643_v53 = vunpack.c.l.b16 %v5532_v42  ;;  %v1925_v58 = vrot.slane %v6616_v11, 4  ;;  %v1812_v63 = vrot.slane %v6637_v48, 6 }
 0x1e3   : > { %v1730_v54 = vunpack.c.l.b16 %v1706_v43  ;;  %v2075_v55 = vunpack.c.h.b16 %v1706_v43  ;;  %v2099_v56 = vunpack.c.l.b16 %v5531_v44  ;;  %v6650_v61 = vsel %vm8156_vm8, %v6641_v51, %v1842_v23 }
 0x1e4   : > { %v1844_v0 = vrot.slane %v6637_v48, 7  ;;  %v1746_v1 = vrot.slane %v1731_v52, 5  ;;  %v2076_v2 = vunpack.c.h.b16 %v1707_v41  ;;  %v2215_v4 = vrot.slane %v6643_v53, 7 }
 0x1e5   : > { %v5719_v57 = vpop.f32.mrb[8].mxu0  ;;  %v1743_v5 = vrot.slane %v1730_v54, 6  ;;  %v2111_v6 = vrot.slane %v2099_v56, 6  ;;  %v2143_v8 = vrot.slane %v2075_v55, 6  ;;  %v2214_v12 = vsel %vm8156_vm8, %v2099_v56, %v2213_v45 }
 0x1e6   : > { %v1617_v62 = vpop.f32.mrb[9].mxu0  ;;  %v2246_v13 = vrot.slane %v2099_v56, 1  ;;  %v2145_v20 = vrot.slane %v2076_v2, 5  ;;  %v6665_v22 = vsel %vm8154_vm11, %v2215_v4, %v2214_v12  ;;  %v5522_v25 = vpack.c.bf16 %v5719_v57, %v5719_v57 }
 0x1e7   : > { %v5720_v3 = vpop.f32.mrb[10].mxu0  ;;  %v5521_v14 = vpack.c.bf16 %v1617_v62, %v1617_v62  ;;  %v1745_v15 = vsel %vm8156_vm8, %v1743_v5, %v1742_v34  ;;  %v1873_v16 = vsel %vm8153_vm10, %v1743_v5, %v1872_v35  ;;  %v1992_v17 = vsel %vm8158_vm7, %v1746_v1, %v1743_v5 }
 0x1e8   : > { %v1620_v9 = vpop.f32.mrb[11].mxu0  ;;  %v6661_v18 = vsel %vm8156_vm8, %v2111_v6, %v2110_v36  ;;  %v2144_v21 = vsel %vm8154_vm11, %v2143_v8, %v2142_v37  ;;  %v6668_v23 = vsel %vm8156_vm8, %v2246_v13, %v2245_v39  ;;  %v1709_v26 = vpack.c.bf16 %v5720_v3, %v5719_v57 }
 0x1e9   : > { %v5534_v27 = vpack.c.bf16 %v5720_v3, %v5720_v3  ;;  %v1708_v28 = vpack.c.bf16 %v1620_v9, %v1617_v62  ;;  %v6670_v29 = vunpack.c.l.b16 %v5521_v14  ;;  %v1748_v30 = vsel %vm8154_vm11, %v1746_v1, %v1745_v15 }
 0x1ea   : > { %v2146_v32 = vsel %vm8157_vm9, %v2145_v20, %v2144_v21  ;;  %v6675_v33 = vsel %vm8152_vm12, %v1746_v1, %v1873_v16  ;;  %v1810_v36 = vrot.slane %v6641_v51, 7  ;;  %v1733_v40 = vunpack.c.l.b16 %v1709_v26 }
 0x1eb   : > { %v1732_v41 = vunpack.c.l.b16 %v1708_v28  ;;  %v5533_v42 = vpack.c.bf16 %v1620_v9, %v1620_v9  ;;  %v6684_v52 = vunpack.c.l.b16 %v5534_v27  ;;  %v2077_v54 = vunpack.c.h.b16 %v1708_v28 }
 0x1ec   : > { %v6686_v56 = vunpack.c.l.b16 %v5522_v25  ;;  %v1814_v57 = vrot.slane %v6670_v29, 5  ;;  %v1846_v62 = vrot.slane %v6670_v29, 6  ;;  %v2078_v3 = vunpack.c.h.b16 %v1709_v26 }
 0x1ed   : > { %v5723_v31 = vpop.f32.mrb[12].mxu0  ;;  %v6692_v4 = vrot.slane %v1732_v41, 4  ;;  %v2147_v5 = vrot.slane %v2077_v54, 4  ;;  %v6694_v6 = vrot.slane %v1733_v40, 3  ;;  %v6696_v8 = vunpack.c.l.b16 %v5533_v42 }
 0x1ee   : > { %v1633_v38 = vpop.f32.mrb[13].mxu0  ;;  %v5524_v9 = vpack.c.bf16 %v5723_v31, %v5723_v31  ;;  %v2149_v28 = vrot.slane %v2078_v3, 3 }
 0x1ef   : > { %v5724_v43 = vpop.f32.mrb[14].mxu0  ;;  %v5523_v12 = vpack.c.bf16 %v1633_v38, %v1633_v38  ;;  %v6701_v14 = vsel %vm8157_vm9, %v6692_v4, %v1748_v30  ;;  %v1993_v15 = vsel %vm8156_vm8, %v6692_v4, %v1992_v17  ;;  %v2148_v27 = vsel %vm8153_vm10, %v2147_v5, %v2146_v32 }
 0x1f0   : > { %v1636_v55 = vpop.f32.mrb[15].mxu0  ;;  %v1711_v16 = vpack.c.bf16 %v5724_v43, %v5723_v31  ;;  %v5536_v20 = vpack.c.bf16 %v5724_v43, %v5724_v43  ;;  %v1994_v25 = vsel %vm8154_vm11, %v6694_v6, %v1993_v15  ;;  %v6715_v45 = vunpack.c.l.b16 %v5524_v9 }
 0x1f1   : > { %v1710_v21 = vpack.c.bf16 %v1636_v55, %v1633_v38  ;;  %v5535_v42 = vpack.c.bf16 %v1636_v55, %v1636_v55  ;;  %v6717_v3 = vunpack.c.l.b16 %v5523_v12 }
 0x1f2   : > { %v1735_v40 = vunpack.c.l.b16 %v1711_v16  ;;  %v2080_v41 = vunpack.c.h.b16 %v1711_v16  ;;  %v6719_v55 = vunpack.c.l.b16 %v5536_v20 }
 0x1f3   : > { %v1734_v31 = vunpack.c.l.b16 %v1710_v21  ;;  %v2079_v13 = vunpack.c.h.b16 %v1710_v21  ;;  %v6725_v54 = vunpack.c.l.b16 %v5535_v42  ;;  %v2150_v42 = vsel %vm8152_vm12, %v2149_v28, %v2148_v27 }
 0x1f4   : > { %v6723_v17 = vrot.slane %v1735_v40, 1  ;;  %v2153_v21 = vrot.slane %v2080_v41, 1 }
 0x1f5   : > { %v6707_v26 = vpop.f32.mrb[16].mxu0  ;;  %v6721_v5 = vrot.slane %v1734_v31, 2  ;;  %v2151_v16 = vrot.slane %v2079_v13, 2 }
 0x1f6   : > { %v1649_v30 = vpop.f32.mrb[17].mxu0  ;;  %v5526_v15 = vpack.c.bf16 %v6707_v26, %v6707_v26 }
 0x1f7   : > { %v5728_v43 = vpop.f32.mrb[18].mxu0  ;;  %v1876_v9 = vsel %vm8158_vm7, %v6721_v5, %v6694_v6  ;;  %v6734_v12 = vsel %vm8157_vm9, %v6721_v5, %v1994_v25  ;;  %v2152_v44 = vsel %vm8155_vm13, %v2151_v16, %v2150_v42  ;;  %v5525_v34 = vpack.c.bf16 %v1649_v30, %v1649_v30 }
 0x1f8   : > { %v1652_v32 = vpop.f32.mrb[19].mxu0  ;;  %v1713_v20 = vpack.c.bf16 %v5728_v43, %v6707_v26  ;;  %v5538_v31 = vpack.c.bf16 %v5728_v43, %v5728_v43  ;;  %v1877_v40 = vsel %vm8156_vm8, %v6723_v17, %v1876_v9  ;;  %v6745_v26 = vpack.c.b16 %v2152_v44, %v2152_v44 }
 0x1f9   : > { %v1712_v13 = vpack.c.bf16 %v1652_v32, %v1649_v30  ;;  %v5537_v41 = vpack.c.bf16 %v1652_v32, %v1652_v32  ;;  %v6762_v28 = vunpack.c.l.b16 %v5525_v34 }
 0x1fa   : > { %v1737_v2 = vunpack.c.l.b16 %v1713_v20  ;;  %v2082_v38 = vunpack.c.h.b16 %v1713_v20  ;;  %v6740_v35 = vunpack.c.l.b16 %v5538_v31  ;;  %2163 = vrot.lane.b32.xlu1 %v6745_v26, %s6252_s23 }
 0x1fb   : > { %v1736_v60 = vunpack.c.l.b16 %v1712_v13  ;;  %v2081_v25 = vunpack.c.h.b16 %v1712_v13  ;;  %v6743_v1 = vunpack.c.l.b16 %v5537_v41  ;;  %v1875_v13 = vsel %vm8155_vm13, %v6692_v4, %v6675_v33 }
 0x1fc   : > { %v1761_v39 = vrot.slane %v1737_v2, 7  ;;  %v2123_v32 = vrot.slane %v6740_v35, 7  ;;  %v2155_v9 = vrot.slane %v2082_v38, 7 }
 0x1fd   : > { %v5731_v49 = vpop.f32.mrb[20].mxu0  ;;  %v1878_v16 = vsel %vm8154_vm11, %v1736_v60, %v1877_v40  ;;  %v2154_v31 = vsel %vm8158_vm7, %v2081_v25, %v2153_v21 }
 0x1fe   : > { %v1665_v43 = vpop.f32.mrb[21].mxu0  ;;  %v6756_v2 = vsel %vm8158_vm7, %v1761_v39, %v1736_v60  ;;  %v6760_v30 = vsel %vm8158_vm7, %v2123_v32, %v6743_v1  ;;  %v5528_v38 = vpack.c.bf16 %v5731_v49, %v5731_v49  ;;  %v2156_v25 = vsel %vm8156_vm8, %v2155_v9, %v2154_v31 }
 0x1ff   : > { %v5732_v27 = vpop.f32.mrb[22].mxu0  ;;  %v5527_v41 = vpack.c.bf16 %v1665_v43, %v1665_v43  ;;  %v1879_v34 = vsel %vm8157_vm9, %v1761_v39, %v1878_v16 }
 0x200   : > { %v1668_v44 = vpop.f32.mrb[23].mxu0  ;;  %v1715_v42 = vpack.c.bf16 %v5732_v27, %v5731_v49  ;;  %v5540_v20 = vpack.c.bf16 %v5732_v27, %v5732_v27  ;;  %v6768_v47 = vunpack.c.l.b16 %v5528_v38 }
 0x201   : > { %v1714_v40 = vpack.c.bf16 %v1668_v44, %v1665_v43  ;;  %v5539_v21 = vpack.c.bf16 %v1668_v44, %v1668_v44  ;;  %v6770_v59 = vunpack.c.l.b16 %v5527_v41  ;;  %v6775_v44 = vunpack.c.l.b16 %v5526_v15 }
 0x202   : > { %v1739_v32 = vunpack.c.l.b16 %v1715_v42  ;;  %v2084_v10 = vunpack.c.h.b16 %v1715_v42  ;;  %v6777_v9 = vunpack.c.l.b16 %v5540_v20  ;;  %v1822_v42 = vrot.slane %v6762_v28, 1 }
 0x203   : > { %v1738_v49 = vunpack.c.l.b16 %v1714_v40  ;;  %v2083_v27 = vunpack.c.h.b16 %v1714_v40  ;;  %v6779_v31 = vunpack.c.l.b16 %v5539_v21  ;;  %v1824_v40 = vrot.slane %v6770_v59, 7 }
 0x204   : > { %v6781_v33 = vrot.slane %v1739_v32, 5  ;;  %v2159_v4 = vrot.slane %v2084_v10, 5  ;;  %v1826_v16 = vrot.slane %v6768_v47, 6  ;;  %v1991_v15 = vsel %vm8155_vm13, %v6623_v24, %v6620_v19 }
 0x205   : > { %v6783_v38 = vrot.slane %v1738_v49, 6  ;;  %v2157_v41 = vrot.slane %v2083_v27, 6  ;;  %v1996_v10 = vsel %vm8153_vm10, %v6723_v17, %v6734_v12  ;;  %v1854_v32 = vrot.slane %v6762_v28, 2 }
 0x206   : > { %v1823_v43 = vsel %vm8158_vm7, %v6775_v44, %v1822_v42  ;;  %v1997_v19 = vsel %vm8152_vm12, %v1736_v60, %v1996_v10  ;;  %v2125_v42 = vrot.slane %v6779_v31, 6 }
 0x207   : > { %v2158_v20 = vsel %vm8154_vm11, %v2157_v41, %v2156_v25  ;;  %v1880_v21 = vsel %vm8153_vm10, %v6783_v38, %v1879_v34  ;;  %v1825_v34 = vsel %vm8156_vm8, %v1824_v40, %v1823_v43  ;;  %v1998_v12 = vsel %vm8155_vm13, %v1761_v39, %v1997_v19 }
 0x208   : > { %v2160_v49 = vsel %vm8157_vm9, %v2159_v4, %v2158_v20  ;;  %v1881_v27 = vsel %vm8152_vm12, %v6781_v33, %v1880_v21  ;;  %v1827_v41 = vsel %vm8154_vm11, %v1826_v16, %v1825_v34  ;;  %v6811_v37 = vpack.c.b16 %v1998_v12, %v1991_v15 }
 0x209   : > { %v6804_v24 = vpack.c.b16 %v2160_v49, %v2160_v49  ;;  %v6806_v25 = vpack.c.b16 %v1881_v27, %v1875_v13  ;;  %v1855_v4 = vrot.slane %v6775_v44, 1  ;;  %v1858_v20 = vrot.slane %v6768_v47, 7 }
 0x20a   : > { %v1999_v60 = vsel %vm8158_vm7, %v6781_v33, %v6783_v38  ;;  %v1939_v39 = vrot.slane %v6762_v28, 4  ;;  %v1940_v13 = vrot.slane %v6775_v44, 3  ;;  %v1829_v43 = vpack.c.b16 %v1827_v41, %v1827_v41 }
 0x20b   : > { %2165 = vrot.lane.b32.xlu1 %v6804_v24, %s6252_s23  ;;  %1883 = vrot.lane.b32.xlu0 %v6806_v25, %s6252_s23  ;;  %v1856_v40 = vsel %vm8158_vm7, %v1855_v4, %v1854_v32  ;;  %v6826_v16 = vpack.c.b16 %v1999_v60, %v1999_v60  ;;  %v1942_v15 = vrot.slane %v6770_v59, 2  ;;  %v1944_v49 = vrot.slane %v6768_v47, 1 }
 0x20c   : > { %v1857_v21 = vsel %vm8156_vm8, %v6770_v59, %v1856_v40  ;;  %v1941_v10 = vsel %vm8158_vm7, %v1940_v13, %v1939_v39  ;;  %v1809_v27 = vsel %vm8158_vm7, %v6614_v7, %v1808_v50  ;;  %v1818_v12 = vrot.slane %v6717_v3, 3 }
 0x20d   : > { %v1859_v19 = vsel %vm8154_vm11, %v1858_v20, %v1857_v21  ;;  %v1943_v32 = vsel %vm8156_vm8, %v1942_v15, %v1941_v10  ;;  %v1811_v34 = vsel %vm8156_vm8, %v1810_v36, %v1809_v27  ;;  %v1816_v20 = vrot.slane %v6686_v56, 4 }
 0x20e   : > { %v1861_v41 = vpack.c.b16 %v1859_v19, %v1859_v19  ;;  %v1945_v4 = vsel %vm8154_vm11, %v1944_v49, %v1943_v32  ;;  %v1813_v50 = vsel %vm8154_vm11, %v1812_v63, %v1811_v34  ;;  %v1820_v60 = vrot.slane %v6715_v45, 2 }
 0x20f   : > { %1832 = vrot.lane.b32.xlu1 %v1829_v43, %s6251_s22  ;;  %2002 = vrot.lane.b32.xlu0 %v6811_v37, %s6252_s23  ;;  %v1815_v36 = vsel %vm8157_vm9, %v1814_v57, %v1813_v50  ;;  %v1972_v39 = vrot.slane %v6762_v28, 5  ;;  %v1973_v13 = vrot.slane %v6775_v44, 4  ;;  %v1975_v40 = vrot.slane %v6770_v59, 3 }
 0x210   : > { %v1817_v43 = vsel %vm8153_vm10, %v1816_v20, %v1815_v36  ;;  %v1977_v15 = vrot.slane %v6768_v47, 2  ;;  %v1845_v63 = vsel %vm8154_vm11, %v1844_v0, %v6650_v61  ;;  %v1848_v49 = vrot.slane %v6686_v56, 5 }
 0x211   : > { %v1819_v21 = vsel %vm8152_vm12, %v1818_v12, %v1817_v43  ;;  %v1974_v57 = vsel %vm8158_vm7, %v1973_v13, %v1972_v39  ;;  %v1847_v10 = vsel %vm8157_vm9, %v1846_v62, %v1845_v63  ;;  %v1947_v27 = vpack.c.b16 %v1945_v4, %v1945_v4 }
 0x212   : > { %v1821_v19 = vsel %vm8155_vm13, %v1820_v60, %v1819_v21  ;;  %v1976_v61 = vsel %vm8156_vm8, %v1975_v40, %v1974_v57  ;;  %v1850_v0 = vrot.slane %v6717_v3, 4  ;;  %v1849_v34 = vsel %vm8153_vm10, %v1848_v49, %v1847_v10 }
 0x213   : > { %1864 = vrot.lane.b32.xlu1 %v1861_v41, %s6253_s18  ;;  %2004 = vrot.lane.b32.xlu0 %v6826_v16, %s6252_s23  ;;  %v1978_v32 = vsel %vm8154_vm11, %v1977_v15, %v1976_v61  ;;  %v1852_v62 = vrot.slane %v6715_v45, 3  ;;  %v2054_v12 = vrot.slane %v6762_v28, 7  ;;  %v1828_v50 = vpack.c.b16 %v1821_v19, %v1821_v19 }
 0x214   : > { %v1851_v41 = vsel %vm8152_vm12, %v1850_v0, %v1849_v34  ;;  %v2055_v20 = vrot.slane %v6775_v44, 6  ;;  %v2057_v4 = vrot.slane %v6770_v59, 5  ;;  %v1980_v36 = vpack.c.b16 %v1978_v32, %v1978_v32 }
 0x215   : > { %v1853_v60 = vsel %vm8155_vm13, %v1852_v62, %v1851_v41  ;;  %v1927_v39 = vsel %vm8158_vm7, %v1926_v46, %v1925_v58  ;;  %v1933_v13 = vrot.slane %v6686_v56, 7  ;;  %v2059_v59 = vrot.slane %v6768_v47, 4 }
 0x216   : > { %v2056_v28 = vsel %vm8158_vm7, %v2055_v20, %v2054_v12  ;;  %v8182_v44 = vrot.slane %v6641_v51, 2  ;;  %v1935_v40 = vrot.slane %v6717_v3, 6  ;;  %v1860_v15 = vpack.c.b16 %v1853_v60, %v1853_v60 }
 0x217   : > { %1950 = vrot.lane.b32.xlu1 %v1947_v27, %s8170_s19  ;;  %1830 = vrot.lane.b32.xlu0 %v1828_v50, %s6251_s22  ;;  %v2058_v46 = vsel %vm8156_vm8, %v2057_v4, %v2056_v28  ;;  %v8183_v58 = vrot.slane %v6637_v48, 1  ;;  %v8184_v21 = vrot.slane %v6616_v11, 5  ;;  %v8185_v57 = vrot.slane %v6614_v7, 4 }
 0x218   : > { %v1929_v43 = vsel %vm8156_vm8, %v8182_v44, %v1927_v39  ;;  %v2060_v47 = vsel %vm8154_vm11, %v2059_v59, %v2058_v46  ;;  %v8186_v27 = vrot.slane %v6641_v51, 3  ;;  %v1968_v61 = vrot.slane %v6717_v3, 7 }
 0x219   : > { %v1931_v63 = vsel %vm8154_vm11, %v8183_v58, %v1929_v43  ;;  %v1960_v10 = vsel %vm8158_vm7, %v8185_v57, %v8184_v21  ;;  %v2062_v0 = vpack.c.b16 %v2060_v47, %v2060_v47  ;;  %v1937_v34 = vrot.slane %v6715_v45, 5 }
 0x21a   : > { %v1932_v49 = vsel %vm8157_vm9, %v6670_v29, %v1931_v63  ;;  %v1962_v19 = vsel %vm8156_vm8, %v8186_v27, %v1960_v10  ;;  %v8187_v62 = vrot.slane %v6637_v48, 2  ;;  %v8188_v41 = vrot.slane %v6670_v29, 1 }
 0x21b   : > { %v1934_v32 = vsel %vm8153_vm10, %v1933_v13, %v1932_v49  ;;  %1983 = vrot.lane.b32.xlu1 %v1980_v36, %s6255_s20  ;;  %1862 = vrot.lane.b32.xlu0 %v1860_v15, %s6253_s18  ;;  %v1970_v4 = vrot.slane %v6715_v45, 6  ;;  %v1754_v60 = vsel %vm8153_vm10, %v6694_v6, %v6701_v14  ;;  %v1764_v28 = vsel %vm8156_vm8, %v6783_v38, %v6756_v2  ;;  %s6259_s18 = smov 48  }
 0x21c   : > { %v1964_v12 = vsel %vm8154_vm11, %v8187_v62, %v1962_v19  ;;  %v1936_v50 = vsel %vm8152_vm12, %v1935_v40, %v1934_v32  ;;  %v1757_v36 = vsel %vm8152_vm12, %v6721_v5, %v1754_v60  ;;  %v1766_v6 = vsel %vm8154_vm11, %v6781_v33, %v1764_v28 }
 0x21d   : > { %v1966_v20 = vsel %vm8157_vm9, %v8188_v41, %v1964_v12  ;;  %v1938_v39 = vsel %vm8155_vm13, %v1937_v34, %v1936_v50  ;;  %v1760_v43 = vsel %vm8155_vm13, %v6723_v17, %v1757_v36  ;;  %v2127_v14 = vrot.slane %v6777_v9, 5 }
 0x21e   : > { %v1967_v13 = vsel %vm8153_vm10, %v6686_v56, %v1966_v20  ;;  %v1946_v59 = vpack.c.b16 %v1938_v39, %v1938_v39  ;;  %v6945_v15 = vpack.c.b16 %v1766_v6, %v1760_v43  ;;  %v8189_v5 = vrot.slane %v6616_v11, 7 }
 0x21f   : > { %v1969_v44 = vsel %vm8152_vm12, %v1968_v61, %v1967_v13  ;;  %v8190_v2 = vrot.slane %v6614_v7, 6  ;;  %v2226_v46 = vrot.slane %v6740_v35, 1  ;;  %2065 = vrot.lane.b32.xlu1 %v2062_v0, %s6256_s24  ;;  %v8191_v17 = vrot.slane %v6641_v51, 5 }
 0x220   : > { %v1971_v40 = vsel %vm8155_vm13, %v1970_v4, %v1969_v44  ;;  %1948 = vrot.lane.b32.xlu0 %v1946_v59, %s8170_s19  ;;  %v2051_v58 = vrot.slane %v6717_v3, 1  ;;  %v2126_v7 = vsel %vm8156_vm8, %v2125_v42, %v6760_v30  ;;  %v8192_v11 = vrot.slane %v6637_v48, 4 }
 0x221   : > { %v2042_v38 = vsel %vm8158_vm7, %v8190_v2, %v8189_v5  ;;  %v2049_v51 = vrot.slane %v6686_v56, 2  ;;  %v2128_v21 = vsel %vm8154_vm11, %v2127_v14, %v2126_v7  ;;  %v8193_v3 = vrot.slane %v6643_v53, 5 }
 0x222   : > { %v2044_v33 = vsel %vm8156_vm8, %v8191_v17, %v2042_v38  ;;  %v2258_v30 = vrot.slane %v6740_v35, 2  ;;  %v1979_v42 = vpack.c.b16 %v1971_v40, %v1971_v40  ;;  %v8194_v10 = vrot.slane %v6670_v29, 3 }
 0x223   : > { %v2046_v63 = vsel %vm8154_vm11, %v8192_v11, %v2044_v33  ;;  %v2114_v57 = vsel %vm8154_vm11, %v8193_v3, %v6661_v18  ;;  %v8195_v48 = vrot.slane %v6696_v8, 4  ;;  %v2225_v56 = vrot.slane %v6743_v1, 2  ;;  %1768 = vrot.lane.b32.xlu1 %v6945_v15, %s6252_s23 }
 0x224   : > { %v2048_v47 = vsel %vm8157_vm9, %v8194_v10, %v2046_v63  ;;  %v2257_v27 = vrot.slane %v6743_v1, 3  ;;  %v8196_v61 = vrot.slane %v6684_v52, 3  ;;  %v2229_v35 = vrot.slane %v6777_v9, 7  ;;  %1981 = vrot.lane.b32.xlu0 %v1979_v42, %s6255_s20 }
 0x225   : > { %v2116_v49 = vsel %vm8157_vm9, %v8195_v48, %v2114_v57  ;;  %v2050_v19 = vsel %vm8153_vm10, %v2049_v51, %v2048_v47  ;;  %v8197_v0 = vrot.slane %v6725_v54, 2  ;;  %v8198_v1 = vrot.slane %v6696_v8, 6 }
 0x226   : > { %v2118_v18 = vsel %vm8153_vm10, %v8196_v61, %v2116_v49  ;;  %v2052_v29 = vsel %vm8152_vm12, %v2051_v58, %v2050_v19  ;;  %v2260_v62 = vrot.slane %v6779_v31, 1  ;;  %v8199_v50 = vrot.slane %v6719_v55, 1 }
 0x227   : > { %v2120_v32 = vsel %vm8152_vm12, %v8197_v0, %v2118_v18  ;;  %v2218_v34 = vsel %vm8157_vm9, %v8198_v1, %v6665_v22  ;;  %v2053_v12 = vsel %vm8155_vm13, %v6715_v45, %v2052_v29  ;;  %v8200_v20 = vrot.slane %v6684_v52, 5 }
 0x228   : > { %v2122_v41 = vsel %vm8155_vm13, %v8199_v50, %v2120_v32  ;;  %v2061_v60 = vpack.c.b16 %v2053_v12, %v2053_v12  ;;  %v2130_v39 = vpack.c.b16 %v2128_v21, %v2128_v21  ;;  %v8201_v13 = vrot.slane %v6725_v54, 4 }
 0x229   : > { %v2220_v4 = vsel %vm8153_vm10, %v8200_v20, %v2218_v34  ;;  %v2248_v22 = vsel %vm8154_vm11, %v6643_v53, %v6668_v23  ;;  %v8202_v45 = vrot.slane %v6719_v55, 3  ;;  %v8203_v59 = vrot.slane %v6696_v8, 7 }
 0x22a   : > { %v2222_v36 = vsel %vm8152_vm12, %v8201_v13, %v2220_v4  ;;  %v2227_v43 = vsel %vm8158_vm7, %v2226_v46, %v2225_v56  ;;  %v2259_v6 = vsel %vm8158_vm7, %v2258_v30, %v2257_v27  ;;  %v2255_v14 = vrot.slane %v6719_v55, 4  ;;  %2063 = vrot.lane.b32.xlu0 %v2061_v60, %s6256_s24  ;;  %2133 = vrot.lane.b32.xlu1 %v2130_v39, %s6257_s12 }
 0x22b   : > { %v7020_v28 = vsel %vm8155_vm13, %v8202_v45, %v2222_v36  ;;  %v2250_v44 = vsel %vm8157_vm9, %v8203_v59, %v2248_v22  ;;  %v8204_v53 = vrot.slane %v6684_v52, 6  ;;  %v2228_v40 = vsel %vm8156_vm8, %v6779_v31, %v2227_v43  ;;  %v6105_v59 = vld [vmem:[%s6966_s10 + $0x54] sm:$0xff]  }
 0x22c   : > { %v8205_v8 = vrot.slane %v6725_v54, 5  ;;  %v7038_v2 = vsel %vm8154_vm11, %v2229_v35, %v2228_v40  ;;  %v2261_v55 = vsel %vm8156_vm8, %v2260_v62, %v2259_v6  ;;  %v2129_v38 = vpack.c.b16 %v2122_v41, %v2122_v41 }
 0x22d   : > { %v2252_v23 = vsel %vm8153_vm10, %v8204_v53, %v2250_v44  ;;  %v7046_v52 = vsel %vm8154_vm11, %v6777_v9, %v2261_v55  ;;  %vm2180_vm10 = vsmask.f32 7440  ;;  %vm1893_vm11 = vsmask.f32 2304 }
 0x22e   : > { %v2254_v5 = vsel %vm8152_vm12, %v8205_v8, %v2252_v23  ;;  %2131 = vrot.lane.b32.xlu0 %v2129_v38, %s6257_s12  ;;  %vm7061_vm12 = vmor %vm2020_vm14, %vm8157_vm9  ;;  %v8210_v53 = vmov 0  ;;  %v6109_v23 = vld [vmem:[%s6966_s10 + $0x60] sm:$0xff]   ;;  %v2665_v55 = vshll.u32 %v6105_v59, 16  ;;  %vm1838_vm8 = vcmask 91200  }
 0x22f   : > { %v7042_v46 = vsel %vm8155_vm13, %v2255_v14, %v2254_v5  ;;  %vm7073_vm14 = vmor %vm2179_vm15, %vm2180_vm10  ;;  %vm1894_vm13 = vsmask.f32 6416  ;;  %v6106_v5 = vld [vmem:[%s6966_s10 + $0x5c] ss:$0 sps:$4 sm:$0x11]   ;;  %vm8160_vm15 = vcmask 93248  }
 0x230   : > { %vm7086_vm10 = vmor %vm1893_vm11, %vm1894_vm13  ;;  %vm8161_vm11 = vcmask 60416   ;;  %vm1782_vm13 = vcmask 58368   ;;  %vm1868_vm9 = vcmask 126048   ;;  %vm1870_vm7 = vcmask 124000  }
 0x231   : > { %v8211_v53 = vsel %vm7086_vm10, 4294967295, %v8210_v53 }
 0x26c   : > { %v2164_v17 = vpop.permute.xlu1 %2163 }
 0x26d   : > { %v2169_v54 = vsel %vm8164_vm2, %v6745_v26, %v2164_v17 }
 0x26e   : > { %v5309_v31 = vcombine.high %v2169_v54, %v2169_v54  ;;  %v7099_v54 = vld [vmem:[%s6966_s10 + $0x54] sm:$0xfe]  }
 0x270   : > { %v2183_v33 = vshrl.u32 %v5309_v31, 16  ;;  %v2186_v58 = vshll.u32 %v5309_v31, 16  ;;  %v6110_v31 = vld [vmem:[%s6966_s10 + $0x68] ss:$0 sps:$4 sm:$0x11]  }
 0x272   : > { %v2185_v57 = vrot.slane %v2183_v33, 4  ;;  %v2188_v30 = vrot.slane %v2186_v58, 5  ;;  %v2677_v33 = vshll.u32 %v6109_v23, 16 }
 0x274   : > { %v2189_v18 = vor.u32 %v2188_v30, %v2185_v57  ;;  %v2263_v57 = vpack.c.b16 %v7042_v46, %v7042_v46  ;;  %v2232_v30 = vpack.c.b16 %v7038_v2, %v7038_v2  ;;  %v8171_v2 = vmov 0.0  }
 0x275   : > { %5733 = vmatprep.subr.bf16.mxu1 %v8171_v2 }
 0x276   : > { %v2190_v22 = vrot.slane %v2189_v18, 4 }
 0x27d   : > { %v2166_v7 = vpop.permute.xlu1 %2165  ;;  %v1884_v11 = vpop.permute.xlu0 %1883 }
 0x27e   : > { %v2172_v63 = vsel %vm8164_vm2, %v6804_v24, %v2166_v7  ;;  %v1887_v51 = vsel %vm8164_vm2, %v6806_v25, %v1884_v11  ;;  %v2663_v7 = vshrl.u32 %v6105_v59, 16  ;;  %v2667_v11 = vrot.slane %v2665_v55, 1 }
 0x27f   : > { %v5310_v21 = vcombine.low %v2172_v63, %v2172_v63  ;;  %v5291_v3 = vcombine.low %v1887_v51, %v1887_v51  ;;  %v5292_v9 = vcombine.high %v1887_v51, %v1887_v51  ;;  %v2670_v63 = vshll.u32 %v6106_v5, 16  ;;  %v7103_v51 = vld [vmem:[%s6966_s10 + $0x6c] sm:$0xff]  }
 0x281   : > { %v1897_v42 = vshrl.u32 %v5291_v3, 16  ;;  %v1900_v10 = vshll.u32 %v5291_v3, 16  ;;  %v7054_v47 = vpop.permute.xlu1 %1832  ;;  %v2003_v26 = vpop.permute.xlu0 %2002  ;;  %v1906_v48 = vshrl.u32 %v5292_v9, 16  ;;  %v1909_v49 = vshll.u32 %v5292_v9, 16  ;;  %v6153_v3 = vld [vmem:[%s6966_s10 + $0x54] sm:$0xff]  }
 0x282   : > { %v2008_v56 = vsel %vm8164_vm2, %v6811_v37, %v2003_v26  ;;  %v2192_v24 = vshll.u32 %v5310_v21, 16  ;;  %v2196_v35 = vshrl.u32 %v5310_v21, 16  ;;  %v2231_v21 = vpack.c.b16 %v7020_v28, %v7020_v28  ;;  %v6154_v26 = vld [vmem:[%s6966_s10 + $0x60] sm:$0xff]   ;;  %2441 = vst.msk [vmem:[#allocation3 + $0x38] sm:$0xff] %vm8164_vm2, %v6153_v3 }
 0x283   : > { %v1899_v27 = vrot.slane %v1897_v42, 5  ;;  %v1902_v25 = vrot.slane %v1900_v10, 6  ;;  %v5293_v19 = vcombine.low %v2008_v56, %v2008_v56  ;;  %v5294_v61 = vcombine.high %v2008_v56, %v2008_v56  ;;  %v7114_v42 = vld [vmem:[%s6966_s10 + $0x5c] ss:$0 sps:$4 sm:$0x11]   ;;  %2442 = vst.msk [vmem:[#allocation3 + $0x40] sm:$0xff] %vm8164_vm2, %v6154_v26 }
 0x284   : > { %v1908_v29 = vrot.slane %v1906_v48, 5  ;;  %v1911_v37 = vrot.slane %v1909_v49, 6  ;;  %v2194_v41 = vrot.slane %v2192_v24, 5  ;;  %v7117_v10 = vld [vmem:[%s6966_s10 + $0x78] sm:$0xff]   ;;  %v2923_v48 = vrot.slane %v7099_v54, 1 }
 0x285   : > { %v7058_v0 = vpop.permute.xlu1 %1864  ;;  %v2005_v32 = vpop.permute.xlu0 %2004  ;;  %v5296_v34 = vrot.slane %v5293_v19, 11  ;;  %v2025_v62 = vrot.slane %v5294_v61, 7  ;;  %v1903_v4 = vor.u32 %v1902_v25, %v1899_v27  ;;  %v2675_v49 = vshrl.u32 %v6109_v23, 16  ;;  %v6112_v19 = vld [vmem:[%s6966_s10 + $0x74] ss:$0 sps:$4 sm:$0x11]  }
 0x286   : > { %v2011_v12 = vsel %vm8164_vm2, %v6826_v16, %v2005_v32  ;;  %v2198_v16 = vrot.slane %v2196_v35, 4  ;;  %v1912_v45 = vor.u32 %v1911_v37, %v1908_v29  ;;  %v2195_v43 = vsel %vm7073_vm14, %v2190_v22, %v2194_v41  ;;  %v7130_v29 = vld [vmem:[%s6966_s10 + $0x60] sm:$0xfe]   ;;  %v6115_v22 = vld [vmem:[%s6966_s10 + $0x6c] sm:$0xfe]  }
 0x287   : > { %v5295_v50 = vcombine.low %v2011_v12, %v2011_v12  ;;  %v2026_v20 = vsel %vm7061_vm12, %v5296_v34, %v2025_v62  ;;  %v2027_v60 = vrot.slane %v2025_v62, 4  ;;  %v1904_v6 = vrot.slane %v1903_v4, 4  ;;  %v6125_v23 = vld [vmem:[%s6966_s10 + $0xc] sm:$0xff]   ;;  %v6120_v54 = vld [vmem:[%s6966_s10 + $0x8] ss:$0 sps:$4 sm:$0x11]  }
 0x288   : > { %2030 = vrot.lane.b32.xlu0 %v2026_v20, %s6258_s13  ;;  %v1914_v40 = vrot.slane %v1912_v45, 4  ;;  %v2199_v8 = vor.u32 %v2198_v16, %v2194_v41  ;;  %v2679_v56 = vrot.slane %v2677_v33, 1  ;;  %v2682_v24 = vshll.u32 %v6110_v31, 16  ;;  %v6155_v16 = vld [vmem:[%s6966_s10 + $0x6c] sm:$0xff]   ;;  %v6159_v33 = vld [vmem:[%s6966_s10] sm:$0xff]  }
 0x289   : > { %v2028_v39 = vrot.slane %v5295_v50, 7  ;;  %v7070_v13 = vpop.permute.xlu1 %1950  ;;  %v1913_v38 = vsel %vm7086_vm10, %v1904_v6, %v1912_v45  ;;  %v1831_v9 = vpop.permute.xlu0 %1830  ;;  %v2668_v27 = vor.u32 %v2667_v11, %v2663_v7  ;;  %v2672_v25 = vrot.slane %v2670_v63, 1  ;;  %v6114_v50 = vld [vmem:[%s6966_s10 + $0x68] ss:$0 sps:$4 sm:$0x11]   ;;  %2443 = vst.msk [vmem:[#allocation3 + $0x48] sm:$0xff] %vm8164_vm2, %v6155_v16 }
 0x28a   : > { %v2200_v58 = vrot.slane %v2199_v8, 4  ;;  %v2689_v61 = vshll.u32 %v7103_v51, 16  ;;  %v2264_v32 = vpack.c.b16 %v7046_v52, %v7046_v52  ;;  %v2701_v37 = vshll.u32 %v7117_v10, 16  ;;  %v6116_v45 = vld [vmem:[%s6966_s10 + $0x74] ss:$0 sps:$4 sm:$0x11]  }
 0x28b   : > { %v2029_v44 = vsel %vm7061_vm12, %v2027_v60, %v2028_v39  ;;  %v2924_v34 = vrot.slane %v7114_v42, 1  ;;  %v2680_v62 = vor.u32 %v2679_v56, %v2675_v49  ;;  %v2684_v12 = vrot.slane %v2682_v24, 1  ;;  %v7145_v39 = vld [vmem:[%s6966_s10] sm:$0xff]   ;;  %2434 = vst.msk [vmem:[#allocation3] sm:$0xff] %vm8164_vm2, %v6159_v33  ;;  %v6127_v42 = vld [vmem:[%s6966_s10 + $0x18] sm:$0xff]  }
 0x28c   : > { %2032 = vrot.lane.b32.xlu1 %v2029_v44, %s6258_s13  ;;  %2201 = vrot.lane.b32.xlu0 %v2195_v43, %s6259_s18  ;;  %v2687_v52 = vshrl.u32 %v7103_v51, 16  ;;  %v2673_v20 = vsel %vm633_vm1, %v2668_v27, %v2672_v25  ;;  %v2691_v4 = vrot.slane %v2689_v61, 1  ;;  %v2694_v60 = vshll.u32 %v6112_v19, 16  ;;  %v7169_v8 = vld [vmem:[%s8149_s6 + $0x20] sm:$0x3f]  }
 0x28d   : > { %v7084_v14 = vpop.permute.xlu1 %1983  ;;  %v1863_v41 = vpop.permute.xlu0 %1862  ;;  %v2699_v59 = vshrl.u32 %v7117_v10, 16  ;;  %v2926_v43 = vrot.slane %v7130_v29, 1  ;;  %v2927_v6 = vrot.slane %v6114_v50, 1  ;;  %v2925_v5 = vsel %vm1013_vm0, %v2923_v48, %v2924_v34  ;;  %5966 = vmatprep.subr.msk.bf16.mxu0 %vm8166_vm3, %v7169_v8  ;;  %v6133_v27 = vld [vmem:[%s6966_s10 + $0x24] sm:$0xff]   ;;  %v6161_v29 = vld [vmem:[%s6966_s10 + $0x18] sm:$0xff]  }
 0x28e   : > { %v2692_v55 = vor.u32 %v2691_v4, %v2687_v52  ;;  %v2581_v31 = vshll.u32 %v7145_v39, 16  ;;  %v7179_v7 = vsel %vm8166_vm3, %v7169_v8, 0  ;;  %v2929_v11 = vrot.slane %v6115_v22, 1  ;;  %v6123_v34 = vld [vmem:[%s6966_s10] sm:$0xfe]   ;;  %2436 = vst.msk [vmem:[#allocation3 + $0x10] sm:$0xff] %vm8164_vm2, %v6161_v29 }
 0x28f   : > { %5740 = vmatpush3.bf16.msra.mxu0 %v7179_v7  ;;  %v2928_v3 = vsel %vm1013_vm0, %v2926_v43, %v2927_v6  ;;  %v2579_v26 = vshrl.u32 %v7145_v39, 16  ;;  %v2586_v48 = vshll.u32 %v6120_v54, 16  ;;  %v2591_v19 = vshrl.u32 %v6125_v23, 16  ;;  %v6129_v16 = vld [vmem:[%s6966_s10 + $0xc] sm:$0xfe]   ;;  %v6141_v33 = vld [vmem:[%s6966_s10 + $0x3c] sm:$0xff]  }
 0x290   : > { %1917 = vrot.lane.b32.xlu1 %v1914_v40, %s6260_s21  ;;  %1915 = vrot.lane.b32.xlu0 %v1913_v38, %s6260_s21  ;;  %v6157_v40 = vld [vmem:[%s6966_s10 + $0x78] sm:$0xff]   ;;  %v2696_v38 = vrot.slane %v2694_v60, 1  ;;  %v2603_v52 = vshrl.u32 %v6127_v42, 16  ;;  %v6130_v22 = vld [vmem:[%s6966_s10 + $0x14] ss:$0 sps:$4 sm:$0x11]  }
 0x291   : > { %v7096_v17 = vpop.permute.xlu1 %2065  ;;  %2444 = vst.msk [vmem:[#allocation3 + $0x50] sm:$0xff] %vm8164_vm2, %v6157_v40  ;;  %v2615_v43 = vshrl.u32 %v6133_v27, 16  ;;  %v2905_v54 = vrot.slane %v6129_v16, 1  ;;  %v2639_v29 = vshrl.u32 %v6141_v33, 16  ;;  %vm2139_vm3 = vcmask 386400  }
 0x292   : > { %v2697_v10 = vsel %vm633_vm1, %v2692_v55, %v2696_v38 }
 0x294   : > { %2203 = vrot.lane.b32.xlu1 %v2200_v58, %s6259_s18  ;;  %2233 = vrot.lane.b32.xlu0 %v2231_v21, %s8159_s25  ;;  %v6126_v58 = vld [vmem:[%s6966_s10 + $0x14] ss:$0 sps:$4 sm:$0x11]   ;;  %v6121_v21 = vld [vmem:[%s6966_s10 + $0x78] sm:$0xfe]  }
 0x295   : > { %v1769_v28 = vpop.permute.xlu1 %1768  ;;  %v2598_v49 = vshll.u32 %v6126_v58, 16  ;;  %v2932_v24 = vrot.slane %v6121_v21, 1  ;;  %v6162_v58 = vld [vmem:[%s6966_s10 + $0x24] sm:$0xff]  }
 0x296   : > { %v1772_v46 = vsel %vm8164_vm2, %v6945_v15, %v1769_v28  ;;  %v6118_v15 = vld [vmem:[%s6966_s10 + $0x80] ss:$0 sps:$4 sm:$0x11]   ;;  %v2583_v28 = vrot.slane %v2581_v31, 1  ;;  %v2906_v31 = vrot.slane %v6130_v22, 1  ;;  %2437 = vst.msk [vmem:[#allocation3 + $0x18] sm:$0xff] %vm8164_vm2, %v6162_v58 }
 0x297   : > { %v5277_v18 = vcombine.low %v1772_v46, %v1772_v46  ;;  %v5278_v35 = vcombine.high %v1772_v46, %v1772_v46  ;;  %v2706_v44 = vshll.u32 %v6118_v15, 16  ;;  %v6128_v46 = vld [vmem:[%s6966_s10 + $0x20] ss:$0 sps:$4 sm:$0x11]  }
 0x298   : > { %2235 = vrot.lane.b32.xlu1 %v2232_v30, %s8159_s25  ;;  %2265 = vrot.lane.b32.xlu0 %v2263_v57, %s6263_s26  ;;  %v6122_v57 = vld [vmem:[%s6966_s10 + $0x80] ss:$0 sps:$4 sm:$0x11]   ;;  %v2593_v30 = vshll.u32 %v6125_v23, 16  ;;  %v2584_v15 = vor.u32 %v2583_v28, %v2579_v26  ;;  %v2610_v50 = vshll.u32 %v6128_v46, 16  ;;  %s5975_s25 = smul.u32 80, %s6364_s17 }
 0x299   : > { %1781 = vst.msk [vmem:[#allocation5] sm:$0xf] %vm8161_vm11, %v5277_v18  ;;  %v2708_v51 = vrot.slane %v2706_v44, 1  ;;  %v2933_v25 = vrot.slane %v6122_v57, 1  ;;  %v2605_v18 = vshll.u32 %v6127_v42, 16  ;;  %v6135_v44 = vld [vmem:[%s6966_s10 + $0x30] sm:$0xff]  }
 0x29a   : > { %1783 = vst.msk [vmem:[#allocation5 + $0x4] sm:$0x3] %vm1782_vm13, %v5278_v35  ;;  %vm8162_vm13 = vmmov 0   ;;  %v2595_v61 = vrot.slane %v2593_v30, 1  ;;  %v6160_v35 = vld [vmem:[%s6966_s10 + $0xc] sm:$0xff]   ;;  %v2612_v6 = vrot.slane %v2610_v50, 1  ;;  %s7425_s19 = scalar_lea.vmem %s8147_s4, %s5975_s25 }
 0x29b   : > { %1837 = vst.msk [vmem:[#allocation5] sm:$0xf] %vm8160_vm15, %v1831_v9  ;;  %5735 = vmatprep.mubr.msk.bf16.mxu1 %vm8162_vm13, %v8171_v2  ;;  %v2930_v9 = vrot.slane %v6116_v45, 1  ;;  %v2934_v4 = vsel %vm1013_vm0, %v2932_v24, %v2933_v25  ;;  %v2607_v39 = vrot.slane %v2605_v18, 1  ;;  %v2629_v21 = vshll.u32 %v6135_v44, 16 }
 0x29c   : > { %1839 = vst.msk [vmem:[#allocation5 + $0x4] sm:$0x3] %vm1838_vm8, %v7054_v47  ;;  %2267 = vrot.lane.b32.xlu1 %v2264_v32, %s6263_s26  ;;  %v2703_v47 = vrot.slane %v2701_v37, 1  ;;  %2736 = vrot.lane.b32.xlu0 %v2673_v20, %s6252_s23  ;;  %v2588_v37 = vrot.slane %v2586_v48, 1  ;;  %v2617_v20 = vshll.u32 %v6133_v27, 16  ;;  %v2596_v60 = vor.u32 %v2595_v61, %v2591_v19 }
 0x29d   : > { %1869 = vst.msk [vmem:[#allocation5] sm:$0xf] %vm1868_vm9, %v1863_v41  ;;  %v2931_v32 = vsel %vm1013_vm0, %v2929_v11, %v2930_v9  ;;  %v6134_v41 = vld [vmem:[%s6966_s10 + $0x2c] ss:$0 sps:$4 sm:$0x11]   ;;  %v2608_v38 = vor.u32 %v2607_v39, %v2603_v52  ;;  %v6164_v11 = vld [vmem:[%s6966_s10 + $0x30] sm:$0xff]  }
 0x29e   : > { %1871 = vst.msk [vmem:[#allocation5 + $0x4] sm:$0x3] %vm1870_vm7, %v7058_v0  ;;  %v2685_v0 = vsel %vm633_vm1, %v2680_v62, %v2684_v12  ;;  %v2704_v63 = vor.u32 %v2703_v47, %v2699_v59  ;;  %v6124_v62 = vld [vmem:[%s6966_s10 + $0x8] ss:$0 sps:$4 sm:$0x11]   ;;  %v2600_v12 = vrot.slane %v2598_v49, 1  ;;  %v2589_v45 = vsel %vm633_vm1, %v2584_v15, %v2588_v37 }
 0x29f   : > { %2435 = vst.msk [vmem:[#allocation3 + $0x8] sm:$0xff] %vm8164_vm2, %v6160_v35  ;;  %v2902_v59 = vrot.slane %v6123_v34, 1  ;;  %v2903_v47 = vrot.slane %v6124_v62, 1  ;;  %v6132_v23 = vld [vmem:[%s6966_s10 + $0x20] ss:$0 sps:$4 sm:$0x11]   ;;  %v2613_v42 = vsel %vm633_vm1, %v2608_v38, %v2612_v6 }
 0x2a0   : > { %2738 = vrot.lane.b32.xlu1 %v2685_v0, %s6252_s23  ;;  %2952 = vrot.lane.b32.xlu0 %v2925_v5, %s6251_s22  ;;  %v2709_v56 = vsel %vm633_vm1, %v2704_v63, %v2708_v51  ;;  %v6131_v0 = vld [vmem:[%s6966_s10 + $0x18] sm:$0xfe]   ;;  %v2619_v40 = vrot.slane %v2617_v20, 1  ;;  %v2622_v5 = vshll.u32 %v6134_v41, 16  ;;  %v2601_v55 = vsel %vm633_vm1, %v2596_v60, %v2600_v12  ;;  %2438 = vst.msk [vmem:[#allocation3 + $0x20] sm:$0xff] %vm8164_vm2, %v6164_v11  ;;  %v6145_v49 = vld [vmem:[%s6966_s10 + $0x48] sm:$0xff]  }
 0x2a1   : > { %v2904_v63 = vsel %vm1013_vm0, %v2902_v59, %v2903_v47  ;;  %v6136_v51 = vld [vmem:[%s6966_s10 + $0x38] ss:$0 sps:$4 sm:$0x11]   ;;  %v6138_v30 = vld [vmem:[%s6966_s10 + $0x2c] ss:$0 sps:$4 sm:$0x11]  }
 0x2a2   : > { %v2620_v9 = vor.u32 %v2619_v40, %v2615_v43  ;;  %v2624_v57 = vrot.slane %v2622_v5, 1  ;;  %v2908_v26 = vrot.slane %v6131_v0, 1  ;;  %v6142_v28 = vld [vmem:[%s6966_s10 + $0x44] ss:$0 sps:$4 sm:$0x11]   ;;  %v2641_v48 = vshll.u32 %v6141_v33, 16 }
 0x2a3   : > { %v2627_v24 = vshrl.u32 %v6135_v44, 16  ;;  %v2631_v46 = vrot.slane %v2629_v21, 1  ;;  %v2634_v27 = vshll.u32 %v6136_v51, 16  ;;  %v2912_v61 = vrot.slane %v6138_v30, 1  ;;  %v6139_v18 = vld [vmem:[%s6966_s10 + $0x30] sm:$0xfe]  }
 0x2a4   : > { %2954 = vrot.lane.b32.xlu1 %v2928_v3, %s6251_s22  ;;  %2740 = vrot.lane.b32.xlu0 %v2697_v10, %s6252_s23  ;;  %v6137_v3 = vld [vmem:[%s6966_s10 + $0x24] sm:$0xfe]   ;;  %v2907_v10 = vsel %vm1013_vm0, %v2905_v54, %v2906_v31  ;;  %v2625_v19 = vsel %vm633_vm1, %v2620_v9, %v2624_v57  ;;  %v6140_v35 = vld [vmem:[%s6966_s10 + $0x38] ss:$0 sps:$4 sm:$0x11]   ;;  %v2646_v15 = vshll.u32 %v6142_v28, 16 }
 0x2a5   : > { %v2911_v25 = vrot.slane %v6137_v3, 1  ;;  %v2653_v37 = vshll.u32 %v6145_v49, 16  ;;  %v6165_v34 = vld [vmem:[%s6966_s10 + $0x3c] sm:$0xff]   ;;  %v2632_v12 = vor.u32 %v2631_v46, %v2627_v24  ;;  %v2636_v52 = vrot.slane %v2634_v27, 1  ;;  %v6149_v41 = vld [vmem:[%s6966_s10 + $0x84] sm:$0xff]   ;;  %v1949_v46 = vpop.permute.xlu0 %1948 }
 0x2a6   : > { %v6146_v50 = vld [vmem:[%s6966_s10 + $0x50] ss:$0 sps:$4 sm:$0x11]   ;;  %2439 = vst.msk [vmem:[#allocation3 + $0x28] sm:$0xff] %vm8164_vm2, %v6165_v34  ;;  %v2915_v60 = vrot.slane %v6140_v35, 1  ;;  %v2648_v22 = vrot.slane %v2646_v15, 1 }
 0x2a7   : > { %v2913_v20 = vsel %vm1013_vm0, %v2911_v25, %v2912_v61  ;;  %v6143_v39 = vld [vmem:[%s6966_s10 + $0x3c] sm:$0xfe]   ;;  %v2651_v59 = vshrl.u32 %v6145_v49, 16  ;;  %v2655_v47 = vrot.slane %v2653_v37, 1  ;;  %v2637_v44 = vsel %vm633_vm1, %v2632_v12, %v2636_v52  ;;  %v6147_v40 = vld [vmem:[%s6966_s10 + $0x48] sm:$0xfe]  }
 0x2a8   : > { %2742 = vrot.lane.b32.xlu1 %v2709_v56, %s6252_s23  ;;  %2956 = vrot.lane.b32.xlu0 %v2931_v32, %s6251_s22  ;;  %v2909_v56 = vrot.slane %v6132_v23, 1  ;;  %v2643_v32 = vrot.slane %v2641_v48, 1  ;;  %v2658_v0 = vshll.u32 %v6146_v50, 16  ;;  %v6150_v43 = vld [vmem:[%s6966_s10 + $0x8c] ss:$0 sps:$4 sm:$0x11]  }
 0x2a9   : > { %v2713_v6 = vshll.u32 %v6149_v41, 16  ;;  %v2656_v54 = vor.u32 %v2655_v47, %v2651_v59  ;;  %v6148_v31 = vld [vmem:[%s6966_s10 + $0x50] ss:$0 sps:$4 sm:$0x11]   ;;  %v6166_v33 = vld [vmem:[%s6966_s10 + $0x48] sm:$0xff]   ;;  %v2711_v11 = vshrl.u32 %v6149_v41, 16  ;;  %v1982_v27 = vpop.permute.xlu0 %1981 }
 0x2aa   : > { %v2910_v62 = vsel %vm1013_vm0, %v2908_v26, %v2909_v56  ;;  %v2644_v16 = vor.u32 %v2643_v32, %v2639_v29  ;;  %v2660_v58 = vrot.slane %v2658_v0, 1  ;;  %v2718_v51 = vshll.u32 %v6150_v43, 16  ;;  %2440 = vst.msk [vmem:[#allocation3 + $0x30] sm:$0xff] %vm8164_vm2, %v6166_v33  ;;  %v6151_v57 = vld [vmem:[%s6966_s10 + $0x84] sm:$0xfe]  }
 0x2ab   : > { %v2920_v21 = vrot.slane %v6147_v40, 1  ;;  %v2921_v9 = vrot.slane %v6148_v31, 1  ;;  %v6152_v30 = vld [vmem:[%s6966_s10 + $0x8c] ss:$0 sps:$4 sm:$0x11]   ;;  %v2935_v48 = vrot.slane %v6151_v57, 1 }
 0x2ac   : > { %2958 = vrot.lane.b32.xlu1 %v2934_v4, %s6251_s22  ;;  %2722 = vrot.lane.b32.xlu0 %v2589_v45, %s6252_s23  ;;  %v2914_v4 = vrot.slane %v6139_v18, 1  ;;  %v6144_v45 = vld [vmem:[%s6966_s10 + $0x44] ss:$0 sps:$4 sm:$0x11]   ;;  %v2649_v5 = vsel %vm633_vm1, %v2644_v16, %v2648_v22  ;;  %v2720_v26 = vrot.slane %v2718_v51, 1  ;;  %v2936_v49 = vrot.slane %v6152_v30, 1  ;;  %v2134_v18 = vpop.permute.xlu1 %2133 }
 0x2ad   : > { %v2918_v38 = vrot.slane %v6144_v45, 1  ;;  %v2922_v28 = vsel %vm1013_vm0, %v2920_v21, %v2921_v9  ;;  %v6168_v25 = vld [vmem:[%s6966_s10 + $0x84] sm:$0xff]   ;;  %vm8169_vm7 = vcmask 191616   ;;  %vm1956_vm8 = vcmask 222400  }
 0x2ae   : > { %v2916_v23 = vsel %vm1013_vm0, %v2914_v4, %v2915_v60  ;;  %v2937_v24 = vsel %vm1013_vm0, %v2935_v48, %v2936_v49  ;;  %2445 = vst.msk [vmem:[#allocation3 + $0x58] sm:$0xff] %vm8164_vm2, %v6168_v25  ;;  %vm1954_vm9 = vcmask 224448   ;;  %vm1989_vm15 = vcmask 255200   ;;  %v6156_v22 = vld [vmem:[%s8144_s1] sm:$0xff]  }
 0x2af   : > { %vm2038_vm11 = vcmask 320768   ;;  %vm8176_vm13 = vcmask 322816   ;;  %vm2071_vm2 = vcmask 353600  }
 0x2b0   : > { %2724 = vrot.lane.b32.xlu1 %v2601_v55, %s6252_s23  ;;  %2938 = vrot.lane.b32.xlu0 %v2904_v63, %s6251_s22  ;;  %v2917_v55 = vrot.slane %v6143_v39, 1  ;;  %v2715_v63 = vrot.slane %v2713_v6, 1 }
 0x2b2   : > { %v2919_v3 = vsel %vm1013_vm0, %v2917_v55, %v2918_v38  ;;  %vm1987_vm0 = vcmask 257248  }
 0x2b4   : > { %2940 = vrot.lane.b32.xlu1 %v2907_v10, %s6251_s22  ;;  %2726 = vrot.lane.b32.xlu0 %v2613_v42, %s6252_s23  ;;  %v2661_v42 = vsel %vm633_vm1, %v2656_v54, %v2660_v58  ;;  %v2716_v10 = vor.u32 %v2715_v63, %v2711_v11 }
 0x2b6   : > { %v2721_v56 = vsel %vm633_vm1, %v2716_v10, %v2720_v26  ;;  %vm1923_vm1 = vcmask 189568  }
 0x2b8   : > { %2728 = vrot.lane.b32.xlu1 %v2625_v19, %s6252_s23  ;;  %2942 = vrot.lane.b32.xlu0 %v2910_v62, %s6251_s22  ;;  %v2064_v19 = vpop.permute.xlu0 %2063 }
 0x2bc   : > { %2944 = vrot.lane.b32.xlu1 %v2913_v20, %s6251_s22  ;;  %2730 = vrot.lane.b32.xlu0 %v2637_v44, %s6252_s23  ;;  %v2132_v61 = vpop.permute.xlu0 %2131  ;;  %v6163_v44 = vld [vmem:[%s8149_s6 + $0x18] sm:$0x3f]  }
 0x2c0   : > { %2732 = vrot.lane.b32.xlu1 %v2649_v5, %s6252_s23  ;;  %2946 = vrot.lane.b32.xlu0 %v2916_v23, %s6251_s22  ;;  %v6167_v5 = vld [vmem:[%s8149_s6 + $0x28] sm:$0x3f]  }
 0x2c4   : > { %2948 = vrot.lane.b32.xlu1 %v2919_v3, %s6251_s22  ;;  %2734 = vrot.lane.b32.xlu0 %v2661_v42, %s6252_s23 }
 0x2c8   : > { %2950 = vrot.lane.b32.xlu1 %v2922_v28, %s6251_s22  ;;  %2744 = vrot.lane.b32.xlu0 %v2721_v56, %s6252_s23 }
 0x2cc   : > { %2960 = vrot.lane.b32.xlu1 %v2937_v24, %s6251_s22 }
 0x2fa   : > { %v2031_v35 = vpop.permute.xlu0 %2030 }
 0x2fe   : > { %v2033_v29 = vpop.permute.xlu1 %2032  ;;  %v2202_v32 = vpop.permute.xlu0 %2201 }
 0x302   : > { %v1918_v15 = vpop.permute.xlu1 %1917  ;;  %v1916_v37 = vpop.permute.xlu0 %1915 }
 0x303   : > { %1924 = vst.msk [vmem:[#allocation5 + $0x4] sm:$0x3] %vm1923_vm1, %v1918_v15  ;;  %vm8173_vm1 = vcmask 454016  }
 0x304   : > { %1922 = vst.msk [vmem:[#allocation5] sm:$0xf] %vm8169_vm7, %v1916_v37  ;;  %vm2239_vm7 = vcmask 486848  }
 0x305   : > { %1957 = vst.msk [vmem:[#allocation5 + $0x4] sm:$0x3] %vm1956_vm8, %v7070_v13  ;;  %vm2241_vm8 = vcmask 484800  }
 0x306   : > { %1955 = vst.msk [vmem:[#allocation5] sm:$0xf] %vm1954_vm9, %v1949_v46  ;;  %v2204_v34 = vpop.permute.xlu1 %2203  ;;  %v2234_v62 = vpop.permute.xlu0 %2233 }
 0x307   : > { %1990 = vst.msk [vmem:[#allocation5 + $0x4] sm:$0x3] %vm1989_vm15, %v7084_v14  ;;  %vm8175_vm15 = vcmask 519648  }
 0x308   : > { %1988 = vst.msk [vmem:[#allocation5] sm:$0xf] %vm1987_vm0, %v1982_v27 }
 0x309   : > { %2039 = vst.msk [vmem:[#allocation5 + $0x4] sm:$0x3] %vm2038_vm11, %v2033_v29  ;;  %vm2273_vm11 = vcmask 517600  }
 0x30a   : > { %2037 = vst.msk [vmem:[#allocation5] sm:$0xf] %vm8176_vm13, %v2031_v35  ;;  %v2236_v13 = vpop.permute.xlu1 %2235  ;;  %v2266_v14 = vpop.permute.xlu0 %2265  ;;  %vm3817_vm13 = vcmask 385344  }
 0x30b   : > { %2072 = vst.msk [vmem:[#allocation5 + $0x4] sm:$0x3] %vm2071_vm2, %v7096_v17  ;;  %vm8212_vm2 = vcmask 64544  }
 0x30c   : > { %2070 = vst.msk [vmem:[#allocation5] sm:$0xf] %vm2069_vm6, %v2064_v19  ;;  %vm8216_vm6 = vmmov %vm8212_vm2 }
 0x30d   : > { %2140 = vst.msk [vmem:[#allocation5 + $0x4] sm:$0x3] %vm2139_vm3, %v2134_v18  ;;  %vm8213_vm3 = vmmov %vm8212_vm2 }
 0x30e   : > { %2138 = vst.msk [vmem:[#allocation5] sm:$0xf] %vm2137_vm5, %v2132_v61  ;;  %v2268_v12 = vpop.permute.xlu1 %2267  ;;  %v2737_v52 = vpop.permute.xlu0 %2736  ;;  %vm8218_vm9 = vmmov %vm8212_vm2 }
 0x30f   : > { %2210 = vst.msk [vmem:[#allocation5 + $0x4] sm:$0x3] %vm2209_vm4, %v2204_v34  ;;  %vm8214_vm4 = vcmask 97344  }
 0x310   : > { %2208 = vst.msk [vmem:[#allocation5] sm:$0xf] %vm8173_vm1, %v2202_v32  ;;  %vm8215_vm5 = vmmov %vm8214_vm4  ;;  %vm3655_vm1 = vcmask 158848  }
 0x311   : > { %2240 = vst.msk [vmem:[#allocation5] sm:$0xf] %vm2239_vm7, %v2234_v62  ;;  %vm8217_vm7 = vcmask 1045504  }
 0x312   : > { %2242 = vst.msk [vmem:[#allocation5 + $0x4] sm:$0x3] %vm2241_vm8, %v2236_v13  ;;  %v2739_v17 = vpop.permute.xlu1 %2738  ;;  %v2953_v50 = vpop.permute.xlu0 %2952  ;;  %vm8219_vm8 = vmmov %vm8217_vm7 }
 0x313   : > { %2272 = vst.msk [vmem:[#allocation5] sm:$0xf] %vm8175_vm15, %v2266_v14  ;;  %vm3783_vm15 = vcmask 319744  }
 0x314   : > { %2274 = vst.msk [vmem:[#allocation5 + $0x4] sm:$0x3] %vm2273_vm11, %v2268_v12  ;;  %vm8220_vm11 = vmmov %vm8214_vm4 }
 0x315   : > { %2765 = vst.msk [vmem:[#allocation3 + $0x38] sm:$0xff] %vm8212_vm2, %v2737_v52  ;;  %vm8221_vm2 = vcmask 97280  }
 0x316   : > { %2766 = vst.msk [vmem:[#allocation3 + $0x40] sm:$0xff] %vm8213_vm3, %v2739_v17  ;;  %v2955_v4 = vpop.permute.xlu1 %2954  ;;  %v2741_v39 = vpop.permute.xlu0 %2740  ;;  %vm8222_vm3 = vmmov %vm8221_vm2 }
 0x317   : > { %2981 = vst.msk [vmem:[#allocation3 + $0x38] sm:$0xff] %vm8214_vm4, %v2953_v50 }
 0x318   : > { %2982 = vst.msk [vmem:[#allocation3 + $0x40] sm:$0xff] %vm8215_vm5, %v2955_v4  ;;  %vm8223_vm5 = vmmov %vm8217_vm7 }
 0x319   : > { %2767 = vst.msk [vmem:[#allocation3 + $0x48] sm:$0xff] %vm8216_vm6, %v2741_v39 }
 0x31a   : > { %v2277_v41 = vld [vmem:[#allocation5] sm:$0xf]  ;;  %v2743_v45 = vpop.permute.xlu1 %2742  ;;  %v2957_v59 = vpop.permute.xlu0 %2956 }
 0x31b   : > { %v2278_v20 = vld [vmem:[#allocation5 + $0x4] sm:$0x3]  ;;  %2768 = vst.msk [vmem:[#allocation3 + $0x50] sm:$0xff] %vm8218_vm9, %v2743_v45  ;;  %vm8225_vm9 = vmmov %vm8223_vm5 }
 0x31c   : > { %v5312_v60 = vcombine.low %v2277_v41, %v2278_v20  ;;  %2983 = vst.msk [vmem:[#allocation3 + $0x48] sm:$0xff] %vm8220_vm11, %v2957_v59  ;;  %vm8227_vm11 = vmmov %vm8221_vm2 }
 0x31e   : > { %v2293_v16 = vsel %vm8217_vm7, %v5312_v60, 0  ;;  %v7294_v47 = vld [vmem:[#allocation3 + $0x38] sm:$0xff]  ;;  %v2959_v0 = vpop.permute.xlu1 %2958  ;;  %v2723_v43 = vpop.permute.xlu0 %2722  ;;  %vm8224_vm7 = vmmov %vm8216_vm6 }
 0x31f   : > { %5734 = vmatpush3.bf16.msra.mxu1 %v2293_v16  ;;  %2984 = vst.msk [vmem:[#allocation3 + $0x50] sm:$0xff] %vm8214_vm4, %v2959_v0 }
 0x320   : > { %5967 = vmatprep.subr.msk.bf16.mxu1 %vm8219_vm8, %v7169_v8  ;;  %2758 = vst.msk [vmem:[#allocation3] sm:$0xff] %vm8216_vm6, %v2723_v43  ;;  %v7307_v8 = vld [vmem:[#allocation3 + $0x40] sm:$0xff]  ;;  %vm8226_vm8 = vmmov %vm8214_vm4 }
 0x322   : > { %5736 = vmatmul.mubr.msk.bf16.vlgmr.msra.gmra.mrb[0].mxu1 %vm8221_vm2, %v6156_v22  ;;  %v2725_v6 = vpop.permute.xlu1 %2724  ;;  %v2939_v23 = vpop.permute.xlu0 %2938 }
 0x323   : > { %5848 = vmatpush3.bf16.msra.mxu1 %v7179_v7  ;;  %5753 = vmatprep.mubr.msk.bf16.mxu1 %vm8222_vm3, %v7294_v47  ;;  %2759 = vst.msk [vmem:[#allocation3 + $0x8] sm:$0xff] %vm8224_vm7, %v2725_v6  ;;  %v7310_v40 = vld [vmem:[#allocation3 + $0x48] sm:$0xff]  ;;  %v3200_v7 = vsel %vm8225_vm9, %v6163_v44, 0  ;;  %vm8228_vm3 = vmmov %vm8214_vm4 }
 0x324   : > { %5968 = vmatprep.subr.msk.bf16.mxu1 %vm8223_vm5, %v6163_v44  ;;  %2974 = vst.msk [vmem:[#allocation3] sm:$0xff] %vm8226_vm8, %v2939_v23  ;;  %vm8229_vm4 = vmmov %vm8223_vm5 }
 0x325   : > { %vm8230_vm5 = vmmov %vm8216_vm6 }
 0x326   : > { %v2941_v55 = vpop.permute.xlu1 %2940  ;;  %v2727_v38 = vpop.permute.xlu0 %2726  ;;  %v3009_v54 = vld [vmem:[#allocation3 + $0x50] sm:$0xff]  ;;  %vm8231_vm6 = vmmov %vm8230_vm5 }
 0x327   : > { %2975 = vst.msk [vmem:[#allocation3 + $0x8] sm:$0xff] %vm8228_vm3, %v2941_v55  ;;  %vm8232_vm7 = vmmov %vm8228_vm3 }
 0x328   : > { %2760 = vst.msk [vmem:[#allocation3 + $0x10] sm:$0xff] %vm8230_vm5, %v2727_v38  ;;  %vm8233_vm9 = vmmov %vm8221_vm2 }
 0x329   : > { %vm8234_vm8 = vmmov %vm8221_vm2 }
 0x32a   : > { %5754 = vmatmul.mubr.msk.bf16.vlgmr.msra.gmra.mrb[4].mxu1 %vm8227_vm11, %v7307_v8  ;;  %v2729_v31 = vpop.permute.xlu1 %2728  ;;  %v2943_v33 = vpop.permute.xlu0 %2942  ;;  %vm8235_vm11 = vmmov %vm8228_vm3 }
 0x32b   : > { %5757 = vmatprep.mubr.msk.bf16.mxu1 %vm8221_vm2, %v7310_v40  ;;  %5762 = vmatpush3.bf16.msra.mxu1 %v3200_v7  ;;  %2761 = vst.msk [vmem:[#allocation3 + $0x18] sm:$0xff] %vm8231_vm6, %v2729_v31  ;;  %v2986_v58 = vld [vmem:[#allocation3] sm:$0xff]  ;;  %vm8236_vm3 = vmmov %vm8230_vm5  ;;  %vm8238_vm5 = vcmask 1045504  }
 0x32c   : > { %5969 = vmatprep.subr.msk.bf16.mxu1 %vm8229_vm4, %v6167_v5  ;;  %2976 = vst.msk [vmem:[#allocation3 + $0x10] sm:$0xff] %vm8232_vm7, %v2943_v33  ;;  %vm8237_vm4 = vmmov %vm8236_vm3  ;;  %v3365_v57 = vsel %vm8238_vm5, %v6167_v5, 0 }
 0x32d   : > { %vm8239_vm6 = vmmov %vm8232_vm7 }
 0x32e   : > { %v2945_v11 = vpop.permute.xlu1 %2944  ;;  %v3000_v63 = vld [vmem:[#allocation3 + $0x8] sm:$0xff]  ;;  %v2731_v51 = vpop.permute.xlu0 %2730  ;;  %vm8240_vm7 = vmmov %vm8221_vm2 }
 0x32f   : > { %2977 = vst.msk [vmem:[#allocation3 + $0x18] sm:$0xff] %vm8235_vm11, %v2945_v11  ;;  %5741 = vmatprep.mubr.msk.bf16.mxu0 %vm8221_vm2, %v3000_v63  ;;  %vm8243_vm11 = vmmov %vm8239_vm6 }
 0x330   : > { %2762 = vst.msk [vmem:[#allocation3 + $0x20] sm:$0xff] %vm8236_vm3, %v2731_v51  ;;  %vm8245_vm5 = vmmov %vm8221_vm2 }
 0x332   : > { %5758 = vmatmul.mubr.msk.bf16.gmra.mrb[8].mxu1 %vm8233_vm9, %v3009_v54  ;;  %v2733_v21 = vpop.permute.xlu1 %2732  ;;  %v2947_v3 = vpop.permute.xlu0 %2946  ;;  %vm8241_vm9 = vmmov %vm8221_vm2 }
 0x333   : > { %5763 = vmatprep.mubr.msk.bf16.mxu1 %vm8234_vm8, %v2986_v58  ;;  %2763 = vst.msk [vmem:[#allocation3 + $0x28] sm:$0xff] %vm8237_vm4, %v2733_v21  ;;  %v3001_v9 = vld [vmem:[#allocation3 + $0x10] sm:$0xff]  ;;  %vm8242_vm8 = vmmov %vm8221_vm2 }
 0x334   : > { %2978 = vst.msk [vmem:[#allocation3 + $0x20] sm:$0xff] %vm8239_vm6, %v2947_v3  ;;  %5742 = vmatmul.mubr.msk.bf16.vlgmr.msra.gmra.mrb[24].mxu0 %vm8240_vm7, %v3001_v9  ;;  %vm8244_vm4 = vmmov %vm8239_vm6 }
 0x335   : > { %vm8246_vm6 = vmmov %vm8236_vm3 }
 0x336   : > { %v2949_v30 = vpop.permute.xlu1 %2948  ;;  %v3002_v42 = vld [vmem:[#allocation3 + $0x18] sm:$0xff]  ;;  %v2735_v10 = vpop.permute.xlu0 %2734  ;;  %vm8247_vm7 = vmmov %vm8221_vm2 }
 0x337   : > { %2979 = vst.msk [vmem:[#allocation3 + $0x28] sm:$0xff] %vm8243_vm11, %v2949_v30  ;;  %5745 = vmatprep.mubr.msk.bf16.mxu0 %vm8221_vm2, %v3002_v42  ;;  %vm8250_vm11 = vmmov %vm8244_vm4 }
 0x338   : > { %2764 = vst.msk [vmem:[#allocation3 + $0x30] sm:$0xff] %vm8236_vm3, %v2735_v10  ;;  %vm8251_vm3 = vmmov %vm8221_vm2 }
 0x33a   : > { %5764 = vmatmul.mubr.msk.bf16.vlgmr.msra.gmra.mrb[12].mxu1 %vm8241_vm9, %v3000_v63  ;;  %v2951_v26 = vpop.permute.xlu1 %2950  ;;  %v2745_v48 = vpop.permute.xlu0 %2744  ;;  %vm8248_vm9 = vmmov %vm8221_vm2 }
 0x33b   : > { %5767 = vmatprep.mubr.msk.bf16.mxu1 %vm8242_vm8, %v3001_v9  ;;  %5784 = vmatpush3.bf16.msra.mxu1 %v3365_v57  ;;  %2980 = vst.msk [vmem:[#allocation3 + $0x30] sm:$0xff] %vm8244_vm4, %v2951_v26  ;;  %v3003_v28 = vld [vmem:[#allocation3 + $0x20] sm:$0xff]  ;;  %vm8249_vm8 = vmmov %vm8221_vm2 }
 0x33c   : > { %5805 = vmatprep.subr.bf16.mxu1 %v8171_v2  ;;  %5746 = vmatmul.mubr.msk.bf16.gmra.mrb[28].mxu0 %vm8245_vm5, %v3003_v28  ;;  %2769 = vst.msk [vmem:[#allocation3 + $0x58] sm:$0xff] %vm8246_vm6, %v2745_v48  ;;  %vm8252_vm4 = vmmov %vm8221_vm2 }
 0x33d   : > { %vm8253_vm5 = vmmov %vm8221_vm2 }
 0x33e   : > { %v3004_v49 = vld [vmem:[#allocation3 + $0x28] sm:$0xff]  ;;  %v2961_v56 = vpop.permute.xlu1 %2960  ;;  %vm8254_vm6 = vmmov %vm8221_vm2 }
 0x33f   : > { %5749 = vmatprep.mubr.msk.bf16.mxu0 %vm8249_vm8, %v3004_v49  ;;  %2985 = vst.msk [vmem:[#allocation3 + $0x58] sm:$0xff] %vm8250_vm11, %v2961_v56  ;;  %vm8257_vm8 = vmmov %vm8221_vm2 }
 0x340   : > { %vm8258_vm11 = vmmov %vm8221_vm2 }
 0x342   : > { %5768 = vmatmul.mubr.msk.bf16.gmra.mrb[16].mxu1 %vm8247_vm7, %v3002_v42  ;;  %v3005_v24 = vld [vmem:[#allocation3 + $0x30] sm:$0xff]  ;;  %vm8255_vm7 = vmmov %vm8221_vm2 }
 0x343   : > { %5771 = vmatprep.mubr.msk.bf16.mxu1 %vm8248_vm9, %v3003_v28  ;;  %vm8256_vm9 = vmmov %vm8221_vm2 }
 0x344   : > { %5750 = vmatmul.mubr.msk.bf16.gmra.mrb[32].mxu0 %vm8221_vm2, %v3005_v24 }
 0x346   : > { %v3325_v46 = vld [vmem:[#allocation3 + $0x58] sm:$0xff] }
 0x34a   : > { %5772 = vmatmul.mubr.msk.bf16.gmra.mrb[20].mxu1 %vm8251_vm3, %v3004_v49  ;;  %vm8259_vm3 = vmmov %vm8221_vm2 }
 0x34b   : > { %5775 = vmatprep.mubr.msk.bf16.mxu1 %vm8252_vm4, %v3005_v24  ;;  %vm8260_vm4 = vmmov %vm8221_vm2 }
 0x352   : > { %5776 = vmatmul.mubr.msk.bf16.gmra.mrb[4].mxu1 %vm8253_vm5, %v7294_v47  ;;  %vm8261_vm5 = vmmov %vm8221_vm2 }
 0x353   : > { %5779 = vmatprep.mubr.msk.bf16.mxu1 %vm8254_vm6, %v7307_v8  ;;  %vm8262_vm6 = vmmov %vm8221_vm2 }
 0x35a   : > { %5780 = vmatmul.mubr.msk.bf16.gmra.mrb[8].mxu1 %vm8255_vm7, %v7310_v40  ;;  %vm8263_vm7 = vmmov %vm8221_vm2 }
 0x35b   : > { %5785 = vmatprep.mubr.msk.bf16.mxu1 %vm8256_vm9, %v3001_v9  ;;  %vm8264_vm9 = vmmov %vm8221_vm2 }
 0x362   : > { %5786 = vmatmul.mubr.msk.bf16.vlgmr.msra.gmra.mrb[12].mxu1 %vm8257_vm8, %v3002_v42  ;;  %vm8265_vm8 = vmmov 0  }
 0x363   : > { %5789 = vmatprep.mubr.msk.bf16.mxu1 %vm8258_vm11, %v3003_v28  ;;  %vm8266_vm11 = vcmask 1041409  }
 0x36a   : > { %5790 = vmatmul.mubr.msk.bf16.gmra.mrb[16].mxu1 %vm8221_vm2, %v3004_v49  ;;  %vm8267_vm2 = vmmov %vm8266_vm11 }
 0x36b   : > { %5793 = vmatprep.mubr.msk.bf16.mxu1 %vm8259_vm3, %v3005_v24  ;;  %vm8268_vm3 = vmmov %vm8267_vm2 }
 0x372   : > { %5794 = vmatmul.mubr.msk.bf16.gmra.mrb[20].mxu1 %vm8260_vm4, %v7294_v47  ;;  %vm8269_vm4 = vmmov %vm8267_vm2 }
 0x373   : > { %5797 = vmatprep.mubr.msk.bf16.mxu1 %vm8261_vm5, %v7307_v8  ;;  %vm8270_vm5 = vmmov %vm8267_vm2 }
 0x37a   : > { %5798 = vmatmul.mubr.msk.bf16.gmra.mrb[4].mxu1 %vm8262_vm6, %v7310_v40  ;;  %vm8271_vm6 = vcmask 1044484  }
 0x37b   : > { %5801 = vmatprep.mubr.msk.bf16.mxu1 %vm8263_vm7, %v3009_v54  ;;  %vm8272_vm7 = vcmask 1042434  }
 0x382   : > { %5802 = vmatmul.mubr.msk.bf16.gmra.mrb[8].mxu1 %vm8264_vm9, %v3325_v46  ;;  %vm8273_vm9 = vmmov %vm8267_vm2 }
 0x383   : > { %5807 = vmatprep.mubr.msk.bf16.mxu1 %vm8265_vm8, %v8171_v2 }
 0x407   : > { %v5743_v27 = vpop.f32.mrb[24].mxu0 }
 0x408   : > { %v3085_v25 = vpop.f32.mrb[25].mxu0 }
 0x409   : > { %v5744_v19 = vpop.f32.mrb[26].mxu0 }
 0x40a   : > { %v3088_v61 = vpop.f32.mrb[27].mxu0 }
 0x40f   : > { %v5747_v18 = vpop.f32.mrb[28].mxu0 }
 0x410   : > { %v3101_v35 = vpop.f32.mrb[29].mxu0 }
 0x411   : > { %v5748_v29 = vpop.f32.mrb[30].mxu0 }
 0x412   : > { %v3104_v32 = vpop.f32.mrb[31].mxu0 }
 0x417   : > { %v7372_v15 = vpop.f32.mrb[32].mxu0 }
 0x418   : > { %v7374_v37 = vpop.f32.mrb[33].mxu0 }
 0x419   : > { %v7376_v34 = vpop.f32.mrb[34].mxu0 }
 0x41a   : > { %v7378_v62 = vpop.f32.mrb[35].mxu0 }
 0x435   : > { %v5787_v13 = vpop.f32.mrb[12].mxu1 }
 0x436   : > { %v5851_v14 = vadd.f32 %v5787_v13, %v5743_v27  ;;  %v3401_v12 = vpop.f32.mrb[13].mxu1 }
 0x437   : > { %v5852_v52 = vadd.f32 %v3401_v12, %v3085_v25  ;;  %v5788_v17 = vpop.f32.mrb[14].mxu1 }
 0x438   : > { %v5542_v50 = vpack.c.bf16 %v5851_v14, %v5851_v14  ;;  %v5853_v41 = vadd.f32 %v5788_v17, %v5744_v19  ;;  %v3404_v20 = vpop.f32.mrb[15].mxu1 }
 0x439   : > { %v5541_v4 = vpack.c.bf16 %v5852_v52, %v5852_v52  ;;  %v5854_v60 = vadd.f32 %v3404_v20, %v3088_v61 }
 0x43a   : > { %v3621_v39 = vunpack.c.l.b16 %v5542_v50  ;;  %v3501_v16 = vpack.c.bf16 %v5853_v41, %v5851_v14  ;;  %v5552_v22 = vpack.c.bf16 %v5853_v41, %v5853_v41 }
 0x43b   : > { %v3620_v45 = vunpack.c.l.b16 %v5541_v4  ;;  %v3500_v59 = vpack.c.bf16 %v5854_v60, %v5852_v52  ;;  %v5551_v47 = vpack.c.bf16 %v5854_v60, %v5854_v60 }
 0x43c   : > { %v3631_v44 = vrot.slane %v3621_v39, 1  ;;  %v3708_v0 = vrot.slane %v3621_v39, 3  ;;  %v3820_v43 = vrot.slane %v3621_v39, 6  ;;  %v3521_v8 = vunpack.c.l.b16 %v3501_v16 }
 0x43d   : > { %v3630_v6 = vrot.slane %v3620_v45, 2  ;;  %v3707_v23 = vrot.slane %v3620_v45, 4  ;;  %v3819_v40 = vrot.slane %v3620_v45, 7  ;;  %v3849_v7 = vunpack.c.h.b16 %v3501_v16  ;;  %v5791_v5 = vpop.f32.mrb[16].mxu1 }
 0x43e   : > { %v7380_v55 = vrot.slane %v3521_v8, 7  ;;  %v3913_v38 = vunpack.c.l.b16 %v5552_v22  ;;  %v7382_v54 = vunpack.c.l.b16 %v3500_v59  ;;  %v3848_v31 = vunpack.c.h.b16 %v3500_v59  ;;  %v3417_v33 = vpop.f32.mrb[17].mxu1 }
 0x43f   : > { %v3709_v58 = vsel %vm8266_vm11, %v3708_v0, %v3707_v23  ;;  %v3821_v11 = vsel %vm8267_vm2, %v3820_v43, %v3819_v40  ;;  %v3858_v63 = vrot.slane %v3849_v7, 7  ;;  %v3912_v51 = vunpack.c.l.b16 %v5551_v47  ;;  %v5792_v21 = vpop.f32.mrb[18].mxu1  ;;  %vm8275_vm2 = vmmov %vm8272_vm7 }
 0x440   : > { %v7389_v3 = vsel %vm8268_vm3, %v7380_v55, %v7382_v54  ;;  %v5855_v9 = vadd.f32 %v5791_v5, %v5747_v18  ;;  %v5856_v57 = vadd.f32 %v3417_v33, %v3101_v35  ;;  %v3632_v30 = vsel %vm8269_vm4, %v3631_v44, %v3630_v6  ;;  %v3420_v42 = vpop.f32.mrb[19].mxu1  ;;  %vm8277_vm4 = vmmov %vm8275_vm2 }
 0x441   : > { %v3859_v10 = vsel %vm8270_vm5, %v3858_v63, %v3848_v31  ;;  %v3922_v26 = vrot.slane %v3912_v51, 1  ;;  %v5857_v28 = vadd.f32 %v5792_v21, %v5748_v29  ;;  %v5858_v48 = vadd.f32 %v3420_v42, %v3104_v32  ;;  %v7441_v51 = vld [vmem:[%s7425_s19 + $0x10] sm:$0xf] }
 0x442   : > { %v5544_v49 = vpack.c.bf16 %v5855_v9, %v5855_v9  ;;  %v5543_v56 = vpack.c.bf16 %v5856_v57, %v5856_v57  ;;  %v7396_v24 = vsel %vm8271_vm6, %v7380_v55, %v7382_v54  ;;  %v7401_v46 = vsel %vm8272_vm7, %v7380_v55, %v7382_v54  ;;  %vm8278_vm6 = vmmov %vm8275_vm2 }
 0x443   : > { %v3923_v27 = vsel %vm8273_vm9, %v3913_v38, %v3922_v26  ;;  %v3503_v25 = vpack.c.bf16 %v5857_v28, %v5855_v9  ;;  %v5554_v19 = vpack.c.bf16 %v5857_v28, %v5857_v28  ;;  %v3502_v61 = vpack.c.bf16 %v5858_v48, %v5856_v57  ;;  %vm8280_vm9 = vmmov %vm8275_vm2 }
 0x444   : > { %v7404_v18 = vunpack.c.l.b16 %v5544_v49  ;;  %v3622_v35 = vunpack.c.l.b16 %v5543_v56  ;;  %vm8274_vm11 = vcmask 1047559   ;;  %v5553_v12 = vpack.c.bf16 %v5858_v48, %v5858_v48 }
 0x445   : > { %v7409_v29 = vsel %vm8274_vm11, %v7380_v55, %v7382_v54  ;;  %v3523_v32 = vunpack.c.l.b16 %v3503_v25  ;;  %v3851_v13 = vunpack.c.h.b16 %v3503_v25  ;;  %v3522_v14 = vunpack.c.l.b16 %v3502_v61  ;;  %v5795_v52 = vpop.f32.mrb[20].mxu1  ;;  %vm8281_vm11 = vmmov %vm8275_vm2 }
 0x446   : > { %v3634_v17 = vrot.slane %v7404_v18, 7  ;;  %v3633_v50 = vsel %vm8275_vm2, %v3622_v35, %v3632_v30  ;;  %v3915_v41 = vunpack.c.l.b16 %v5554_v19  ;;  %v3433_v20 = vpop.f32.mrb[21].mxu1  ;;  %v3712_v4 = vrot.slane %v7404_v18, 1 }
 0x447   : > { %v3710_v60 = vrot.slane %v3622_v35, 2  ;;  %v3822_v39 = vrot.slane %v3622_v35, 5  ;;  %v7415_v16 = vrot.slane %v3523_v32, 5  ;;  %v5796_v22 = vpop.f32.mrb[22].mxu1  ;;  %vm8276_vm3 = vcmask 1043459  }
 0x448   : > { %v7418_v45 = vsel %vm8276_vm3, %v3634_v17, %v3633_v50  ;;  %v3862_v59 = vrot.slane %v3851_v13, 5  ;;  %v7420_v47 = vrot.slane %v3522_v14, 6  ;;  %v3850_v44 = vunpack.c.h.b16 %v3502_v61  ;;  %v3436_v0 = vpop.f32.mrb[23].mxu1  ;;  %vm8279_vm7 = vmmov %vm8276_vm3 }
 0x449   : > { %v7428_v43 = vsel %vm8277_vm4, %v3822_v39, %v3821_v11  ;;  %v3914_v8 = vunpack.c.l.b16 %v5553_v12  ;;  %v5859_v6 = vadd.f32 %v5795_v52, %v7372_v15  ;;  %v5860_v23 = vadd.f32 %v3433_v20, %v7374_v37  ;;  %vm8282_vm2 = vmmov %vm8276_vm3 }
 0x44a   : > { %v7435_v40 = vsel %vm8270_vm5, %v7415_v16, %v7420_v47  ;;  %v3860_v7 = vrot.slane %v3850_v44, 6  ;;  %v3711_v5 = vsel %vm8278_vm6, %v3710_v60, %v3709_v58  ;;  %v5861_v38 = vadd.f32 %v5796_v22, %v7376_v34  ;;  %vm8284_vm4 = vmmov %vm8282_vm2 }
 0x44b   : > { %v3924_v31 = vrot.slane %v3914_v8, 7  ;;  %v5546_v33 = vpack.c.bf16 %v5859_v6, %v5859_v6  ;;  %v5545_v63 = vpack.c.bf16 %v5860_v23, %v5860_v23  ;;  %v3713_v11 = vsel %vm8279_vm7, %v3712_v4, %v3711_v5 }
 0x44c   : > { %v3861_v15 = vsel %vm8280_vm9, %v3860_v7, %v3859_v10  ;;  %v3505_v37 = vpack.c.bf16 %v5861_v38, %v5859_v6  ;;  %v5556_v21 = vpack.c.bf16 %v5861_v38, %v5861_v38  ;;  %v5862_v9 = vadd.f32 %v3436_v0, %v7378_v62 }
 0x44d   : > { %v3925_v57 = vsel %vm8281_vm11, %v3924_v31, %v3923_v27  ;;  %v7446_v30 = vunpack.c.l.b16 %v5546_v33  ;;  %v7448_v58 = vunpack.c.l.b16 %v5545_v63  ;;  %v3863_v34 = vsel %vm8282_vm2, %v3862_v59, %v3861_v15  ;;  %v5799_v42 = vpop.f32.mrb[4].mxu1  ;;  %vm8289_vm11 = vmmov %vm8282_vm2 }
 0x44e   : > { %v3824_v26 = vrot.slane %v7404_v18, 4  ;;  %v3504_v28 = vpack.c.bf16 %v5862_v9, %v5860_v23  ;;  %v3449_v48 = vpop.f32.mrb[5].mxu1  ;;  %v3926_v56 = vrot.slane %v3915_v41, 6  ;;  %v3525_v25 = vunpack.c.l.b16 %v3505_v37 }
 0x44f   : > { %v3853_v62 = vunpack.c.h.b16 %v3505_v37  ;;  %v7454_v19 = vunpack.c.l.b16 %v5556_v21  ;;  %v5800_v27 = vpop.f32.mrb[6].mxu1  ;;  %v3638_v61 = vrot.slane %v7446_v30, 5  ;;  %v3715_v35 = vrot.slane %v7446_v30, 7 }
 0x450   : > { %v3828_v32 = vrot.slane %v7446_v30, 2  ;;  %vm8283_vm3 = vcmask 1044484   ;;  %v3452_v14 = vpop.f32.mrb[7].mxu1  ;;  %v3636_v12 = vrot.slane %v7448_v58, 6  ;;  %v3524_v52 = vunpack.c.l.b16 %v3504_v28 }
 0x451   : > { %v7461_v13 = vsel %vm8283_vm3, %v7448_v58, %v3713_v11  ;;  %v3852_v17 = vunpack.c.h.b16 %v3504_v28  ;;  %v5555_v50 = vpack.c.bf16 %v5862_v9, %v5862_v9  ;;  %v3927_v41 = vsel %vm8284_vm4, %v3926_v56, %v3925_v57  ;;  %vm8285_vm5 = vmmov %vm8283_vm3 }
 0x452   : > { %v5548_v20 = vpack.c.bf16 %v5799_v42, %v5799_v42  ;;  %v5547_v4 = vpack.c.bf16 %v3449_v48, %v3449_v48  ;;  %v3507_v60 = vpack.c.bf16 %v5800_v27, %v5799_v42  ;;  %v3826_v39 = vrot.slane %v7448_v58, 3  ;;  %vm8286_vm6 = vmmov %vm8283_vm3 }
 0x453   : > { %v3864_v22 = vrot.slane %v3852_v17, 4  ;;  %v3916_v59 = vunpack.c.l.b16 %v5555_v50  ;;  %v5558_v44 = vpack.c.bf16 %v5800_v27, %v5800_v27  ;;  %v7466_v0 = vrot.slane %v3525_v25, 3  ;;  %vm8292_vm4 = vmmov %vm8285_vm5 }
 0x454   : > { %v7468_v8 = vrot.slane %v3853_v62, 3  ;;  %v7470_v6 = vunpack.c.l.b16 %v5548_v20  ;;  %v7472_v23 = vunpack.c.l.b16 %v5547_v4  ;;  %v3506_v31 = vpack.c.bf16 %v3452_v14, %v3449_v48 }
 0x455   : > { %v7476_v5 = vsel %vm8285_vm5, %v3864_v22, %v3863_v34  ;;  %v3928_v38 = vrot.slane %v3916_v59, 5  ;;  %v5803_v33 = vpop.f32.mrb[8].mxu1  ;;  %v7478_v63 = vrot.slane %v3524_v52, 4  ;;  %v3527_v11 = vunpack.c.l.b16 %v3507_v60 }
 0x456   : > { %v3855_v15 = vunpack.c.h.b16 %v3507_v60  ;;  %v7480_v37 = vunpack.c.l.b16 %v5558_v44  ;;  %v3465_v21 = vpop.f32.mrb[9].mxu1  ;;  %v3642_v57 = vrot.slane %v7470_v6, 3  ;;  %v3719_v42 = vrot.slane %v7470_v6, 5 }
 0x457   : > { %v7483_v9 = vsel %vm8286_vm6, %v3928_v38, %v3927_v41  ;;  %v3640_v34 = vrot.slane %v7472_v23, 4  ;;  %v5804_v28 = vpop.f32.mrb[10].mxu1  ;;  %v3717_v48 = vrot.slane %v7472_v23, 6  ;;  %v3526_v56 = vunpack.c.l.b16 %v3506_v31 }
 0x458   : > { %v3854_v25 = vunpack.c.h.b16 %v3506_v31  ;;  %v5557_v62 = vpack.c.bf16 %v3452_v14, %v3452_v14  ;;  %v3468_v27 = vpop.f32.mrb[11].mxu1  ;;  %v5550_v52 = vpack.c.bf16 %v5803_v33, %v5803_v33  ;;  %v5549_v17 = vpack.c.bf16 %v3465_v21, %v3465_v21 }
 0x459   : > { %v3509_v50 = vpack.c.bf16 %v5804_v28, %v5803_v33  ;;  %v5560_v20 = vpack.c.bf16 %v5804_v28, %v5804_v28  ;;  %v7490_v4 = vrot.slane %v3527_v11, 1  ;;  %v7492_v60 = vrot.slane %v3526_v56, 2 }
 0x45a   : > { %v3508_v22 = vpack.c.bf16 %v3468_v27, %v3465_v21  ;;  %v7494_v59 = vunpack.c.l.b16 %v5550_v52  ;;  %v7496_v44 = vunpack.c.l.b16 %v5549_v17  ;;  %v3870_v31 = vrot.slane %v3855_v15, 1 }
 0x45b   : > { %v3529_v38 = vunpack.c.l.b16 %v3509_v50  ;;  %v3857_v2 = vunpack.c.h.b16 %v3509_v50  ;;  %v3868_v14 = vrot.slane %v3854_v25, 2  ;;  %v7498_v10 = vunpack.c.l.b16 %v5557_v62 }
 0x45c   : > { %v7500_v49 = vunpack.c.l.b16 %v3508_v22  ;;  %v3645_v33 = vrot.slane %v7494_v59, 1  ;;  %v3722_v11 = vrot.slane %v7494_v59, 3  ;;  %v3921_v28 = vunpack.c.l.b16 %v5560_v20 }
 0x45d   : > { %v3856_v56 = vunpack.c.h.b16 %v3508_v22  ;;  %v3644_v52 = vrot.slane %v7496_v44, 2  ;;  %v7506_v17 = vrot.slane %v3529_v38, 7  ;;  %v3872_v41 = vrot.slane %v3857_v2, 7 }
 0x45e   : > { %v5559_v50 = vpack.c.bf16 %v3468_v27, %v3468_v27  ;;  %vm8287_vm7 = vcmask 1045509   ;;  %vm8288_vm9 = vcmask 1041409   ;;  %v3563_v62 = vsel %vm8289_vm11, %v7420_v47, %v7401_v46 }
 0x45f   : > { %v3660_v15 = vsel %vm8287_vm7, %v7420_v47, %v7396_v24  ;;  %v3663_v25 = vsel %vm8288_vm9, %v7492_v60, %v7466_v0  ;;  %vm8290_vm2 = vcmask 1046534   ;;  %vm8291_vm3 = vcmask 1042434   ;;  %vm8293_vm5 = vmmov %vm8288_vm9 }
 0x460   : > { %v3661_v20 = vsel %vm8290_vm2, %v7415_v16, %v3660_v15  ;;  %v3664_v22 = vsel %vm8291_vm3, %v7490_v4, %v3663_v25  ;;  %v3564_v2 = vsel %vm8292_vm4, %v7415_v16, %v3563_v62  ;;  %v3568_v24 = vsel %vm8293_vm5, %v7500_v49, %v7490_v4  ;;  %vm8295_vm7 = vmmov %vm8289_vm11 }
 0x461   : > { %v3920_v27 = vunpack.c.l.b16 %v5559_v50  ;;  %vm8294_vm6 = vcmask 1047559   ;;  %v3665_v46 = vsel %vm8295_vm7, %v7500_v49, %v3664_v22  ;;  %vm8296_vm9 = vcmask 1045509   ;;  %vm8297_vm11 = vmmov %vm8292_vm4 }
 0x462   : > { %v3662_v38 = vsel %vm8294_vm6, %v7478_v63, %v3661_v20  ;;  %v3565_v15 = vsel %vm8296_vm9, %v7478_v63, %v3564_v2  ;;  %v3666_v25 = vsel %vm8297_vm11, %v7506_v17, %v3665_v46  ;;  %v3569_v7 = vsel %vm8291_vm3, %v7506_v17, %v3568_v24  ;;  %vm8298_vm4 = vmmov %vm8291_vm3 }
 0x463   : > { %v3566_v62 = vsel %vm8290_vm2, %v7466_v0, %v3565_v15  ;;  %v3787_v50 = vsel %vm8298_vm4, %v7478_v63, %v7435_v40  ;;  %v3936_v20 = vrot.slane %v3920_v27, 1  ;;  %v7541_v21 = vpack.c.b16 %v3666_v25, %v3662_v38  ;;  %vm8299_vm5 = vmmov %vm8294_vm6 }
 0x464   : > { %v3567_v22 = vsel %vm8299_vm5, %v7492_v60, %v3566_v62  ;;  %vm8300_vm6 = vmmov %vm8295_vm7  ;;  %vm8305_vm3 = vcmask 1045509   ;;  %v3934_v18 = vrot.slane %v7480_v37, 2  ;;  %v8334_v30 = vrot.slane %v7472_v23, 1 }
 0x465   : > { %v3788_v2 = vsel %vm8300_vm6, %v7466_v0, %v3787_v50  ;;  %v7547_v46 = vpack.c.b16 %v3569_v7, %v3567_v22  ;;  %vm8301_vm7 = vmmov %vm8297_vm11  ;;  %vm8303_vm11 = vcmask 1041409   ;;  %3668 = vrot.lane.b32.xlu1 %v7541_v21, %s6252_s23  ;;  %v3721_v50 = vrot.slane %v7496_v44, 4 }
 0x466   : > { %v3789_v15 = vsel %vm8301_vm7, %v7492_v60, %v3788_v2  ;;  %vm8302_vm9 = vmmov %vm8290_vm2  ;;  %v3737_v40 = vsel %vm8303_vm11, %v7478_v63, %v7415_v16  ;;  %vm8309_vm7 = vcmask 1043459  }
 0x467   : > { %v3735_v24 = vsel %vm8302_vm9, %v7380_v55, %v7382_v54  ;;  %vm8304_vm2 = vmmov %vm8303_vm11  ;;  %v3790_v7 = vsel %vm8305_vm3, %v7490_v4, %v3789_v15  ;;  %3571 = vrot.lane.b32.xlu0 %v7547_v46, %s6252_s23 }
 0x468   : > { %v7558_v27 = vsel %vm8304_vm2, %v3921_v28, %v3936_v20  ;;  %vm8306_vm4 = vmmov %vm8299_vm5  ;;  %vm8307_vm5 = vcmask 1042434  }
 0x469   : > { %v3736_v38 = vsel %vm8306_vm4, %v7420_v47, %v3735_v24  ;;  %v3738_v25 = vsel %vm8307_vm5, %v7466_v0, %v3737_v40  ;;  %vm8308_vm6 = vmmov %vm8302_vm9  ;;  %v4043_v40 = vld [vmem:[%s7425_s19 + $0x20] sm:$0xf] }
 0x46a   : > { %v3791_v55 = vsel %vm8308_vm6, %v7500_v49, %v3790_v7  ;;  %v3739_v54 = vsel %vm8309_vm7, %v7492_v60, %v3738_v25  ;;  %vm8310_vm9 = vmmov %vm8304_vm2  ;;  %v3932_v7 = vrot.slane %v7498_v10, 3 }
 0x46b   : > { %v3873_v28 = vsel %vm8310_vm9, %v3872_v41, %v3856_v56  ;;  %vm8311_vm11 = vmmov %vm8305_vm3  ;;  %vm8313_vm3 = vcmask 1044484  }
 0x46c   : > { %v3867_v62 = vsel %vm8311_vm11, %v7468_v8, %v7476_v5  ;;  %vm8312_vm2 = vmmov %vm8306_vm4  ;;  %v3740_v22 = vsel %vm8313_vm3, %v7490_v4, %v3739_v54  ;;  %v3833_v5 = vrot.slane %v7496_v44, 7  ;;  %v4040_v54 = vld [vmem:[%s7425_s19 + $0x14] sm:$0x1] }
 0x46d   : > { %v3792_v20 = vsel %vm8312_vm2, %v7506_v17, %v3791_v55  ;;  %vm8314_vm4 = vmmov %vm8308_vm6  ;;  %v4115_v55 = vshll.u32 %v4043_v40, 16 }
 0x46e   : > { %v3869_v2 = vsel %vm8314_vm4, %v3868_v14, %v3867_v62  ;;  %v7585_v15 = vpack.c.b16 %v3792_v20, %v7409_v29  ;;  %vm8315_vm5 = vmmov %vm8311_vm11 }
 0x46f   : > { %v3741_v41 = vsel %vm8315_vm5, %v7500_v49, %v3740_v22  ;;  %vm8316_vm6 = vmmov %vm8312_vm2  ;;  %vm8320_vm2 = vcmask 1041409  }
 0x470   : > { %v3871_v56 = vsel %vm8316_vm6, %v3870_v31, %v3869_v2  ;;  %vm8317_vm7 = vmmov %vm8313_vm3  ;;  %v3646_v14 = vsel %vm8320_vm2, %v3645_v33, %v3644_v52  ;;  %3794 = vrot.lane.b32.xlu1 %v7585_v15, %s6252_s23 }
 0x471   : > { %v3637_v8 = vsel %vm8317_vm7, %v3636_v12, %v7418_v45  ;;  %vm8318_vm9 = vmmov %vm8314_vm4 }
 0x472   : > { %v3742_v24 = vsel %vm8318_vm9, %v7506_v17, %v3741_v41  ;;  %vm8319_vm11 = vmmov %vm8315_vm5  ;;  %vm8326_vm9 = vcmask 1043459  }
 0x473   : > { %v3639_v29 = vsel %vm8319_vm11, %v3638_v61, %v3637_v8  ;;  %v7605_v31 = vpack.c.b16 %v3742_v24, %v3736_v38  ;;  %vm8321_vm3 = vmmov %vm8314_vm4  ;;  %v4041_v38 = vld [vmem:[%s7425_s19 + $0x18] sm:$0xf]  ;;  %v4016_v24 = vld [vmem:[%s7425_s19 + $0x10] sm:$0xf] }
 0x474   : > { %v3641_v45 = vsel %vm8321_vm3, %v3640_v34, %v3639_v29  ;;  %vm8322_vm4 = vmmov %vm8315_vm5  ;;  %v3825_v34 = vsel %vm8326_vm9, %v3824_v26, %v7428_v43  ;;  %v8330_v26 = vrot.slane %v7494_v59, 6  ;;  %vm8336_vm9 = vcmask 1042434  }
 0x475   : > { %v3716_v12 = vsel %vm8322_vm4, %v3715_v35, %v7461_v13  ;;  %vm8323_vm5 = vmmov %vm8316_vm6  ;;  %3744 = vrot.lane.b32.xlu0 %v7605_v31, %s6252_s23  ;;  %v7627_v35 = vpack.c.b16 %v3873_v28, %v3873_v28  ;;  %v3533_v59 = vsel %vm8336_vm9, %v7420_v47, %v7389_v3  ;;  %v8339_v3 = vshrl.u32 %v7441_v51, 16 }
 0x476   : > { %v3643_v61 = vsel %vm8323_vm5, %v3642_v57, %v3641_v45  ;;  %vm8324_vm6 = vmmov %vm8321_vm3  ;;  %v8341_v28 = vshll.u32 %v7441_v51, 16  ;;  %v4098_v22 = vshrl.u32 %v4041_v38, 16  ;;  %v4101_v41 = vshll.u32 %v4041_v38, 16 }
 0x477   : > { %v3718_v10 = vsel %vm8324_vm6, %v3717_v48, %v3716_v12  ;;  %vm8325_vm7 = vmmov %vm8320_vm2  ;;  %vm8328_vm2 = vcmask 1044484   ;;  %v4112_v48 = vshrl.u32 %v4043_v40, 16  ;;  %3878 = vrot.lane.b32.xlu1 %v7627_v35, %s6252_s23  ;;  %v3647_v25 = vpack.c.b16 %v3643_v61, %v3643_v61  ;;  %v4044_v40 = vld [vmem:[%s7425_s19 + $0x24] sm:$0x1] }
 0x478   : > { %v3723_v44 = vsel %vm8325_vm7, %v3722_v11, %v3721_v50  ;;  %vm8327_vm11 = vmmov %vm8323_vm5  ;;  %v3827_v57 = vsel %vm8328_vm2, %v3826_v39, %v3825_v34  ;;  %v7650_v39 = vpack.c.b16 %v3871_v56, %v3871_v56  ;;  %v4037_v11 = vld [vmem:[%s7425_s19 + $0x8] sm:$0xf]  ;;  %v4086_v47 = vrot.slane %v8339_v3, 4  ;;  %v4042_v34 = vld [vmem:[%s7425_s19 + $0x1c] sm:$0x1] }
 0x479   : > { %v3720_v13 = vsel %vm8327_vm11, %v3719_v42, %v3718_v10  ;;  %vm8329_vm3 = vmmov %vm8322_vm4  ;;  %v8332_v42 = vrot.slane %v7454_v19, 4  ;;  %v4073_v62 = vshll.u32 %v4037_v11, 16  ;;  %v3648_v50 = vpack.c.b16 %v3646_v14, %v3646_v14  ;;  %v4017_v3 = vld [vmem:[%s7425_s19 + $0x18] sm:$0xf] }
 0x47a   : > { %v3829_v43 = vsel %vm8329_vm3, %v3828_v32, %v3827_v57  ;;  %vm8331_vm4 = vmmov %vm8325_vm7  ;;  %3876 = vrot.lane.b32.xlu0 %v7650_v39, %s6252_s23  ;;  %v4093_v56 = vshll.u32 %v4040_v54, 16  ;;  %v4117_v14 = vrot.slane %v4115_v55, 5  ;;  %v4100_v12 = vrot.slane %v4098_v22, 4 }
 0x47b   : > { %v7642_v33 = vsel %vm8331_vm4, %v8330_v26, %v3833_v5  ;;  %vm8333_vm5 = vmmov %vm8329_vm3  ;;  %v3831_v32 = vsel %vm8324_vm6, %v8334_v30, %v3829_v43  ;;  %vm8338_vm3 = vcmask 1043459   ;;  %v3545_v23 = vsel %vm8331_vm4, %v7506_v17, %v7500_v49  ;;  %3649 = vrot.lane.b32.xlu1 %v3647_v25, %s6260_s21  ;;  %v4038_v5 = vld [vmem:[%s7425_s19 + $0xc] sm:$0x1]  ;;  %v4015_v25 = vld [vmem:[%s7425_s19 + $0x8] sm:$0xf] }
 0x47c   : > { %v3931_v58 = vsel %vm8333_vm5, %v8332_v42, %v7483_v9  ;;  %vm8335_vm7 = vmmov %vm8324_vm6  ;;  %v3832_v19 = vsel %vm8327_vm11, %v7470_v6, %v3831_v32  ;;  %v3535_v52 = vsel %vm8338_vm3, %v7415_v16, %v3533_v59  ;;  %vm8340_vm5 = vcmask 1044484  }
 0x47d   : > { %v3933_v37 = vsel %vm8335_vm7, %v3932_v7, %v3931_v58  ;;  %vm8337_vm2 = vmmov %vm8327_vm11  ;;  %v3537_v6 = vsel %vm8340_vm5, %v7478_v63, %v3535_v52  ;;  %v4089_v16 = vrot.slane %v8341_v28, 5  ;;  %vm8342_vm6 = vcmask 1045509  }
 0x47e   : > { %v3935_v9 = vsel %vm8337_vm2, %v3934_v18, %v3933_v37  ;;  %v3539_v49 = vsel %vm8342_vm6, %v7466_v0, %v3537_v6  ;;  %v4070_v17 = vshrl.u32 %v4037_v11, 16  ;;  %vm8343_vm9 = vmmov %vm8337_vm2  ;;  %v4075_v2 = vrot.slane %v4073_v62, 5  ;;  %3651 = vrot.lane.b32.xlu0 %v3648_v50, %s6260_s21 }
 0x47f   : > { %v3541_v20 = vsel %vm8335_vm7, %v7492_v60, %v3539_v49  ;;  %v3724_v0 = vpack.c.b16 %v3720_v13, %v3720_v13  ;;  %v4090_v29 = vor.u32 %v4089_v16, %v4086_v47  ;;  %v4114_v60 = vrot.slane %v4112_v48, 4  ;;  %v4018_v13 = vld [vmem:[%s7425_s19 + $0x20] sm:$0xf] }
 0x480   : > { %v3543_v63 = vsel %vm8343_vm9, %v7490_v4, %v3541_v20  ;;  %v4072_v51 = vrot.slane %v4070_v17, 4  ;;  %vm4024_vm11 = vcmask 27648   ;;  %v3725_v4 = vpack.c.b16 %v3723_v44, %v3723_v44 }
 0x481   : > { %v7686_v8 = vpack.c.b16 %v3545_v23, %v3543_v63  ;;  %3726 = vrot.lane.b32.xlu1 %v3724_v0, %s6255_s20  ;;  %4027 = vst.msk [vmem:[#allocation4 + $0x8] sm:$0xf] %vm4024_vm11, %v4016_v24  ;;  %v4079_v45 = vshll.u32 %v4038_v5, 16  ;;  %v4103_v61 = vrot.slane %v4101_v41, 5  ;;  %v3836_v10 = vpack.c.b16 %v3832_v19, %v3832_v19  ;;  %4029 = vst.msk [vmem:[#allocation4 + $0x10] sm:$0xf] %vm4024_vm11, %v4018_v13 }
 0x482   : > { %v4076_v7 = vor.u32 %v4075_v2, %v4072_v51  ;;  %3728 = vrot.lane.b32.xlu0 %v3725_v4, %s6255_s20  ;;  %v4091_v57 = vrot.slane %v4090_v29, 4  ;;  %v4095_v18 = vrot.slane %v4093_v56, 5  ;;  %v4118_v48 = vor.u32 %v4117_v14, %v4114_v60  ;;  %4026 = vst.msk [vmem:[#allocation4 + $0x4] sm:$0xf] %vm4024_vm11, %v4015_v25  ;;  %4028 = vst.msk [vmem:[#allocation4 + $0xc] sm:$0xf] %vm4024_vm11, %v4017_v3 }
 0x483   : > { %v4121_v43 = vshll.u32 %v4044_v40, 16  ;;  %v3837_v44 = vpack.c.b16 %v7642_v33, %v7642_v33  ;;  %v4081_v42 = vrot.slane %v4079_v45, 5  ;;  %v4104_v58 = vor.u32 %v4103_v61, %v4100_v12  ;;  %s6265_s20 = smov 52  }
 0x484   : > { %v4077_v26 = vrot.slane %v4076_v7, 4  ;;  %v4107_v30 = vshll.u32 %v4042_v34, 16  ;;  %v3938_v32 = vpack.c.b16 %v3935_v9, %v3935_v9  ;;  %v4096_v37 = vsel %vm7073_vm14, %v4091_v57, %v4095_v18 }
 0x485   : > { %3838 = vrot.lane.b32.xlu1 %v3836_v10, %s6259_s18  ;;  %v4119_v59 = vrot.slane %v4118_v48, 4  ;;  %v4123_v11 = vrot.slane %v4121_v43, 5  ;;  %v4105_v33 = vrot.slane %v4104_v58, 4  ;;  %v3939_v38 = vpack.c.b16 %v7558_v27, %v7558_v27 }
 0x486   : > { %3840 = vrot.lane.b32.xlu0 %v3837_v44, %s6259_s18  ;;  %v4082_v19 = vsel %vm7073_vm14, %v4077_v26, %v4081_v42  ;;  %v4109_v52 = vrot.slane %v4107_v30, 5  ;;  %vm8344_vm2 = vcmask 31744   ;;  %vm8174_vm9 = vcmask 60448  }
 0x487   : > { %v4124_v23 = vsel %vm7073_vm14, %v4119_v59, %v4123_v11  ;;  %vm8345_vm3 = vmmov %vm8344_vm2  ;;  %v4240_v11 = vld [vmem:[%s7425_s19 + $0x10] sm:$0xe] }
 0x488   : > { %v4110_v9 = vsel %vm7073_vm14, %v4105_v33, %v4109_v52  ;;  %vm8346_vm4 = vmmov %vm8344_vm2 }
 0x489   : > { %3940 = vrot.lane.b32.xlu1 %v3938_v32, %s6263_s26  ;;  %vm8347_vm5 = vmmov %vm8344_vm2 }
 0x48a   : > { %4199 = vrot.lane.b32.xlu0 %v4096_v37, %s6252_s23  ;;  %vm8348_vm6 = vmmov %vm8344_vm2 }
 0x48b   : > { %vm8349_vm7 = vmmov %vm8344_vm2 }
 0x48d   : > { %4197 = vrot.lane.b32.xlu1 %v4082_v19, %s6252_s23 }
 0x48e   : > { %4203 = vrot.lane.b32.xlu0 %v4124_v23, %s6252_s23 }
 0x491   : > { %4201 = vrot.lane.b32.xlu1 %v4110_v9, %s6252_s23 }
 0x492   : > { %3547 = vrot.lane.b32.xlu0 %v7686_v8, %s6252_s23 }
 0x496   : > { %3942 = vrot.lane.b32.xlu0 %v3939_v38, %s6263_s26  ;;  %v4047_v38 = vld [vmem:[%s7425_s19 + $0x30] sm:$0xf]  ;;  %s6266_s26 = smov 20  }
 0x4d7   : > { %v3669_v47 = vpop.permute.xlu1 %3668 }
 0x4d8   : > { %v3672_v6 = vsel %vm8344_vm2, %v7541_v21, %v3669_v47  ;;  %vm3754_vm2 = vsmask.f32 1280 }
 0x4d9   : > { %v3572_v55 = vpop.permute.xlu0 %3571  ;;  %v5427_v49 = vcombine.low %v3672_v6, %v3672_v6  ;;  %v5428_v27 = vcombine.high %v3672_v6, %v3672_v6  ;;  %v4241_v6 = vld [vmem:[%s7425_s19 + $0x14] sm:$0x1] }
 0x4da   : > { %v3575_v54 = vsel %vm8345_vm3, %v7547_v46, %v3572_v55  ;;  %vm4276_vm3 = vcmask 1042432  }
 0x4db   : > { %v5416_v28 = vcombine.high %v3575_v54, %v3575_v54  ;;  %v5415_v16 = vcombine.low %v3575_v54, %v3575_v54  ;;  %v3679_v21 = vshrl.u32 %v5427_v49, 16  ;;  %v3682_v41 = vshll.u32 %v5427_v49, 16 }
 0x4dc   : > { %v3688_v0 = vshrl.u32 %v5428_v27, 16  ;;  %v3691_v5 = vshll.u32 %v5428_v27, 16  ;;  %v4140_v49 = vshrl.u32 %v4047_v38, 16  ;;  %v4143_v27 = vshll.u32 %v4047_v38, 16 }
 0x4dd   : > { %v3591_v62 = vshll.u32 %v5416_v28, 16  ;;  %v3595_v50 = vshrl.u32 %v5416_v28, 16  ;;  %v3582_v22 = vshrl.u32 %v5415_v16, 16  ;;  %v3585_v63 = vshll.u32 %v5415_v16, 16  ;;  %v7757_v28 = vld [vmem:[%s7425_s19 + $0x8] sm:$0xe] }
 0x4de   : > { %v3681_v61 = vrot.slane %v3679_v21, 5  ;;  %v3684_v13 = vrot.slane %v3682_v41, 6  ;;  %v3690_v57 = vrot.slane %v3688_v0, 5  ;;  %v3693_v18 = vrot.slane %v3691_v5, 6  ;;  %v4045_v16 = vld [vmem:[%s7425_s19 + $0x28] sm:$0xf] }
 0x4df   : > { %v7731_v24 = vrot.slane %v3591_v62, 5  ;;  %v3597_v29 = vrot.slane %v3595_v50, 4  ;;  %v3587_v45 = vrot.slane %v3585_v63, 5  ;;  %v4051_v63 = vld [vmem:[%s7425_s19 + $0x40] sm:$0xf] }
 0x4e0   : > { %v3685_v59 = vor.u32 %v3684_v13, %v3681_v61  ;;  %v3694_v19 = vor.u32 %v3693_v18, %v3690_v57  ;;  %v4239_v41 = vld [vmem:[%s7425_s19 + $0xc] sm:$0x1]  ;;  %v4244_v5 = vld [vmem:[%s7425_s19 + $0x20] sm:$0xe]  ;;  %v4243_v13 = vld [vmem:[%s7425_s19 + $0x1c] sm:$0x1] }
 0x4e1   : > { %v4285_v61 = vrot.slane %v4239_v41, 5  ;;  %v4048_v57 = vld [vmem:[%s7425_s19 + $0x34] sm:$0x1] }
 0x4e2   : > { %v3795_v17 = vpop.permute.xlu1 %3794  ;;  %v3696_v50 = vrot.slane %v3694_v19, 4 }
 0x4e3   : > { %v3798_v51 = vsel %vm8346_vm4, %v7585_v15, %v3795_v17  ;;  %v3584_v15 = vrot.slane %v3582_v22, 4  ;;  %vm4277_vm4 = vcmask 1046532   ;;  %v4289_v22 = vrot.slane %v4241_v6, 5 }
 0x4e4   : > { %v5432_v46 = vcombine.high %v3798_v51, %v3798_v51  ;;  %v5431_v12 = vcombine.low %v3798_v51, %v3798_v51  ;;  %v3686_v51 = vrot.slane %v3685_v59, 4  ;;  %v4293_v6 = vrot.slane %v4243_v13, 5  ;;  %v4246_v13 = vld [vmem:[%s7425_s19 + $0x28] sm:$0xe] }
 0x4e5   : > { %v3588_v58 = vor.u32 %v3587_v45, %v3584_v15  ;;  %v4168_v15 = vshrl.u32 %v4051_v63, 16  ;;  %v4171_v45 = vshll.u32 %v4051_v63, 16 }
 0x4e6   : > { %v3806_v14 = vrot.slane %v5432_v46, 7  ;;  %v5433_v30 = vrot.slane %v5431_v12, 11  ;;  %v5450_v46 = vrot.slane %v7757_v28, 9 }
 0x4e7   : > { %v3745_v20 = vpop.permute.xlu0 %3744  ;;  %v3589_v25 = vrot.slane %v3588_v58, 4  ;;  %v4046_v58 = vld [vmem:[%s7425_s19 + $0x2c] sm:$0x1] }
 0x4e8   : > { %v3748_v2 = vsel %vm8347_vm5, %v7605_v31, %v3745_v20  ;;  %v3808_v48 = vrot.slane %v3806_v14, 4  ;;  %v3807_v55 = vsel %vm7061_vm12, %v5433_v30, %v3806_v14  ;;  %vm3755_vm5 = vsmask.f32 5392  ;;  %v4242_v14 = vld [vmem:[%s7425_s19 + $0x18] sm:$0xe] }
 0x4e9   : > { %v3879_v56 = vpop.permute.xlu1 %3878  ;;  %v5430_v4 = vcombine.high %v3748_v2, %v3748_v2  ;;  %v5429_v31 = vcombine.low %v3748_v2, %v3748_v2  ;;  %v5451_v20 = vrot.slane %v4240_v11, 9  ;;  %v3594_v21 = vsel %vm7073_vm14, %v3589_v25, %v7731_v24 }
 0x4ea   : > { %v3885_v60 = vsel %vm8348_vm6, %v7627_v35, %v3879_v56  ;;  %v3598_v35 = vor.u32 %v3597_v29, %v7731_v24  ;;  %vm7771_vm6 = vmor %vm4276_vm3, %vm4277_vm4  ;;  %v4245_v29 = vld [vmem:[%s7425_s19 + $0x24] sm:$0x1]  ;;  %v4126_v24 = vshrl.u32 %v4045_v16, 16  ;;  %v5452_v25 = vrot.slane %v4242_v14, 9 }
 0x4eb   : > { %v5435_v40 = vcombine.low %v3885_v60, %v3885_v60  ;;  %v3767_v43 = vshrl.u32 %v5430_v4, 16  ;;  %v3770_v44 = vshll.u32 %v5430_v4, 16  ;;  %v3761_v32 = vshll.u32 %v5429_v31, 16 }
 0x4ec   : > { %v3877_v7 = vpop.permute.xlu0 %3876  ;;  %v3599_v9 = vrot.slane %v3598_v35, 4  ;;  %v4129_v60 = vshll.u32 %v4045_v16, 16  ;;  %v4142_v4 = vrot.slane %v4140_v49, 4  ;;  %v3695_v35 = vsel %vm7086_vm10, %v3686_v51, %v3694_v19  ;;  %v4020_v16 = vld [vmem:[%s7425_s19 + $0x30] sm:$0xf] }
 0x4ed   : > { %v3882_v10 = vsel %vm8349_vm7, %v7650_v39, %v3877_v7  ;;  %v7737_v34 = vpop.permute.xlu1 %3649  ;;  %3894 = vrot.lane.b32.xlu0 %v5435_v40, %s6265_s20  ;;  %v3758_v39 = vshrl.u32 %v5429_v31, 16  ;;  %v3769_v33 = vrot.slane %v3767_v43, 6  ;;  %v3772_v52 = vrot.slane %v3770_v44, 7  ;;  %v4049_v7 = vld [vmem:[%s7425_s19 + $0x38] sm:$0xf]  ;;  %vm7794_vm7 = vmor %vm3754_vm2, %vm3755_vm5 }
 0x4ee   : > { %v5434_v26 = vcombine.high %v3882_v10, %v3882_v10  ;;  %v3763_v47 = vrot.slane %v3761_v32, 7  ;;  %v4145_v40 = vrot.slane %v4143_v27, 5  ;;  %v4290_v10 = vsel %vm7771_vm6, %v5451_v20, %v4289_v22  ;;  %v4019_v44 = vld [vmem:[%s7425_s19 + $0x28] sm:$0xf]  ;;  %v4021_v49 = vld [vmem:[%s7425_s19 + $0x38] sm:$0xf] }
 0x4ef   : > { %v3760_v3 = vrot.slane %v3758_v39, 6  ;;  %v7760_v17 = vor.u32 %v3772_v52, %v3769_v33  ;;  %v4297_v43 = vrot.slane %v4245_v29, 5  ;;  %v4128_v30 = vrot.slane %v4126_v24, 4  ;;  %4030 = vst.msk [vmem:[#allocation4 + $0x14] sm:$0xf] %vm4024_vm11, %v4019_v44 }
 0x4f0   : > { %v7740_v42 = vpop.permute.xlu0 %3651  ;;  %3892 = vrot.lane.b32.xlu1 %v5434_v26, %s6265_s20  ;;  %v8352_v26 = vmov 0  ;;  %v4131_v39 = vrot.slane %v4129_v60, 5  ;;  %v4154_v32 = vshrl.u32 %v4049_v7, 16  ;;  %v4157_v59 = vshll.u32 %v4049_v7, 16  ;;  %4031 = vst.msk [vmem:[#allocation4 + $0x18] sm:$0xf] %vm4024_vm11, %v4020_v16 }
 0x4f1   : > { %3811 = vrot.lane.b32.xlu0 %v3808_v48, %s6256_s24  ;;  %v3764_v2 = vor.u32 %v3763_v47, %v3760_v3  ;;  %v3775_v31 = vrot.slane %v7760_v17, 4  ;;  %v5453_v48 = vrot.slane %v4244_v5, 9  ;;  %v8353_v26 = vsel %vm7794_vm7, 4294967295, %v8352_v26  ;;  %v4052_v3 = vld [vmem:[%s7425_s19 + $0x44] sm:$0x1] }
 0x4f2   : > { %v4146_v19 = vor.u32 %v4145_v40, %v4142_v4  ;;  %v4149_v33 = vshll.u32 %v4048_v57, 16  ;;  %v4170_v52 = vrot.slane %v4168_v15, 4  ;;  %v4135_v28 = vshll.u32 %v4046_v58, 16  ;;  %4032 = vst.msk [vmem:[#allocation4 + $0x1c] sm:$0xf] %vm4024_vm11, %v4021_v49 }
 0x4f3   : > { %v7742_v37 = vpop.permute.xlu1 %3726  ;;  %v3765_v18 = vrot.slane %v3764_v2, 4  ;;  %v4298_v27 = vsel %vm7771_vm6, %v5453_v48, %v4297_v43  ;;  %v4156_v20 = vrot.slane %v4154_v32, 4  ;;  %v4050_v2 = vld [vmem:[%s7425_s19 + $0x3c] sm:$0x1]  ;;  %v4177_v41 = vshll.u32 %v4052_v3, 16 }
 0x4f4   : > { %v7746_v23 = vpop.permute.xlu0 %3728  ;;  %3809 = vrot.lane.b32.xlu1 %v3807_v55, %s6256_s24  ;;  %v4286_v55 = vsel %vm7771_vm6, %v5450_v46, %v4285_v61  ;;  %v4147_v63 = vrot.slane %v4146_v19, 4  ;;  %v4151_v51 = vrot.slane %v4149_v33, 5  ;;  %vm8354_vm2 = vcmask 31744   ;;  %v4022_v60 = vld [vmem:[%s7425_s19 + $0x40] sm:$0xf] }
 0x4f5   : > { %3602 = vrot.lane.b32.xlu0 %v3599_v9, %s6251_s22  ;;  %v4173_v9 = vrot.slane %v4171_v45, 5  ;;  %v3774_v47 = vsel %vm7794_vm7, %v3765_v18, %v7760_v17  ;;  %v4159_v17 = vrot.slane %v4157_v59, 5  ;;  %v4294_v29 = vsel %vm7771_vm6, %v5452_v25, %v4293_v6  ;;  %4033 = vst.msk [vmem:[#allocation4 + $0x20] sm:$0xf] %vm4024_vm11, %v4022_v60  ;;  %v4248_v61 = vld [vmem:[%s7425_s19 + $0x30] sm:$0xe] }
 0x4f6   : > { %v4137_v24 = vrot.slane %v4135_v28, 5  ;;  %vm3560_vm3 = vcmask 57344   ;;  %v4163_v7 = vshll.u32 %v4050_v2, 16  ;;  %v4152_v15 = vsel %vm7073_vm14, %v4147_v63, %v4151_v51  ;;  %v4252_v32 = vld [vmem:[%s7425_s19 + $0x40] sm:$0xe] }
 0x4f7   : > { %v7753_v54 = vpop.permute.xlu1 %3838  ;;  %v4160_v40 = vor.u32 %v4159_v17, %v4156_v20  ;;  %vm8355_vm4 = vcmask 60416   ;;  %v4253_v59 = vld [vmem:[%s7425_s19 + $0x44] sm:$0x1]  ;;  %v5454_v19 = vrot.slane %v4246_v13, 9  ;;  %v4251_v28 = vld [vmem:[%s7425_s19 + $0x3c] sm:$0x1] }
 0x4f8   : > { %v7762_v62 = vpop.permute.xlu0 %3840  ;;  %3600 = vrot.lane.b32.xlu1 %v3594_v21, %s6251_s22  ;;  %v4174_v21 = vor.u32 %v4173_v9, %v4170_v52  ;;  %v4165_v18 = vrot.slane %v4163_v7, 5  ;;  %v4250_v52 = vld [vmem:[%s7425_s19 + $0x38] sm:$0xe]  ;;  %v5457_v9 = vrot.slane %v4252_v32, 9  ;;  %v4036_v16 = vld [vmem:[%s7425_s19 + $0x4] sm:$0x1] }
 0x4f9   : > { %3699 = vrot.lane.b32.xlu0 %v3696_v50, %s6266_s26  ;;  %v4132_v50 = vor.u32 %v4131_v39, %v4128_v30  ;;  %v4161_v57 = vrot.slane %v4160_v40, 4  ;;  %v5455_v30 = vrot.slane %v4248_v61, 9  ;;  %v4237_v20 = vld [vmem:[%s7425_s19 + $0x4] sm:$0x1]  ;;  %v4309_v63 = vrot.slane %v4251_v28, 5 }
 0x4fa   : > { %v4175_v45 = vrot.slane %v4174_v21, 4  ;;  %v4065_v21 = vshll.u32 %v4036_v16, 16  ;;  %v4254_v60 = vld [vmem:[%s7425_s19 + $0x48] sm:$0xe]  ;;  %vm3608_vm5 = vcmask 122944   ;;  %vm3947_vm7 = vcmask 516576  }
 0x4fb   : > { %v7777_v56 = vpop.permute.xlu1 %3940  ;;  %vm8357_vm10 = vcmask 93248  }
 0x4fc   : > { %v4200_v12 = vpop.permute.xlu0 %4199  ;;  %3697 = vrot.lane.b32.xlu1 %v3695_v35, %s6266_s26  ;;  %v4247_v35 = vld [vmem:[%s7425_s19 + $0x2c] sm:$0x1]  ;;  %v4067_v7 = vrot.slane %v4065_v21, 5  ;;  %s5561_s26 = sshll.u32 %s6335_s9, 8 }
 0x4fd   : > { %4228 = vst.msk [vmem:[#allocation4 + $0x8] sm:$0xf] %vm8174_vm9, %v4200_v12  ;;  %3778 = vrot.lane.b32.xlu0 %v3775_v31, %s6258_s13  ;;  %v4179_v12 = vrot.slane %v4177_v41, 5  ;;  %v4035_v31 = vld [vmem:[%s7425_s19] sm:$0xf]  ;;  %v4301_v33 = vrot.slane %v4247_v35, 5 }
 0x4fe   : > { %v4056_v48 = vshrl.u32 %v4035_v31, 16  ;;  %v4059_v43 = vshll.u32 %v4035_v31, 16  ;;  %v4023_v35 = vld [vmem:[%s7425_s19 + $0x48] sm:$0xf] }
 0x4ff   : > { %v4198_v11 = vpop.permute.xlu1 %4197  ;;  %v4180_v58 = vsel %vm7073_vm14, %v4175_v45, %v4179_v12  ;;  %v4302_v17 = vsel %vm7771_vm6, %v5454_v19, %v4301_v33  ;;  %v5458_v12 = vrot.slane %v4254_v60, 9  ;;  %4034 = vst.msk [vmem:[#allocation4 + $0x24] sm:$0xf] %vm4024_vm11, %v4023_v35  ;;  %v8385_v60 = vmov 0.0  }
 0x500   : > { %4227 = vst.msk [vmem:[#allocation4 + $0x4] sm:$0xf] %vm8174_vm9, %v4198_v11  ;;  %v4204_v38 = vpop.permute.xlu0 %4203  ;;  %3776 = vrot.lane.b32.xlu1 %v3774_v47, %s6258_s13  ;;  %v4053_v11 = vld [vmem:[%s7425_s19 + $0x48] sm:$0xf]  ;;  %v4058_v25 = vrot.slane %v4056_v48, 4  ;;  %v4061_v3 = vrot.slane %v4059_v43, 5 }
 0x501   : > { %4230 = vst.msk [vmem:[#allocation4 + $0x10] sm:$0xf] %vm8174_vm9, %v4204_v38  ;;  %4323 = vrot.lane.b32.xlu0 %v4290_v10, %s6251_s22  ;;  %v4249_v10 = vld [vmem:[%s7425_s19 + $0x34] sm:$0x1]  ;;  %v4313_v38 = vrot.slane %v4253_v59, 5  ;;  %v4182_v49 = vshrl.u32 %v4053_v11, 16 }
 0x502   : > { %v4305_v39 = vrot.slane %v4249_v10, 5  ;;  %v4014_v47 = vld [vmem:[%s7425_s19] sm:$0xf]  ;;  %v4062_v2 = vor.u32 %v4061_v3, %v4058_v25 }
 0x503   : > { %v4202_v22 = vpop.permute.xlu1 %4201  ;;  %4025 = vst.msk [vmem:[#allocation4] sm:$0xf] %vm4024_vm11, %v4014_v47  ;;  %v4314_v51 = vsel %vm7771_vm6, %v5457_v9, %v4313_v38  ;;  %vm3703_vm11 = vcmask 224416   ;;  %v6170_v25 = vld [vmem:[%s8146_s3] sm:$0xff]  }
 0x504   : > { %4229 = vst.msk [vmem:[#allocation4 + $0xc] sm:$0xf] %vm8174_vm9, %v4202_v22  ;;  %v3548_v46 = vpop.permute.xlu0 %3547  ;;  %4321 = vrot.lane.b32.xlu1 %v4286_v55, %s6251_s22  ;;  %v4166_v55 = vsel %vm7073_vm14, %v4161_v57, %v4165_v18  ;;  %v4306_v6 = vsel %vm7771_vm6, %v5455_v30, %v4305_v39  ;;  %v5456_v22 = vrot.slane %v4250_v52, 9  ;;  %v4063_v40 = vrot.slane %v4062_v2, 4 }
 0x505   : > { %v3551_v5 = vsel %vm8354_vm2, %v7686_v8, %v3548_v46  ;;  %4327 = vrot.lane.b32.xlu0 %v4298_v27, %s6251_s22  ;;  %v4133_v8 = vrot.slane %v4132_v50, 4  ;;  %v4185_v27 = vshll.u32 %v4053_v11, 16  ;;  %v4236_v50 = vld [vmem:[%s7425_s19] sm:$0xe]  ;;  %v4281_v46 = vrot.slane %v4237_v20, 5 }
 0x506   : > { %v5413_v14 = vcombine.low %v3551_v5, %v3551_v5  ;;  %v5414_v4 = vcombine.high %v3551_v5, %v3551_v5  ;;  %v5449_v41 = vrot.slane %v4236_v50, 9  ;;  %v4054_v5 = vld [vmem:[%s7425_s19 + $0x4c] sm:$0x1]  ;;  %v4068_v61 = vsel %vm7073_vm14, %v4063_v40, %v4067_v7  ;;  %v6182_v20 = vld [vmem:[%s8149_s6 + $0x40] sm:$0x3f]  }
 0x507   : > { %v4138_v44 = vsel %vm7073_vm14, %v4133_v8, %v4137_v24  ;;  %v4187_v24 = vrot.slane %v4185_v27, 5  ;;  %v4191_v8 = vshll.u32 %v4054_v5, 16  ;;  %vm3657_vm2 = vcmask 155776  }
 0x508   : > { %3559 = vst.msk [vmem:[#allocation5] sm:$0xf] %vm8355_vm4, %v5413_v14  ;;  %4325 = vrot.lane.b32.xlu1 %v4294_v29, %s6251_s22  ;;  %v4184_v29 = vrot.slane %v4182_v49, 4  ;;  %v4255_v14 = vld [vmem:[%s7425_s19 + $0x4c] sm:$0x1]  ;;  %v3943_v48 = vpop.permute.xlu0 %3942  ;;  %vm3705_vm4 = vcmask 221344  }
 0x509   : > { %3561 = vst.msk [vmem:[#allocation5 + $0x4] sm:$0x1] %vm3560_vm3, %v5414_v4  ;;  %4207 = vrot.lane.b32.xlu0 %v4152_v15, %s6252_s23  ;;  %v4310_v4 = vsel %vm7771_vm6, %v5456_v22, %v4309_v63  ;;  %v4282_v15 = vsel %vm7771_vm6, %v5449_v41, %v4281_v46  ;;  %v4317_v31 = vrot.slane %v4255_v14, 5  ;;  %v4193_v13 = vrot.slane %v4191_v8, 5 }
 0x50a   : > { %v4188_v45 = vor.u32 %v4187_v24, %v4184_v29  ;;  %vm8178_vm3 = vcmask 126016   ;;  %vm3733_vm9 = vcmask 254176  }
 0x50b   : > { %v4318_v57 = vsel %vm7771_vm6, %v5458_v12, %v4317_v31 }
 0x50c   : > { %4205 = vrot.lane.b32.xlu1 %v4138_v44, %s6252_s23  ;;  %v4189_v10 = vrot.slane %v4188_v45, 4 }
 0x50d   : > { %4211 = vrot.lane.b32.xlu0 %v4180_v58, %s6252_s23 }
 0x50e   : > { %v4194_v18 = vsel %vm7073_vm14, %v4189_v10, %v4193_v13 }
 0x510   : > { %4209 = vrot.lane.b32.xlu1 %v4166_v55, %s6252_s23 }
 0x511   : > { %4331 = vrot.lane.b32.xlu0 %v4306_v6, %s6251_s22  ;;  %v6176_v6 = vld [vmem:[%s8149_s6 + $0x30] sm:$0x3f]  }
 0x514   : > { %4329 = vrot.lane.b32.xlu1 %v4302_v17, %s6251_s22 }
 0x515   : > { %4335 = vrot.lane.b32.xlu0 %v4314_v51, %s6251_s22 }
 0x518   : > { %4333 = vrot.lane.b32.xlu1 %v4310_v4, %s6251_s22 }
 0x519   : > { %4319 = vrot.lane.b32.xlu0 %v4282_v15, %s6251_s22 }
 0x51c   : > { %4195 = vrot.lane.b32.xlu1 %v4068_v61, %s6252_s23 }
 0x51d   : > { %4337 = vrot.lane.b32.xlu0 %v4318_v57, %s6251_s22 }
 0x520   : > { %4213 = vrot.lane.b32.xlu1 %v4194_v18, %s6252_s23 }
 0x55f   : > { %v3895_v43 = vpop.permute.xlu0 %3894 }
 0x562   : > { %v3893_v44 = vpop.permute.xlu1 %3892 }
 0x563   : > { %v3812_v58 = vpop.permute.xlu0 %3811 }
 0x566   : > { %v3810_v30 = vpop.permute.xlu1 %3809 }
 0x567   : > { %v3603_v39 = vpop.permute.xlu0 %3602 }
 0x568   : > { %3609 = vst.msk [vmem:[#allocation5 + $0x4] sm:$0x1] %vm3608_vm5, %v3603_v39  ;;  %vm3846_vm5 = vcmask 418176  }
 0x569   : > { %3658 = vst.msk [vmem:[#allocation5 + $0x4] sm:$0x1] %vm3657_vm2, %v7740_v42  ;;  %vm3900_vm2 = vcmask 483744  }
 0x56a   : > { %v3601_v32 = vpop.permute.xlu1 %3600 }
 0x56b   : > { %v3700_v59 = vpop.permute.xlu0 %3699  ;;  %3607 = vst.msk [vmem:[#allocation5] sm:$0xf] %vm8178_vm3, %v3601_v32  ;;  %vm3815_vm3 = vcmask 388416  }
 0x56c   : > { %3706 = vst.msk [vmem:[#allocation5 + $0x4] sm:$0x1] %vm3705_vm4, %v3700_v59  ;;  %vm3844_vm4 = vcmask 421248  }
 0x56d   : > { %3656 = vst.msk [vmem:[#allocation5] sm:$0xf] %vm3655_vm1, %v7737_v34  ;;  %vm3898_vm1 = vcmask 486816  }
 0x56e   : > { %3734 = vst.msk [vmem:[#allocation5 + $0x4] sm:$0x1] %vm3733_vm9, %v7746_v23  ;;  %v3698_v11 = vpop.permute.xlu1 %3697  ;;  %vm8356_vm9 = vcmask 322816  }
 0x56f   : > { %v3779_v19 = vpop.permute.xlu0 %3778  ;;  %3704 = vst.msk [vmem:[#allocation5] sm:$0xf] %vm3703_vm11, %v3698_v11 }
 0x570   : > { %3784 = vst.msk [vmem:[#allocation5 + $0x4] sm:$0x1] %vm3783_vm15, %v3779_v19 }
 0x571   : > { %3732 = vst.msk [vmem:[#allocation5] sm:$0xf] %vm1987_vm0, %v7742_v37  ;;  %vm8359_vm0 = vmmov %vm8357_vm10 }
 0x572   : > { %3818 = vst.msk [vmem:[#allocation5 + $0x4] sm:$0x1] %vm3817_vm13, %v3812_v58  ;;  %v3777_v34 = vpop.permute.xlu1 %3776  ;;  %vm8358_vm13 = vcmask 519648   ;;  %vm8360_vm15 = vmmov %vm8359_vm0 }
 0x573   : > { %3847 = vst.msk [vmem:[#allocation5 + $0x4] sm:$0x1] %vm3846_vm5, %v7762_v62  ;;  %v4324_v42 = vpop.permute.xlu0 %4323  ;;  %vm8361_vm11 = vmmov %vm8359_vm0 }
 0x574   : > { %3901 = vst.msk [vmem:[#allocation5 + $0x4] sm:$0x1] %vm3900_vm2, %v3895_v43 }
 0x575   : > { %3782 = vst.msk [vmem:[#allocation5] sm:$0xf] %vm8356_vm9, %v3777_v34 }
 0x576   : > { %3948 = vst.msk [vmem:[#allocation5 + $0x4] sm:$0x1] %vm3947_vm7, %v3943_v48  ;;  %v4322_v37 = vpop.permute.xlu1 %4321  ;;  %vm8362_vm7 = vcmask 60448  }
 0x577   : > { %4351 = vst.msk [vmem:[#allocation4 + $0x8] sm:$0xf] %vm8357_vm10, %v4324_v42  ;;  %v4328_v23 = vpop.permute.xlu0 %4327  ;;  %vm3967_vm10 = vcmask 1044480   ;;  %vm8363_vm5 = vmmov %vm8362_vm7 }
 0x578   : > { %3816 = vst.msk [vmem:[#allocation5] sm:$0xf] %vm3815_vm3, %v3810_v30  ;;  %vm8364_vm2 = vmmov %vm8363_vm5 }
 0x579   : > { %3845 = vst.msk [vmem:[#allocation5] sm:$0xf] %vm3844_vm4, %v7753_v54  ;;  %v6171_v54 = vld [vmem:[%s8149_s6 + $0x38] sm:$0x3f]   ;;  %vm3963_vm4 = vcmask 80896  }
 0x57a   : > { %3899 = vst.msk [vmem:[#allocation5] sm:$0xf] %vm3898_vm1, %v3893_v44  ;;  %v4326_v62 = vpop.permute.xlu1 %4325  ;;  %vm8365_vm1 = vcmask 1045504  }
 0x57b   : > { %3946 = vst.msk [vmem:[#allocation5] sm:$0xf] %vm8358_vm13, %v7777_v56  ;;  %v4208_v33 = vpop.permute.xlu0 %4207  ;;  %v4420_v3 = vsel %vm8365_vm1, %v6171_v54, 0  ;;  %vm8366_vm9 = vmmov %vm8365_vm1 }
 0x57c   : > { %4350 = vst.msk [vmem:[#allocation4 + $0x4] sm:$0xf] %vm8359_vm0, %v4322_v37  ;;  %vm8367_vm13 = vmmov %vm8364_vm2 }
 0x57d   : > { %4353 = vst.msk [vmem:[#allocation4 + $0x10] sm:$0xf] %vm8360_vm15, %v4328_v23  ;;  %vm8368_vm15 = vcmask 97280  }
 0x57e   : > { %4352 = vst.msk [vmem:[#allocation4 + $0xc] sm:$0xf] %vm8361_vm11, %v4326_v62  ;;  %v4206_v52 = vpop.permute.xlu1 %4205  ;;  %vm8369_vm11 = vmmov %vm8365_vm1 }
 0x57f   : > { %4232 = vst.msk [vmem:[#allocation4 + $0x18] sm:$0xf] %vm8362_vm7, %v4208_v33  ;;  %v4212_v38 = vpop.permute.xlu0 %4211  ;;  %vm8370_vm7 = vmmov %vm8359_vm0 }
 0x580   : > { %4231 = vst.msk [vmem:[#allocation4 + $0x14] sm:$0xf] %vm8363_vm5, %v4206_v52  ;;  %vm8372_vm5 = vmmov %vm8365_vm1 }
 0x581   : > { %4234 = vst.msk [vmem:[#allocation4 + $0x20] sm:$0xf] %vm8364_vm2, %v4212_v38  ;;  %v4525_v50 = vsel %vm8372_vm5, %v6176_v6, 0  ;;  %vm8373_vm2 = vmmov %vm8359_vm0 }
 0x582   : > { %v6169_v9 = vld [vmem:[#allocation5] sm:$0x1f]   ;;  %v4210_v47 = vpop.permute.xlu1 %4209  ;;  %vm8382_vm5 = vmmov %vm8365_vm1 }
 0x583   : > { %v3969_v56 = vsel %vm3967_vm10, %v6169_v9, 0  ;;  %v4332_v55 = vpop.permute.xlu0 %4331  ;;  %4233 = vst.msk [vmem:[#allocation4 + $0x1c] sm:$0xf] %vm8367_vm13, %v4210_v47  ;;  %v6172_v28 = vld [vmem:[#allocation4 + $0x4] sm:$0xff]   ;;  %vm8371_vm10 = vmmov %vm8359_vm0  ;;  %v4642_v29 = vsel %vm8382_vm5, %v6182_v20, 0  ;;  %vm8394_vm5 = vcmask 1045509  }
 0x584   : > { %5806 = vmatpush3.bf16.msra.mxu1 %v3969_v56  ;;  %4355 = vst.msk [vmem:[#allocation4 + $0x18] sm:$0xf] %vm8359_vm0, %v4332_v55 }
 0x585   : > { %5970 = vmatprep.subr.msk.bf16.mxu1 %vm8366_vm9, %v6171_v54  ;;  %v6173_v27 = vld [vmem:[#allocation4 + $0xc] sm:$0xff]   ;;  %vm8375_vm9 = vmmov %vm8367_vm13 }
 0x586   : > { %v4330_v16 = vpop.permute.xlu1 %4329  ;;  %vm8376_vm13 = vmmov %vm8359_vm0  ;;  %v6178_v5 = vld [vmem:[#allocation4 + $0x8] sm:$0xff]  }
 0x587   : > { %5808 = vmatmul.mubr.msk.bf16.vlgmr.msra.gmra.mrb[0].mxu1 %vm3963_vm4, %v6170_v25  ;;  %v4336_v49 = vpop.permute.xlu0 %4335  ;;  %4354 = vst.msk [vmem:[#allocation4 + $0x14] sm:$0xf] %vm8370_vm7, %v4330_v16  ;;  %vm8374_vm4 = vmmov %vm8368_vm15  ;;  %v6181_v4 = vld [vmem:[#allocation4 + $0x8] sm:$0xff]  }
 0x588   : > { %5812 = vmatpush3.bf16.msra.mxu1 %v4420_v3  ;;  %5813 = vmatprep.mubr.msk.bf16.mxu1 %vm8368_vm15, %v6172_v28  ;;  %4357 = vst.msk [vmem:[#allocation4 + $0x20] sm:$0xf] %vm8371_vm10, %v4336_v49  ;;  %vm8377_vm0 = vmmov %vm8374_vm4 }
 0x589   : > { %5971 = vmatprep.subr.msk.bf16.mxu1 %vm8369_vm11, %v6176_v6  ;;  %vm8378_vm15 = vmmov %vm8375_vm9 }
 0x58a   : > { %v4334_v17 = vpop.permute.xlu1 %4333  ;;  %vm8379_vm11 = vmmov %vm8377_vm0 }
 0x58b   : > { %4356 = vst.msk [vmem:[#allocation4 + $0x1c] sm:$0xf] %vm8373_vm2, %v4334_v17  ;;  %v4320_v22 = vpop.permute.xlu0 %4319  ;;  %vm8380_vm7 = vmmov %vm8373_vm2 }
 0x58c   : > { %vm8381_vm10 = vmmov %vm8377_vm0 }
 0x58d   : > { %vm8383_vm2 = vmmov %vm8377_vm0 }
 0x58e   : > { %v4196_v63 = vpop.permute.xlu1 %4195  ;;  %v6174_v51 = vld [vmem:[#allocation4 + $0x14] sm:$0xff]  }
 0x58f   : > { %5814 = vmatmul.mubr.msk.bf16.vlgmr.msra.gmra.mrb[24].mxu1 %vm8374_vm4, %v6173_v27  ;;  %4226 = vst.msk [vmem:[#allocation4] sm:$0xf] %vm8375_vm9, %v4196_v63  ;;  %v4338_v2 = vpop.permute.xlu0 %4337  ;;  %v6179_v24 = vld [vmem:[#allocation4 + $0x10] sm:$0xff]   ;;  %vm8384_vm4 = vmmov %vm8377_vm0 }
 0x590   : > { %5822 = vmatpush3.bf16.msra.mxu1 %v4525_v50  ;;  %4349 = vst.msk [vmem:[#allocation4] sm:$0xf] %vm8376_vm13, %v4320_v22  ;;  %5817 = vmatprep.mubr.msk.bf16.mxu1 %vm8377_vm0, %v6174_v51  ;;  %vm8387_vm9 = vmmov %vm8377_vm0  ;;  %v6183_v40 = vld [vmem:[#allocation4 + $0x10] sm:$0xff]  }
 0x591   : > { %5972 = vmatprep.subr.msk.bf16.mxu1 %vm8365_vm1, %v6182_v20  ;;  %vm8386_vm1 = vmmov %vm8377_vm0 }
 0x592   : > { %v6175_v21 = vld [vmem:[#allocation4 + $0x1c] sm:$0xff]   ;;  %v4214_v41 = vpop.permute.xlu1 %4213  ;;  %vm8388_vm13 = vmmov %vm8377_vm0 }
 0x593   : > { %4235 = vst.msk [vmem:[#allocation4 + $0x24] sm:$0xf] %vm8378_vm15, %v4214_v41  ;;  %v6180_v14 = vld [vmem:[#allocation4 + $0x18] sm:$0xff]   ;;  %vm8389_vm15 = vmmov %vm8377_vm0 }
 0x594   : > { %4358 = vst.msk [vmem:[#allocation4 + $0x24] sm:$0xf] %vm8380_vm7, %v4338_v2  ;;  %v6184_v7 = vld [vmem:[#allocation4 + $0x18] sm:$0xff]   ;;  %vm8392_vm7 = vcmask 1042434  }
 0x597   : > { %5818 = vmatmul.mubr.msk.bf16.gmra.mrb[28].mxu1 %vm8379_vm11, %v6175_v21  ;;  %v6177_v46 = vld [vmem:[#allocation4] sm:$0xff]   ;;  %vm8391_vm11 = vcmask 1044484  }
 0x598   : > { %5823 = vmatprep.mubr.msk.bf16.mxu1 %vm8381_vm10, %v6177_v46  ;;  %vm8393_vm10 = vcmask 1043459  }
 0x59b   : > { %v6185_v8 = vld [vmem:[#allocation4 + $0x20] sm:$0xff]  }
 0x59f   : > { %5824 = vmatmul.mubr.msk.bf16.vlgmr.msra.gmra.mrb[24].mxu1 %vm8383_vm2, %v6178_v5  ;;  %vm8395_vm2 = vmmov %vm8393_vm10 }
 0x5a0   : > { %5827 = vmatprep.mubr.msk.bf16.mxu1 %vm8384_vm4, %v6179_v24  ;;  %5832 = vmatpush3.bf16.msra.mxu1 %v4642_v29  ;;  %vm8396_vm4 = vcmask 1046534  }
 0x5a1   : > { %5841 = vmatprep.subr.bf16.mxu1 %v8385_v60 }
 0x5a7   : > { %5828 = vmatmul.mubr.msk.bf16.gmra.mrb[28].mxu1 %vm8386_vm1, %v6180_v14  ;;  %vm8397_vm1 = vmmov %vm8391_vm11 }
 0x5a8   : > { %5833 = vmatprep.mubr.msk.bf16.mxu1 %vm8387_vm9, %v6181_v4  ;;  %vm8398_vm9 = vmmov %vm8397_vm1 }
 0x5af   : > { %5834 = vmatmul.mubr.msk.bf16.vlgmr.msra.gmra.mrb[24].mxu1 %vm8388_vm13, %v6183_v40  ;;  %vm8399_vm13 = vmmov %vm8396_vm4 }
 0x5b0   : > { %5837 = vmatprep.mubr.msk.bf16.mxu1 %vm8377_vm0, %v6184_v7  ;;  %vm8400_vm0 = vmmov %vm8394_vm5 }
 0x5b7   : > { %5838 = vmatmul.mubr.msk.bf16.gmra.mrb[28].mxu1 %vm8389_vm15, %v6185_v8  ;;  %vm8401_vm15 = vcmask 1047559  }
 0x5b8   : > { %5843 = vmatprep.mubr.msk.bf16.mxu1 %vm8265_vm8, %v8385_v60  ;;  %vm8390_vm8 = vcmask 1041409  }
 0x682   : > { %v5835_v15 = vpop.f32.mrb[24].mxu1 }
 0x683   : > { %v4719_v45 = vpack.c.bf16 %v5835_v15, %v5835_v15  ;;  %v4678_v12 = vpop.f32.mrb[25].mxu1 }
 0x684   : > { %v5836_v31 = vpop.f32.mrb[26].mxu1  ;;  %v4717_v57 = vpack.c.bf16 %v4678_v12, %v4678_v12 }
 0x685   : > { %v4735_v61 = vunpack.c.l.b16 %v4719_v45  ;;  %v4720_v10 = vpack.c.bf16 %v5836_v31, %v5836_v31  ;;  %v4681_v13 = vpop.f32.mrb[27].mxu1 }
 0x686   : > { %v4718_v18 = vpack.c.bf16 %v4681_v13, %v4681_v13  ;;  %v7951_v58 = vunpack.c.l.b16 %v4717_v57 }
 0x687   : > { %v4736_v35 = vunpack.c.l.b16 %v4720_v10  ;;  %v7947_v43 = vrot.slane %v4735_v61, 6 }
 0x688   : > { %v4734_v48 = vunpack.c.l.b16 %v4718_v18 }
 0x689   : > { %v7949_v44 = vrot.slane %v4736_v35, 5 }
 0x68a   : > { %v7953_v30 = vrot.slane %v4734_v48, 7  ;;  %v5839_v39 = vpop.f32.mrb[28].mxu1 }
 0x68b   : > { %v4723_v32 = vpack.c.bf16 %v5839_v39, %v5839_v39  ;;  %v4694_v59 = vpop.f32.mrb[29].mxu1  ;;  %v4931_v11 = vsel %vm8390_vm8, %v7949_v44, %v7947_v43  ;;  %vm8402_vm8 = vmmov %vm8400_vm0 }
 0x68c   : > { %v4721_v19 = vpack.c.bf16 %v4694_v59, %v4694_v59  ;;  %v5840_v34 = vpop.f32.mrb[30].mxu1  ;;  %v4823_v42 = vsel %vm8391_vm11, %v7953_v30, %v7951_v58  ;;  %v4763_v37 = vsel %vm8392_vm7, %v7953_v30, %v7951_v58  ;;  %v4798_v23 = vsel %vm8393_vm10, %v7953_v30, %v7951_v58  ;;  %vm8404_vm7 = vmmov %vm8401_vm15 }
 0x68d   : > { %v4739_v62 = vunpack.c.l.b16 %v4723_v32  ;;  %v4724_v33 = vpack.c.bf16 %v5840_v34, %v5840_v34  ;;  %v4697_v54 = vpop.f32.mrb[31].mxu1  ;;  %v4824_v52 = vsel %vm8394_vm5, %v7947_v43, %v4823_v42  ;;  %v4764_v9 = vsel %vm8395_vm2, %v7947_v43, %v4763_v37  ;;  %vm8405_vm10 = vmmov %vm8404_vm7 }
 0x68e   : > { %v4737_v38 = vunpack.c.l.b16 %v4721_v19  ;;  %v4722_v56 = vpack.c.bf16 %v4697_v54, %v4697_v54  ;;  %v4825_v25 = vsel %vm8396_vm4, %v7949_v44, %v4824_v52  ;;  %v4765_v3 = vsel %vm8397_vm1, %v7949_v44, %v4764_v9  ;;  %vm8406_vm5 = vmmov %vm8400_vm0 }
 0x68f   : > { %v4751_v47 = vrot.slane %v4739_v62, 2  ;;  %v4740_v55 = vunpack.c.l.b16 %v4724_v33  ;;  %v4799_v6 = vsel %vm8398_vm9, %v7947_v43, %v4798_v23  ;;  %v4891_v28 = vsel %vm8399_vm13, %v7953_v30, %v7951_v58  ;;  %vm8407_vm2 = vmmov %vm8396_vm4 }
 0x690   : > { %v4747_v16 = vrot.slane %v4737_v38, 4  ;;  %v4738_v49 = vunpack.c.l.b16 %v4722_v56  ;;  %v4800_v27 = vsel %vm8400_vm0, %v7949_v44, %v4799_v6  ;;  %v4892_v50 = vsel %vm8401_vm15, %v7947_v43, %v4891_v28  ;;  %vm8410_vm9 = vmmov %vm8407_vm2 }
 0x691   : > { %v4753_v20 = vrot.slane %v4740_v55, 1  ;;  %v4863_v17 = vsel %vm8402_vm8, %v7953_v30, %v7951_v58  ;;  %vm8403_vm11 = vcmask 1041409   ;;  %v4930_v63 = vsel %vm8404_vm7, %v7953_v30, %v7951_v58  ;;  %vm8413_vm15 = vmmov %vm8407_vm2 }
 0x692   : > { %v4955_v22 = vsel %vm8403_vm11, %v7947_v43, %v7953_v30  ;;  %v4749_v51 = vrot.slane %v4738_v49, 3  ;;  %v4826_v2 = vsel %vm8405_vm10, %v4747_v16, %v4825_v25  ;;  %v4766_v21 = vsel %vm8406_vm5, %v4747_v16, %v4765_v3  ;;  %vm8408_vm4 = vmmov %vm8403_vm11 }
 0x693   : > { %v4801_v41 = vsel %vm8407_vm2, %v4747_v16, %v4800_v27  ;;  %v4803_v46 = vsel %vm8408_vm4, %v4753_v20, %v4751_v47  ;;  %vm8409_vm1 = vmmov %vm8408_vm4  ;;  %v4864_v29 = vsel %vm8410_vm9, %v7947_v43, %v4863_v17  ;;  %vm8411_vm13 = vcmask 1042434  }
 0x694   : > { %v4893_v5 = vsel %vm8409_vm1, %v4747_v16, %v7949_v44  ;;  %v4956_v24 = vsel %vm8411_vm13, %v7949_v44, %v4955_v22  ;;  %vm8412_vm0 = vmmov %vm8409_vm1  ;;  %v4767_v14 = vsel %vm8413_vm15, %v4749_v51, %v4766_v21  ;;  %vm8418_vm5 = vcmask 1043459  }
 0x695   : > { %v4827_v60 = vsel %vm8412_vm0, %v4751_v47, %v4749_v51  ;;  %vm8414_vm8 = vmmov %vm8404_vm7  ;;  %vm8419_vm2 = vcmask 1044484  }
 0x696   : > { %v4802_v4 = vsel %vm8414_vm8, %v4749_v51, %v4801_v41  ;;  %vm8415_vm11 = vmmov %vm8411_vm13 }
 0x697   : > { %v4894_v40 = vsel %vm8415_vm11, %v4749_v51, %v4893_v5  ;;  %vm8416_vm7 = vmmov %vm8415_vm11  ;;  %v4804_v15 = vpack.c.b16 %v4803_v46, %v4802_v4 }
 0x698   : > { %v4828_v7 = vsel %vm8416_vm7, %v4753_v20, %v4827_v60  ;;  %vm8417_vm10 = vmmov %vm8414_vm8  ;;  %v4895_v45 = vsel %vm8418_vm5, %v4751_v47, %v4894_v40 }
 0x699   : > { %v4768_v8 = vsel %vm8417_vm10, %v4751_v47, %v4767_v14  ;;  %v4829_v12 = vpack.c.b16 %v4828_v7, %v4826_v2  ;;  %v4896_v61 = vsel %vm8419_vm2, %v4753_v20, %v4895_v45  ;;  %vm8420_vm4 = vmmov %vm8414_vm8 }
 0x69a   : > { %v4769_v31 = vpack.c.b16 %v4753_v20, %v4768_v8  ;;  %v4865_v10 = vsel %vm8420_vm4, %v7949_v44, %v4864_v29  ;;  %v4897_v13 = vpack.c.b16 %v4896_v61, %v4892_v50  ;;  %vm8421_vm1 = vmmov %vm8412_vm0 }
 0x69b   : > { %v4866_v57 = vsel %vm8421_vm1, %v4749_v51, %v4747_v16  ;;  %vm8422_vm9 = vmmov %vm8418_vm5  ;;  %4830 = vrot.lane.b32.xlu0 %v4829_v12, %s6252_s23 }
 0x69c   : > { %v4957_v18 = vsel %vm8422_vm9, %v4747_v16, %v4956_v24  ;;  %vm8423_vm13 = vmmov %vm8416_vm7  ;;  %4770 = vrot.lane.b32.xlu1 %v4769_v31, %s6252_s23 }
 0x69d   : > { %v4932_v35 = vsel %vm8423_vm13, %v4747_v16, %v4931_v11  ;;  %vm8424_vm0 = vmmov %vm8416_vm7  ;;  %vm8428_vm7 = vcmask 1045509  }
 0x69e   : > { %v4867_v48 = vsel %vm8424_vm0, %v4751_v47, %v4866_v57  ;;  %vm8425_vm15 = vmmov %vm8419_vm2 }
 0x69f   : > { %v4958_v39 = vsel %vm8425_vm15, %v4749_v51, %v4957_v18  ;;  %vm8426_vm8 = vmmov %vm8418_vm5  ;;  %4805 = vrot.lane.b32.xlu0 %v4804_v15, %s6252_s23 }
 0x6a0   : > { %v4933_v32 = vsel %vm8426_vm8, %v4749_v51, %v4932_v35  ;;  %vm8427_vm11 = vmmov %vm8418_vm5  ;;  %v4959_v19 = vsel %vm8428_vm7, %v4751_v47, %v4958_v39  ;;  %4898 = vrot.lane.b32.xlu1 %v4897_v13, %s6252_s23 }
 0x6a1   : > { %v4868_v59 = vsel %vm8427_vm11, %v4753_v20, %v4867_v48  ;;  %vm8429_vm10 = vmmov %vm8419_vm2  ;;  %vm8431_vm2 = vcmask 1046534   ;;  %vm8439_vm11 = vcmask 31744  }
 0x6a2   : > { %v4934_v34 = vsel %vm8429_vm10, %v4751_v47, %v4933_v32  ;;  %vm8430_vm5 = vmmov %vm8421_vm1  ;;  %v4869_v42 = vpack.c.b16 %v4868_v59, %v4865_v10  ;;  %v4960_v37 = vsel %vm8431_vm2, %v4753_v20, %v4959_v19 }
 0x6a3   : > { %v4742_v11 = vsel %vm8430_vm5, %v7953_v30, %v7951_v58  ;;  %vm8432_vm4 = vmmov %vm8428_vm7  ;;  %v4961_v33 = vpack.c.b16 %v4960_v37, %v7951_v58 }
 0x6a4   : > { %v4935_v23 = vsel %vm8432_vm4, %v4753_v20, %v4934_v34  ;;  %vm8433_vm1 = vmmov %vm8424_vm0  ;;  %4870 = vrot.lane.b32.xlu0 %v4869_v42, %s6252_s23 }
 0x6a5   : > { %v4744_v62 = vsel %vm8433_vm1, %v7947_v43, %v4742_v11  ;;  %v8032_v54 = vpack.c.b16 %v4935_v23, %v4930_v63  ;;  %vm8434_vm9 = vmmov %vm8426_vm8  ;;  %vm8438_vm8 = vcmask 1047559   ;;  %4962 = vrot.lane.b32.xlu1 %v4961_v33, %s6252_s23 }
 0x6a6   : > { %v4746_v52 = vsel %vm8434_vm9, %v7949_v44, %v4744_v62  ;;  %vm8435_vm13 = vmmov %vm8429_vm10  ;;  %vm4881_vm9 = vcmask 1045508  }
 0x6a7   : > { %v4748_v30 = vsel %vm8435_vm13, %v4747_v16, %v4746_v52  ;;  %vm8436_vm0 = vmmov %vm8432_vm4 }
 0x6a8   : > { %v4750_v9 = vsel %vm8436_vm0, %v4749_v51, %v4748_v30  ;;  %vm8437_vm15 = vmmov %vm8431_vm2  ;;  %vm4880_vm2 = vcmask 1041408  }
 0x6a9   : > { %v4752_v38 = vsel %vm8437_vm15, %v4751_v47, %v4750_v9  ;;  %4937 = vrot.lane.b32.xlu1 %v8032_v54, %s6252_s23  ;;  %vm8440_vm7 = vmmov %vm8439_vm11 }
 0x6aa   : > { %v4754_v56 = vsel %vm8438_vm8, %v4753_v20, %v4752_v38  ;;  %vm8441_vm10 = vmmov %vm8440_vm7  ;;  %vm8449_vm8 = vcmask 60416  }
 0x6ab   : > { %v4755_v43 = vpack.c.b16 %v4754_v56, %v4754_v56  ;;  %vm8442_vm5 = vmmov %vm8440_vm7 }
 0x6ac   : > { %vm8443_vm4 = vmmov %vm8442_vm5 }
 0x6ad   : > { %4756 = vrot.lane.b32.xlu0 %v4755_v43, %s6252_s23  ;;  %vm8444_vm1 = vmmov %vm8443_vm4  ;;  %s8451_s23 = smov 24  }
 0x6ae   : > { %vm8056_vm13 = vmor %vm4880_vm2, %vm4881_vm9  ;;  %vm4861_vm2 = vcmask 257216   ;;  %vm4991_vm9 = vcmask 519616  }
 0x6af   : > { %vm8447_vm0 = vmmov %vm8444_vm1 }
 0x6b0   : > { %vm8448_vm15 = vmmov %vm8447_vm0 }
 0x70d   : > { %v4831_v44 = vpop.permute.xlu0 %4830 }
 0x70e   : > { %v4771_v58 = vpop.permute.xlu1 %4770  ;;  %v4834_v25 = vsel %vm8439_vm11, %v4829_v12, %v4831_v44  ;;  %vm4973_vm11 = vsmask.f32 4368 }
 0x70f   : > { %v4774_v3 = vsel %vm8440_vm7, %v4769_v31, %v4771_v58  ;;  %v5497_v55 = vcombine.low %v4834_v25, %v4834_v25  ;;  %v5498_v6 = vcombine.high %v4834_v25, %v4834_v25  ;;  %vm8452_vm7 = vnez %v8353_v26 }
 0x710   : > { %v5492_v47 = vcombine.low %v4774_v3, %v4774_v3  ;;  %v5493_v22 = vcombine.high %v4774_v3, %v4774_v3 }
 0x711   : > { %v4841_v28 = vshrl.u32 %v5497_v55, 16  ;;  %v4806_v16 = vpop.permute.xlu0 %4805  ;;  %v4844_v27 = vshll.u32 %v5497_v55, 16  ;;  %v4850_v21 = vshrl.u32 %v5498_v6, 16  ;;  %v4853_v40 = vshll.u32 %v5498_v6, 16 }
 0x712   : > { %v4899_v49 = vpop.permute.xlu1 %4898  ;;  %v4781_v50 = vshrl.u32 %v5492_v47, 16  ;;  %v4784_v20 = vshll.u32 %v5492_v47, 16  ;;  %v4809_v17 = vsel %vm8441_vm10, %v4804_v15, %v4806_v16  ;;  %v4790_v7 = vshll.u32 %v5493_v22, 16 }
 0x713   : > { %v5494_v2 = vcombine.low %v4809_v17, %v4809_v17  ;;  %v5495_v41 = vcombine.high %v4809_v17, %v4809_v17  ;;  %v4902_v46 = vsel %vm8442_vm5, %v4897_v13, %v4899_v49  ;;  %v4843_v24 = vrot.slane %v4841_v28, 5 }
 0x714   : > { %v4783_v63 = vrot.slane %v4781_v50, 4  ;;  %v4786_v51 = vrot.slane %v4784_v20, 5  ;;  %v4846_v60 = vrot.slane %v4844_v27, 6  ;;  %v5502_v4 = vcombine.low %v4902_v46, %v4902_v46 }
 0x715   : > { %v5496_v8 = vrot.slane %v5494_v2, 9  ;;  %v4817_v45 = vrot.slane %v5495_v41, 5  ;;  %v5503_v10 = vcombine.high %v4902_v46, %v4902_v46  ;;  %v4852_v37 = vrot.slane %v4850_v21, 5 }
 0x716   : > { %v4871_v5 = vpop.permute.xlu0 %4870  ;;  %v4787_v14 = vor.u32 %v4786_v51, %v4783_v63  ;;  %v4909_v12 = vshrl.u32 %v5502_v4, 16  ;;  %v4912_v31 = vshll.u32 %v5502_v4, 16  ;;  %v4847_v18 = vor.u32 %v4846_v60, %v4843_v24  ;;  %v5163_v4 = vld [vmem:[%s8150_s7] ss:$0 sm:$0xff] }
 0x717   : > { %v4963_v29 = vpop.permute.xlu1 %4962  ;;  %v4874_v15 = vsel %vm8443_vm4, %v4869_v42, %v4871_v5  ;;  %v4855_v42 = vrot.slane %v4853_v40, 6  ;;  %v4792_v23 = vrot.slane %v4790_v7, 5  ;;  %v4818_v62 = vsel %vm7771_vm6, %v5496_v8, %v4817_v45 }
 0x718   : > { %v4966_v61 = vsel %vm8444_vm1, %v4961_v33, %v4963_v29  ;;  %v5499_v57 = vcombine.low %v4874_v15, %v4874_v15  ;;  %v5500_v13 = vcombine.high %v4874_v15, %v4874_v15  ;;  %v4788_v35 = vrot.slane %v4787_v14, 4  ;;  %4819 = vrot.lane.b32.xlu0 %v4818_v62, %s6260_s21  ;;  %v6186_v14 = vld [vmem:[%s8148_s5] sm:$0xff]   ;;  %s326_s21 = sand.u32 1, %s6241_s28  }
 0x719   : > { %v4911_v48 = vrot.slane %v4909_v12, 6  ;;  %v4914_v59 = vrot.slane %v4912_v31, 7  ;;  %v5508_v11 = vcombine.high %v4966_v61, %v4966_v61  ;;  %v4918_v52 = vshrl.u32 %v5503_v10, 16  ;;  %s5159_s25 = sshll.u32 %s326_s21, 4 }
 0x71a   : > { %v5501_v19 = vrot.slane %v5499_v57, 10  ;;  %v4885_v34 = vrot.slane %v5500_v13, 6  ;;  %v4921_v30 = vshll.u32 %v5503_v10, 16  ;;  %v4848_v56 = vrot.slane %v4847_v18, 4  ;;  %s328_s19 = scalar_lea.vmem [#allocation6], %s5159_s25 }
 0x71b   : > { %v4938_v39 = vpop.permute.xlu1 %4937  ;;  %v4915_v0 = vor.u32 %v4914_v59, %v4911_v48  ;;  %v4981_v25 = vshrl.u32 %v5508_v11, 16  ;;  %v4793_v3 = vsel %vm7073_vm14, %v4788_v35, %v4792_v23  ;;  %v4920_v28 = vrot.slane %v4918_v52, 6  ;;  %s5069_s20 = sshll.u32 %s328_s19, 4  ;;  %s8094_s20 = int_to_ptr.vmem [resolvable:$true] %s5069_s20 }
 0x71c   : > { %v4941_v9 = vsel %vm8447_vm0, %v8032_v54, %v4938_v39  ;;  %v4886_v55 = vsel %vm8056_vm13, %v5501_v19, %v4885_v34  ;;  %4794 = vrot.lane.b32.xlu1 %v4793_v3, %s6251_s22  ;;  %v4856_v54 = vor.u32 %v4855_v42, %v4852_v37  ;;  %v5507_v16 = vcombine.low %v4966_v61, %v4966_v61  ;;  %s6187_s9 = scalar_lea.vmem %s8094_s20, 256 }
 0x71d   : > { %v5504_v44 = vcombine.low %v4941_v9, %v4941_v9  ;;  %v5505_v58 = vcombine.high %v4941_v9, %v4941_v9  ;;  %4887 = vrot.lane.b32.xlu0 %v4886_v55, %s6258_s13  ;;  %v4916_v27 = vrot.slane %v4915_v0, 4  ;;  %v4983_v50 = vrot.slane %v4981_v25, 7  ;;  %s8453_s13 = smov 56   ;;  %p6188_p11 = scmp.ne.s32.totalorder %s8094_s20, %s6187_s9 }
 0x71e   : > { %vm8450_vm14 = vnez %v8211_v53  ;;  %vm4972_vm6 = vsmask.f32 256  ;;  %v4976_v17 = vshrl.u32 %v5507_v16, 16  ;;  %v4984_v22 = vshll.u32 %v5508_v11, 16 }
 0x71f   : > { %v4757_v32 = vpop.permute.xlu0 %4756  ;;  %v5506_v47 = vrot.slane %v5504_v44, 11  ;;  %v4949_v6 = vrot.slane %v5505_v58, 7  ;;  %v4857_v36 = vsel %vm8450_vm14, %v4848_v56, %v4856_v54  ;;  %vm8454_vm10 = vcmask 126016   ;;  %p6189_p12 = pnand %p6188_p11, %p6352_p5 }
 0x720   : > { %v4760_v38 = vsel %vm8448_vm15, %v4755_v43, %v4757_v32  ;;  %v4923_v43 = vrot.slane %v4921_v30, 7  ;;  %4858 = vrot.lane.b32.xlu1 %v4857_v36, %s8451_s23  ;;  %v4986_v63 = vor.u32 %v4984_v22, %v4983_v50  ;;  %v5509_v1 = vrot.slane %v4976_v17, 11 }
 0x721   : > { %4762 = vst.msk [vmem:[#allocation5] sm:$0xf] %vm8449_vm8, %v4760_v38  ;;  %v4950_v49 = vsel %vm7061_vm12, %v5506_v47, %v4949_v6  ;;  %vm4974_vm12 = vmor %vm4972_vm6, %vm4973_vm11  ;;  %vm8455_vm5 = vcmask 191616   ;;  %vm8456_vm4 = vcmask 322816   ;;  %vm8457_vm1 = vcmask 454016   ;;  %p6190_p13 = pneg %p6189_p12 }
 0x722   : > { %v4924_v20 = vor.u32 %v4923_v43, %v4920_v28  ;;  %4951 = vrot.lane.b32.xlu0 %v4950_v49, %s6259_s18  ;;  %v4987_v2 = vsel %vm4974_vm12, %v5509_v1, %v4986_v63  ;;  %vm5005_vm13 = vcmask 1043456   ;;  %vm5001_vm0 = vcmask 64512   ;;  %s6267_s18 = smov [#allocation6]  }
 0x723   : > { %s6191_s25 = sshll.u32 %s6267_s18, 4  ;;  %s6192_s25 = int_to_ptr.vmem [resolvable:$false] %s6191_s25 }
 0x724   : > { %v4925_v51 = vsel %vm8452_vm7, %v4916_v27, %v4924_v20  ;;  %s6193_s17 = scalar_lea.vmem %s6192_s25, 512  ;;  %p6194_p0 = scmp.lt.s32.totalorder %s8094_s20, %s6192_s25 }
 0x725   : > { %4926 = vrot.lane.b32.xlu1 %v4925_v51, %s6256_s24  ;;  %s8101_s24 = scalar_lea.sflag [#allocation7], %s326_s21  ;;  %p6195_p1 = scmp.lt.s32.totalorder %s6193_s17, %s6187_s9 }
 0x727   : > { %p6196_p2 = por %p6195_p1, %p6194_p0 }
 0x729   : > { %4988 = vrot.lane.b32.xlu1 %v4987_v2, %s8453_s13  ;;  %s8099_s13 = scalar_lea.hbm %s8151_s8, %s5561_s26  ;;  %p6197_p3 = pnand %p6196_p2, %p6190_p13 }
 0x78a   : > { %v4820_v53 = vpop.permute.xlu0 %4819 }
 0x78e   : > { %v4795_v21 = vpop.permute.xlu1 %4794 }
 0x78f   : > { %4797 = vst.msk [vmem:[#allocation5] sm:$0xf] %vm8454_vm10, %v4795_v21  ;;  %v4888_v41 = vpop.permute.xlu0 %4887 }
 0x790   : > { %4822 = vst.msk [vmem:[#allocation5] sm:$0xf] %vm8455_vm5, %v4820_v53 }
 0x792   : > { %v4859_v46 = vpop.permute.xlu1 %4858 }
 0x793   : > { %4862 = vst.msk [vmem:[#allocation5] sm:$0xf] %vm4861_vm2, %v4859_v46 }
 0x794   : > { %4890 = vst.msk [vmem:[#allocation5] sm:$0xf] %vm8456_vm4, %v4888_v41  ;;  %v4952_v5 = vpop.permute.xlu0 %4951 }
 0x797   : > { %v4927_v26 = vpop.permute.xlu1 %4926 }
 0x798   : > { %4929 = vst.msk [vmem:[#allocation5] sm:$0xf] %vm3815_vm3, %v4927_v26  ;;  %vm5052_vm3 = vcmask 523264  }
 0x799   : > { %4954 = vst.msk [vmem:[#allocation5] sm:$0xf] %vm8457_vm1, %v4952_v5 }
 0x79b   : > { %v4989_v29 = vpop.permute.xlu1 %4988 }
 0x79c   : > { %4992 = vst.msk [vmem:[#allocation5] sm:$0xf] %vm4991_vm9, %v4989_v29 }
 0x7a3   : > { %v4995_v24 = vld [vmem:[#allocation5] sm:$0xf] }
 0x7a4   : > { %v5007_v60 = vsel %vm5005_vm13, %v4995_v24, 0 }
 0x7a5   : > { %5842 = vmatpush3.bf16.msra.mxu1 %v5007_v60 }
 0x7a8   : > { %5844 = vmatmul.mubr.msk.bf16.vlgmr.msra.gmra.mrb[0].mxu1 %vm5001_vm0, %v6186_v14 }
 0x87b   : > { %v5043_v40 = vpop.f32.mrb[0].mxu1 }
 0x87c   : > { %v5849_v7 = vadd.f32 %v5163_v4, %v5043_v40  ;;  %v5845_v8 = vpop.f32.mrb[1].mxu1 }
 0x87d   : > { %v5046_v15 = vpop.f32.mrb[2].mxu1 }
 0x87e   : > { %5053 = vst.msk [vmem:[%s328_s19] sm:$0xff] %vm5052_vm3, %v5849_v7  ;;  %v5850_v45 = vadd.f32 %v5163_v4, %v5046_v15  ;;  %v5846_v12 = vpop.f32.mrb[3].mxu1 }
 0x880   : > { %5054 = vst.msk [vmem:[%s328_s19 + $0x8] sm:$0xff] %vm5052_vm3, %v5850_v45 }
 0x881   : > { %6200 = shalt.err (!%p6197_p3)
}
 0x882   : > { %s6201_s21 = scalar_lea.hbm %s8099_s13, 256  ;;  %s6205_s26 = scalar_lea.hbm %s8151_s8, 512 }
 0x883   : > { %p6202_p4 = scmp.ne.s32.totalorder %s8099_s13, %s6201_s21  ;;  %p6206_p9 = scmp.lt.u32.totalorder %s8099_s13, %s8151_s8 }
 0x884   : > { %p6207_p10 = scmp.lt.u32.totalorder %s6205_s26, %s6201_s21  ;;  %p6209_p12 = scmp.lt.u32.totalorder %s6201_s21, %s8099_s13 }
 0x885   : > { %p6203_p7 = pnand %p6202_p4, %p6352_p5 }
 0x886   : > { %p6208_p11 = por %p6207_p10, %p6206_p9 }
 0x887   : > { %p6204_p8 = pneg %p6203_p7 }
 0x888   : > { %p6210_p13 = por %p6209_p12, %p6208_p11 }
 0x88a   : > { %p6211_p0 = pnand %p6210_p13, %p6204_p8 }
 0x88c   : > { %6214 = shalt.err (!%p6211_p0)
}
 0x88d   : > { %s6268_s9 = smov 128  }
 0x88e   : > { %5976 = dma.vmem_to_hbm [thread:$0]  (%p6352_p5), %s8094_s20, 256, %s8099_s13, %s8101_s24, %s6268_s9, %s6268_s9, %s6251_s22  }
 0x88f PF: > { %p5982_p1 = scmp.ge.s32.totalorder %s6249_s30, 2  ;;  %s5084_s18 = sand.u32 1, %s6237_s27  }
 0x890   : > { %s5085_s25 = scalar_lea.sflag [#allocation7], %s5084_s18 }
 0x891   : > { %p5979_p2 = pnand %p5982_p1, %p6356_p6 }
 0x893   : > { %6232 = dma.done.wait (!%p5979_p2), %s5085_s25, 256  }
 0x894   : > { %6234 = vsyncadd (!%p5979_p2), %s5085_s25, 4294967040  ;;  %p18_p3 = scmp.ge.s32.totalorder %s6339_s11, 4   ;;  %s8458_s27 = smov %s6241_s28 }
 0x895   : > { %s8459_s28 = smov %s6245_s29  ;;  %s8460_s29 = smov %s6350_s14 }
 0x896   : > { %s8461_s30 = smov %s6339_s11  ;;  %20 = sbr.rel (!%p18_p3) target bundleno = 3 (0x3), region = 107 }
 0x89d   :  { %5090 = vsyncpa [#allocation7], 1 }
 0x89e   :  { %5092 = vsyncpa [#allocation7 + $0x1], 1 }

</bundles_post_ra>
